<compile_context>
chip_gen: v7x
topology: tpu7x:2x2x1
jax: 0.10.0
libtpu: 0.0.40
codegen_flags: <defaults>
</compile_context>

<pallas_src>
import functools
import math

import jax
import jax.numpy as jnp
from jax.experimental import pallas as pl
from jax.experimental.pallas import tpu as pltpu

SQRT2 = math.sqrt(2.0)


# ---------------------------------------------------------------------------
# helpers
# ---------------------------------------------------------------------------
def _vmem_limit_bytes():
    """Generation-aware scoped-VMEM limit (v5e/v6e: 128 MiB phys, v7x: 64 MiB)."""
    try:
        cap = pltpu.get_tpu_info().vmem_capacity_bytes
        return max(16 * 1024 * 1024, min(int(cap * 0.55), 96 * 1024 * 1024))
    except Exception:
        return 32 * 1024 * 1024


def _erf(x):
    # Abramowitz & Stegun 7.1.26 (|abs err| < 1.5e-7): exp + arithmetic only,
    # lowers cleanly in Mosaic. Only used on the tiny reweight tensor.
    a1, a2, a3, a4, a5 = (0.254829592, -0.284496736, 1.421413741,
                          -1.453152027, 1.061405429)
    p = 0.3275911
    ax = jnp.abs(x)
    t = 1.0 / (1.0 + p * ax)
    poly = ((((a5 * t + a4) * t + a3) * t + a2) * t + a1) * t
    y = 1.0 - poly * jnp.exp(-ax * ax)
    return jnp.where(x >= 0, y, -y)


def _gelu(x):
    # exact (erf-based) GELU, matching torch.nn.GELU() default
    return 0.5 * x * (1.0 + _erf(x / SQRT2))


# ---------------------------------------------------------------------------
# fused kernel: one batch element per grid step
# ---------------------------------------------------------------------------
def _vip_fused_kernel(xh_ref, xw_ref, xc_ref,
                      wh_ref, bh_ref, ww_ref, bw_ref, wc_ref, bc_ref,
                      w1_ref, b1_ref, w2_ref, b2_ref,
                      pw_ref, pb_ref,
                      out_ref,
                      hperm_ref, wt_ref, wperm_ref,
                      *, H, W, sd, S):
    C = sd * S
    HW = H * W

    # ---- branch linears on the MXU (bf16 x bf16 -> f32 accumulate) --------
    h2 = jnp.dot(xh_ref[...], wh_ref[...],
                 preferred_element_type=jnp.float32) + bh_ref[...]   # (sd*W, C)
    w2 = jnp.dot(xw_ref[...], ww_ref[...],
                 preferred_element_type=jnp.float32) + bw_ref[...]   # (sd*H, C)
    c = jnp.dot(xc_ref[...], wc_ref[...],
                preferred_element_type=jnp.float32) + bc_ref[...]    # (HW,  C)

    # ---- inverse branch permutes as in-VMEM static block copies -----------
    # h branch: h_final[h*W+w, j*S+s] = h2[j*W+w, h*S+s]   (pure block copies)
    for j in range(sd):
        for h in range(H):
            hperm_ref[h * W:(h + 1) * W, j * S:(j + 1) * S] = \
                h2[j * W:(j + 1) * W, h * S:(h + 1) * S]
    # w branch stage 1: xw rows are (j, h), so
    #   wt[w*H+h, j*S+s] = w2[j*H+h, w*S+s]  is again a pure block copy
    for j in range(sd):
        for w in range(W):
            wt_ref[w * H:(w + 1) * H, j * S:(j + 1) * S] = \
                w2[j * H:(j + 1) * H, w * S:(w + 1) * S]
    # w branch stage 2: row permutation (w, h) -> (h, w), full-lane (1, C) rows
    for h in range(H):
        for w in range(W):
            wperm_ref[h * W + w:h * W + w + 1, :] = \
                wt_ref[w * H + h:w * H + h + 1, :]

    hp = hperm_ref[...]
    wp = wperm_ref[...]

    # ---- fused spatial mean of (h + w + c): no extra HBM pass --------------
    mean = jnp.sum(hp + wp + c, axis=0, keepdims=True) * (1.0 / HW)   # (1, C)

    # ---- reweight MLP (C -> C/4 -> 3C) + 3-way softmax, all in VMEM --------
    m8 = jnp.broadcast_to(mean, (8, C))            # pad M to 8 sublanes
    z = _gelu(jnp.dot(m8, w1_ref[...],
                      preferred_element_type=jnp.float32) + b1_ref[...])
    r = jnp.dot(z, w2_ref[...],
                preferred_element_type=jnp.float32) + b2_ref[...]     # (8, 3C)
    r0 = r[0:1, 0:C]
    r1 = r[0:1, C:2 * C]
    r2 = r[0:1, 2 * C:3 * C]
    mx = jnp.maximum(jnp.maximum(r0, r1), r2)
    e0 = jnp.exp(r0 - mx)
    e1 = jnp.exp(r1 - mx)
    e2 = jnp.exp(r2 - mx)
    denom = e0 + e1 + e2                            # exact divide: weights sum to 1
    a0 = e0 / denom
    a1 = e1 / denom
    a2 = e2 / denom

    # ---- combine + proj -----------------------------------------------------
    comb = (hp * a0 + wp * a1 + c * a2).astype(jnp.bfloat16)
    out_ref[...] = jnp.dot(comb, pw_ref[...],
                           preferred_element_type=jnp.float32) + pb_ref[...]


# ---------------------------------------------------------------------------
# full WeightedPermuteMLP forward
# ---------------------------------------------------------------------------
def weighted_permute_mlp(x, kp, segment_dim):
    B, H, W, C = x.shape
    sd = segment_dim
    S = C // sd
    # mlp_h / mlp_w are nn.Linear(dim, dim) on the permuted views, which
    # requires H == W == segment_dim (H*S == W*S == C).
    assert sd * S == C and H * S == C and W * S == C
    HW = H * W
    C4 = C // 4

    # bf16 input-side permuted views (the post-linear permutes happen in-kernel)
    xb = x.astype(jnp.bfloat16)
    x5 = xb.reshape(B, H, W, sd, S)
    xh = x5.transpose(0, 3, 2, 1, 4).reshape(B, sd * W, H * S)   # rows (j, w)
    xw = x5.transpose(0, 3, 1, 2, 4).reshape(B, sd * H, W * S)   # rows (j, h)
    xc = xb.reshape(B, HW, C)

    kern = functools.partial(_vip_fused_kernel, H=H, W=W, sd=sd, S=S)

    def act(rows):
        return pl.BlockSpec((None, rows, C), lambda b: (b, 0, 0))

    def const2(shape):
        return pl.BlockSpec(shape, lambda b: (0,) * len(shape))   # VMEM-resident

    out = pl.pallas_call(
        kern,
        out_shape=jax.ShapeDtypeStruct((B, HW, C), jnp.float32),
        grid=(B,),
        in_specs=[act(sd * W), act(sd * H), act(HW),
                  const2((C, C)), const2((1, C)),          # mlp_h
                  const2((C, C)), const2((1, C)),          # mlp_w
                  const2((C, C)), const2((1, C)),          # mlp_c
                  const2((C, C4)), const2((1, C4)),        # reweight fc1
                  const2((C4, 3 * C)), const2((1, 3 * C)),  # reweight fc2 (packed)
                  const2((C, C)), const2((1, C))],         # proj
        out_specs=act(HW),
        scratch_shapes=[pltpu.VMEM((HW, C), jnp.float32),   # h permuted
                        pltpu.VMEM((HW, C), jnp.float32),   # w permuted, (w,h) rows
                        pltpu.VMEM((HW, C), jnp.float32)],  # w permuted, (h,w) rows
        compiler_params=pltpu.CompilerParams(
            dimension_semantics=("parallel",),               # B >= 2 grid steps
            vmem_limit_bytes=_vmem_limit_bytes()),
    )(xh, xw, xc,
      kp["mlp_h_w"], kp["mlp_h_b"], kp["mlp_w_w"], kp["mlp_w_b"],
      kp["mlp_c_w"], kp["mlp_c_b"], kp["rw1_w"], kp["rw1_b"],
      kp["rw2_w"], kp["rw2_b"], kp["proj_w"], kp["proj_b"])
    return out.reshape(B, H, W, C)


# ---------------------------------------------------------------------------
# parameters: PyTorch-convention init + kernel-ready packing
# ---------------------------------------------------------------------------
def init_params(key, dim):
    """PyTorch layout: weight (out_features, in_features), bias (out_features,)."""
    C = dim
    C4 = dim // 4
    keys = jax.random.split(key, 6)

    def lin(k, out_f, in_f):
        kw, kb = jax.random.split(k)
        bound = 1.0 / math.sqrt(in_f)
        wgt = jax.random.uniform(kw, (out_f, in_f), jnp.float32, -bound, bound)
        bia = jax.random.uniform(kb, (out_f,), jnp.float32, -bound, bound)
        return wgt, bia

    p = {}
    p["mlp_c_w"], p["mlp_c_b"] = lin(keys[0], C, C)
    p["mlp_h_w"], p["mlp_h_b"] = lin(keys[1], C, C)
    p["mlp_w_w"], p["mlp_w_b"] = lin(keys[2], C, C)
    p["rw1_w"], p["rw1_b"] = lin(keys[3], C4, C)
    p["rw2_w"], p["rw2_b"] = lin(keys[4], 3 * C, C4)
    p["proj_w"], p["proj_b"] = lin(keys[5], C, C)
    return p


def pack_params(p):
    """Kernel-ready params: (in, out) layout, big matmul weights in bf16,
    reweight fc2 packed to (C/4, 3C) with branch-chunked columns (PyTorch
    reshape(B, C, 3) convention de-interleaved)."""
    C4, C = p["rw1_w"].shape
    q = {}
    for name in ("mlp_h", "mlp_w", "mlp_c", "proj"):
        q[name + "_w"] = jnp.asarray(p[name + "_w"].T, jnp.bfloat16)
        q[name + "_b"] = p[name + "_b"].reshape(1, C).astype(jnp.float32)
    q["rw1_w"] = p["rw1_w"].T                                        # (C, C4)
    q["rw1_b"] = p["rw1_b"].reshape(1, C4)
    # PyTorch fc2 weight (3C, C4), output index o = c*3 + k  ->  (C4, 3C) with
    # column index k*C + c so branch k is the lane slice [k*C : (k+1)*C].
    q["rw2_w"] = p["rw2_w"].reshape(C, 3, C4).transpose(2, 1, 0).reshape(C4, 3 * C)
    q["rw2_b"] = p["rw2_b"].reshape(C, 3).T.reshape(1, 3 * C)
    return q


# ---------------------------------------------------------------------------
# pure-JAX reference (mirrors the PyTorch forward exactly, f32)
# ---------------------------------------------------------------------------
def weighted_permute_mlp_ref(x, p, segment_dim):
    B, H, W, C = x.shape
    sd = segment_dim
    S = C // sd

    def linear(v, wgt, bia):
        return v @ wgt.T + bia

    h = x.reshape(B, H, W, sd, S).transpose(0, 3, 2, 1, 4).reshape(B, sd, W, H * S)
    h = linear(h, p["mlp_h_w"], p["mlp_h_b"]).reshape(B, sd, W, H, S) \
        .transpose(0, 3, 2, 1, 4).reshape(B, H, W, C)
    w = x.reshape(B, H, W, sd, S).transpose(0, 1, 3, 2, 4).reshape(B, H, sd, W * S)
    w = linear(w, p["mlp_w_w"], p["mlp_w_b"]).reshape(B, H, sd, W, S) \
        .transpose(0, 1, 3, 2, 4).reshape(B, H, W, C)
    c = linear(x, p["mlp_c_w"], p["mlp_c_b"])

    a = (h + w + c).transpose(0, 3, 1, 2).reshape(B, C, -1).mean(axis=2)  # (B, C)
    a = linear(jax.nn.gelu(linear(a, p["rw1_w"], p["rw1_b"]), approximate=False),
               p["rw2_w"], p["rw2_b"])
    a = a.reshape(B, C, 3).transpose(2, 0, 1)
    a = jax.nn.softmax(a, axis=0)[:, :, None, None, :]

    out = h * a[0] + w * a[1] + c * a[2]
    return linear(out, p["proj_w"], p["proj_b"])


if __name__ == "__main__":
    B = 2
    segment_dim = 8
    H = W = segment_dim          # required: mlp_h / mlp_w are Linear(dim, dim)
    dim = 128                    # S = dim // segment_dim = 16 ; lane-dense C

    key = jax.random.PRNGKey(0)
    kx, kp = jax.random.split(key)
    x = jax.random.normal(kx, (B, H, W, dim), jnp.float32)
    tparams = init_params(kp, dim)
    kparams = pack_params(tparams)

    fwd = jax.jit(functools.partial(weighted_permute_mlp,
                                    segment_dim=segment_dim))
    out = fwd(x, kparams)
    jax.block_until_ready(out)
    assert out.shape == (B, H, W, dim) and out.dtype == jnp.float32

    # sanity check against the f32 reference (loose tol: bf16 MXU matmuls)
    ref = weighted_permute_mlp_ref(x, tparams, segment_dim)
    err = float(jnp.max(jnp.abs(out - ref)))
    assert err < 5e-2, f"max abs err {err}"
    print("KERNEL_OK")
</pallas_src>

<mosaic_0001>
module attributes {stable_mosaic.version = 11 : i64} {
  func.func @_vip_fused_kernel(%arg0: i32, %arg1: memref<1x64x128xbf16, #tpu.memory_space<vmem>>, %arg2: memref<1x64x128xbf16, #tpu.memory_space<vmem>>, %arg3: memref<1x64x128xbf16, #tpu.memory_space<vmem>>, %arg4: memref<128x128xbf16, #tpu.memory_space<vmem>>, %arg5: memref<1x128xf32, #tpu.memory_space<vmem>>, %arg6: memref<128x128xbf16, #tpu.memory_space<vmem>>, %arg7: memref<1x128xf32, #tpu.memory_space<vmem>>, %arg8: memref<128x128xbf16, #tpu.memory_space<vmem>>, %arg9: memref<1x128xf32, #tpu.memory_space<vmem>>, %arg10: memref<128x32xf32, #tpu.memory_space<vmem>>, %arg11: memref<1x32xf32, #tpu.memory_space<vmem>>, %arg12: memref<32x384xf32, #tpu.memory_space<vmem>>, %arg13: memref<1x384xf32, #tpu.memory_space<vmem>>, %arg14: memref<128x128xbf16, #tpu.memory_space<vmem>>, %arg15: memref<1x128xf32, #tpu.memory_space<vmem>>, %arg16: memref<1x64x128xf32, #tpu.memory_space<vmem>>, %arg17: memref<64x128xf32, #tpu.memory_space<vmem>>, %arg18: memref<64x128xf32, #tpu.memory_space<vmem>>, %arg19: memref<64x128xf32, #tpu.memory_space<vmem>>) attributes {dimension_semantics = [#tpu.dimension_semantics<parallel>], iteration_bounds = array<i64: 2>, scalar_prefetch = 0 : i64, scratch_operands = 3 : i64, tpu.core_type = #tpu.core_type<tc>, window_params = [{transform_indices = @transform_0, window_bounds = array<i64: 1, 64, 128>}, {transform_indices = @transform_1, window_bounds = array<i64: 1, 64, 128>}, {transform_indices = @transform_2, window_bounds = array<i64: 1, 64, 128>}, {pipeline_mode = #tpu.pipeline_mode<synchronous>, transform_indices = @transform_3, window_bounds = array<i64: 128, 128>}, {pipeline_mode = #tpu.pipeline_mode<synchronous>, transform_indices = @transform_4, window_bounds = array<i64: 1, 128>}, {pipeline_mode = #tpu.pipeline_mode<synchronous>, transform_indices = @transform_5, window_bounds = array<i64: 128, 128>}, {pipeline_mode = #tpu.pipeline_mode<synchronous>, transform_indices = @transform_6, window_bounds = array<i64: 1, 128>}, {pipeline_mode = #tpu.pipeline_mode<synchronous>, transform_indices = @transform_7, window_bounds = array<i64: 128, 128>}, {pipeline_mode = #tpu.pipeline_mode<synchronous>, transform_indices = @transform_8, window_bounds = array<i64: 1, 128>}, {pipeline_mode = #tpu.pipeline_mode<synchronous>, transform_indices = @transform_9, window_bounds = array<i64: 128, 32>}, {pipeline_mode = #tpu.pipeline_mode<synchronous>, transform_indices = @transform_10, window_bounds = array<i64: 1, 32>}, {pipeline_mode = #tpu.pipeline_mode<synchronous>, transform_indices = @transform_11, window_bounds = array<i64: 32, 384>}, {pipeline_mode = #tpu.pipeline_mode<synchronous>, transform_indices = @transform_12, window_bounds = array<i64: 1, 384>}, {pipeline_mode = #tpu.pipeline_mode<synchronous>, transform_indices = @transform_13, window_bounds = array<i64: 128, 128>}, {pipeline_mode = #tpu.pipeline_mode<synchronous>, transform_indices = @transform_14, window_bounds = array<i64: 1, 128>}, {transform_indices = @transform_15, window_bounds = array<i64: 1, 64, 128>}]} {
    %c0 = arith.constant 0 : index
    %c0_0 = arith.constant 0 : index
    %c0_1 = arith.constant 0 : index
    %0 = vector.load %arg1[%c0, %c0_0, %c0_1] : memref<1x64x128xbf16, #tpu.memory_space<vmem>>, vector<1x64x128xbf16>
    %1 = vector.shape_cast %0 : vector<1x64x128xbf16> to vector<64x128xbf16>
    %c0_2 = arith.constant 0 : index
    %c0_3 = arith.constant 0 : index
    %2 = vector.load %arg4[%c0_2, %c0_3] : memref<128x128xbf16, #tpu.memory_space<vmem>>, vector<128x128xbf16>
    %cst = arith.constant dense<0.000000e+00> : vector<64x128xf32>
    %3 = tpu.matmul %1, %2, %cst {dimension_numbers = #tpu.dot_dimension_numbers<[1], [0], [0], [1], [0, 0, 1, 1], [], []>} : vector<64x128xbf16>, vector<128x128xbf16>, vector<64x128xf32> -> vector<64x128xf32>
    %c0_4 = arith.constant 0 : index
    %c0_5 = arith.constant 0 : index
    %4 = vector.load %arg5[%c0_4, %c0_5] : memref<1x128xf32, #tpu.memory_space<vmem>>, vector<1x128xf32>
    %5 = vector.broadcast %4 : vector<1x128xf32> to vector<64x128xf32>
    %6 = arith.addf %3, %5 : vector<64x128xf32>
    %c0_6 = arith.constant 0 : index
    %c0_7 = arith.constant 0 : index
    %c0_8 = arith.constant 0 : index
    %7 = vector.load %arg2[%c0_6, %c0_7, %c0_8] : memref<1x64x128xbf16, #tpu.memory_space<vmem>>, vector<1x64x128xbf16>
    %8 = vector.shape_cast %7 : vector<1x64x128xbf16> to vector<64x128xbf16>
    %c0_9 = arith.constant 0 : index
    %c0_10 = arith.constant 0 : index
    %9 = vector.load %arg6[%c0_9, %c0_10] : memref<128x128xbf16, #tpu.memory_space<vmem>>, vector<128x128xbf16>
    %cst_11 = arith.constant dense<0.000000e+00> : vector<64x128xf32>
    %10 = tpu.matmul %8, %9, %cst_11 {dimension_numbers = #tpu.dot_dimension_numbers<[1], [0], [0], [1], [0, 0, 1, 1], [], []>} : vector<64x128xbf16>, vector<128x128xbf16>, vector<64x128xf32> -> vector<64x128xf32>
    %c0_12 = arith.constant 0 : index
    %c0_13 = arith.constant 0 : index
    %11 = vector.load %arg7[%c0_12, %c0_13] : memref<1x128xf32, #tpu.memory_space<vmem>>, vector<1x128xf32>
    %12 = vector.broadcast %11 : vector<1x128xf32> to vector<64x128xf32>
    %13 = arith.addf %10, %12 : vector<64x128xf32>
    %c0_14 = arith.constant 0 : index
    %c0_15 = arith.constant 0 : index
    %c0_16 = arith.constant 0 : index
    %14 = vector.load %arg3[%c0_14, %c0_15, %c0_16] : memref<1x64x128xbf16, #tpu.memory_space<vmem>>, vector<1x64x128xbf16>
    %15 = vector.shape_cast %14 : vector<1x64x128xbf16> to vector<64x128xbf16>
    %c0_17 = arith.constant 0 : index
    %c0_18 = arith.constant 0 : index
    %16 = vector.load %arg8[%c0_17, %c0_18] : memref<128x128xbf16, #tpu.memory_space<vmem>>, vector<128x128xbf16>
    %cst_19 = arith.constant dense<0.000000e+00> : vector<64x128xf32>
    %17 = tpu.matmul %15, %16, %cst_19 {dimension_numbers = #tpu.dot_dimension_numbers<[1], [0], [0], [1], [0, 0, 1, 1], [], []>} : vector<64x128xbf16>, vector<128x128xbf16>, vector<64x128xf32> -> vector<64x128xf32>
    %c0_20 = arith.constant 0 : index
    %c0_21 = arith.constant 0 : index
    %18 = vector.load %arg9[%c0_20, %c0_21] : memref<1x128xf32, #tpu.memory_space<vmem>>, vector<1x128xf32>
    %19 = vector.broadcast %18 : vector<1x128xf32> to vector<64x128xf32>
    %20 = arith.addf %17, %19 : vector<64x128xf32>
    %21 = vector.extract_strided_slice %6 {offsets = [0, 0], sizes = [8, 16], strides = [1, 1]} : vector<64x128xf32> to vector<8x16xf32>
    %c0_22 = arith.constant 0 : index
    %c0_23 = arith.constant 0 : index
    %22 = vector.load %arg17[%c0_22, %c0_23] : memref<64x128xf32, #tpu.memory_space<vmem>>, vector<8x16xf32>
    tpu.vector_store %arg17[%c0_22, %c0_23], %21 {strides = array<i32>} : memref<64x128xf32, #tpu.memory_space<vmem>>, vector<8x16xf32>,
    %23 = vector.extract_strided_slice %6 {offsets = [0, 16], sizes = [8, 16], strides = [1, 1]} : vector<64x128xf32> to vector<8x16xf32>
    %c8 = arith.constant 8 : index
    %c0_24 = arith.constant 0 : index
    %24 = vector.load %arg17[%c8, %c0_24] : memref<64x128xf32, #tpu.memory_space<vmem>>, vector<8x16xf32>
    tpu.vector_store %arg17[%c8, %c0_24], %23 {strides = array<i32>} : memref<64x128xf32, #tpu.memory_space<vmem>>, vector<8x16xf32>,
    %25 = vector.extract_strided_slice %6 {offsets = [0, 32], sizes = [8, 16], strides = [1, 1]} : vector<64x128xf32> to vector<8x16xf32>
    %c16 = arith.constant 16 : index
    %c0_25 = arith.constant 0 : index
    %26 = vector.load %arg17[%c16, %c0_25] : memref<64x128xf32, #tpu.memory_space<vmem>>, vector<8x16xf32>
    tpu.vector_store %arg17[%c16, %c0_25], %25 {strides = array<i32>} : memref<64x128xf32, #tpu.memory_space<vmem>>, vector<8x16xf32>,
    %27 = vector.extract_strided_slice %6 {offsets = [0, 48], sizes = [8, 16], strides = [1, 1]} : vector<64x128xf32> to vector<8x16xf32>
    %c24 = arith.constant 24 : index
    %c0_26 = arith.constant 0 : index
    %28 = vector.load %arg17[%c24, %c0_26] : memref<64x128xf32, #tpu.memory_space<vmem>>, vector<8x16xf32>
    tpu.vector_store %arg17[%c24, %c0_26], %27 {strides = array<i32>} : memref<64x128xf32, #tpu.memory_space<vmem>>, vector<8x16xf32>,
    %29 = vector.extract_strided_slice %6 {offsets = [0, 64], sizes = [8, 16], strides = [1, 1]} : vector<64x128xf32> to vector<8x16xf32>
    %c32 = arith.constant 32 : index
    %c0_27 = arith.constant 0 : index
    %30 = vector.load %arg17[%c32, %c0_27] : memref<64x128xf32, #tpu.memory_space<vmem>>, vector<8x16xf32>
    tpu.vector_store %arg17[%c32, %c0_27], %29 {strides = array<i32>} : memref<64x128xf32, #tpu.memory_space<vmem>>, vector<8x16xf32>,
    %31 = vector.extract_strided_slice %6 {offsets = [0, 80], sizes = [8, 16], strides = [1, 1]} : vector<64x128xf32> to vector<8x16xf32>
    %c40 = arith.constant 40 : index
    %c0_28 = arith.constant 0 : index
    %32 = vector.load %arg17[%c40, %c0_28] : memref<64x128xf32, #tpu.memory_space<vmem>>, vector<8x16xf32>
    tpu.vector_store %arg17[%c40, %c0_28], %31 {strides = array<i32>} : memref<64x128xf32, #tpu.memory_space<vmem>>, vector<8x16xf32>,
    %33 = vector.extract_strided_slice %6 {offsets = [0, 96], sizes = [8, 16], strides = [1, 1]} : vector<64x128xf32> to vector<8x16xf32>
    %c48 = arith.constant 48 : index
    %c0_29 = arith.constant 0 : index
    %34 = vector.load %arg17[%c48, %c0_29] : memref<64x128xf32, #tpu.memory_space<vmem>>, vector<8x16xf32>
    tpu.vector_store %arg17[%c48, %c0_29], %33 {strides = array<i32>} : memref<64x128xf32, #tpu.memory_space<vmem>>, vector<8x16xf32>,
    %35 = vector.extract_strided_slice %6 {offsets = [0, 112], sizes = [8, 16], strides = [1, 1]} : vector<64x128xf32> to vector<8x16xf32>
    %c56 = arith.constant 56 : index
    %c0_30 = arith.constant 0 : index
    %36 = vector.load %arg17[%c56, %c0_30] : memref<64x128xf32, #tpu.memory_space<vmem>>, vector<8x16xf32>
    tpu.vector_store %arg17[%c56, %c0_30], %35 {strides = array<i32>} : memref<64x128xf32, #tpu.memory_space<vmem>>, vector<8x16xf32>,
    %37 = vector.extract_strided_slice %6 {offsets = [8, 0], sizes = [8, 16], strides = [1, 1]} : vector<64x128xf32> to vector<8x16xf32>
    %c0_31 = arith.constant 0 : index
    %c16_32 = arith.constant 16 : index
    %38 = vector.load %arg17[%c0_31, %c16_32] : memref<64x128xf32, #tpu.memory_space<vmem>>, vector<8x16xf32>
    tpu.vector_store %arg17[%c0_31, %c16_32], %37 {strides = array<i32>} : memref<64x128xf32, #tpu.memory_space<vmem>>, vector<8x16xf32>,
    %39 = vector.extract_strided_slice %6 {offsets = [8, 16], sizes = [8, 16], strides = [1, 1]} : vector<64x128xf32> to vector<8x16xf32>
    %c8_33 = arith.constant 8 : index
    %c16_34 = arith.constant 16 : index
    %40 = vector.load %arg17[%c8_33, %c16_34] : memref<64x128xf32, #tpu.memory_space<vmem>>, vector<8x16xf32>
    tpu.vector_store %arg17[%c8_33, %c16_34], %39 {strides = array<i32>} : memref<64x128xf32, #tpu.memory_space<vmem>>, vector<8x16xf32>,
    %41 = vector.extract_strided_slice %6 {offsets = [8, 32], sizes = [8, 16], strides = [1, 1]} : vector<64x128xf32> to vector<8x16xf32>
    %c16_35 = arith.constant 16 : index
    %c16_36 = arith.constant 16 : index
    %42 = vector.load %arg17[%c16_35, %c16_36] : memref<64x128xf32, #tpu.memory_space<vmem>>, vector<8x16xf32>
    tpu.vector_store %arg17[%c16_35, %c16_36], %41 {strides = array<i32>} : memref<64x128xf32, #tpu.memory_space<vmem>>, vector<8x16xf32>,
    %43 = vector.extract_strided_slice %6 {offsets = [8, 48], sizes = [8, 16], strides = [1, 1]} : vector<64x128xf32> to vector<8x16xf32>
    %c24_37 = arith.constant 24 : index
    %c16_38 = arith.constant 16 : index
    %44 = vector.load %arg17[%c24_37, %c16_38] : memref<64x128xf32, #tpu.memory_space<vmem>>, vector<8x16xf32>
    tpu.vector_store %arg17[%c24_37, %c16_38], %43 {strides = array<i32>} : memref<64x128xf32, #tpu.memory_space<vmem>>, vector<8x16xf32>,
    %45 = vector.extract_strided_slice %6 {offsets = [8, 64], sizes = [8, 16], strides = [1, 1]} : vector<64x128xf32> to vector<8x16xf32>
    %c32_39 = arith.constant 32 : index
    %c16_40 = arith.constant 16 : index
    %46 = vector.load %arg17[%c32_39, %c16_40] : memref<64x128xf32, #tpu.memory_space<vmem>>, vector<8x16xf32>
    tpu.vector_store %arg17[%c32_39, %c16_40], %45 {strides = array<i32>} : memref<64x128xf32, #tpu.memory_space<vmem>>, vector<8x16xf32>,
    %47 = vector.extract_strided_slice %6 {offsets = [8, 80], sizes = [8, 16], strides = [1, 1]} : vector<64x128xf32> to vector<8x16xf32>
    %c40_41 = arith.constant 40 : index
    %c16_42 = arith.constant 16 : index
    %48 = vector.load %arg17[%c40_41, %c16_42] : memref<64x128xf32, #tpu.memory_space<vmem>>, vector<8x16xf32>
    tpu.vector_store %arg17[%c40_41, %c16_42], %47 {strides = array<i32>} : memref<64x128xf32, #tpu.memory_space<vmem>>, vector<8x16xf32>,
    %49 = vector.extract_strided_slice %6 {offsets = [8, 96], sizes = [8, 16], strides = [1, 1]} : vector<64x128xf32> to vector<8x16xf32>
    %c48_43 = arith.constant 48 : index
    %c16_44 = arith.constant 16 : index
    %50 = vector.load %arg17[%c48_43, %c16_44] : memref<64x128xf32, #tpu.memory_space<vmem>>, vector<8x16xf32>
    tpu.vector_store %arg17[%c48_43, %c16_44], %49 {strides = array<i32>} : memref<64x128xf32, #tpu.memory_space<vmem>>, vector<8x16xf32>,
    %51 = vector.extract_strided_slice %6 {offsets = [8, 112], sizes = [8, 16], strides = [1, 1]} : vector<64x128xf32> to vector<8x16xf32>
    %c56_45 = arith.constant 56 : index
    %c16_46 = arith.constant 16 : index
    %52 = vector.load %arg17[%c56_45, %c16_46] : memref<64x128xf32, #tpu.memory_space<vmem>>, vector<8x16xf32>
    tpu.vector_store %arg17[%c56_45, %c16_46], %51 {strides = array<i32>} : memref<64x128xf32, #tpu.memory_space<vmem>>, vector<8x16xf32>,
    %53 = vector.extract_strided_slice %6 {offsets = [16, 0], sizes = [8, 16], strides = [1, 1]} : vector<64x128xf32> to vector<8x16xf32>
    %c0_47 = arith.constant 0 : index
    %c32_48 = arith.constant 32 : index
    %54 = vector.load %arg17[%c0_47, %c32_48] : memref<64x128xf32, #tpu.memory_space<vmem>>, vector<8x16xf32>
    tpu.vector_store %arg17[%c0_47, %c32_48], %53 {strides = array<i32>} : memref<64x128xf32, #tpu.memory_space<vmem>>, vector<8x16xf32>,
    %55 = vector.extract_strided_slice %6 {offsets = [16, 16], sizes = [8, 16], strides = [1, 1]} : vector<64x128xf32> to vector<8x16xf32>
    %c8_49 = arith.constant 8 : index
    %c32_50 = arith.constant 32 : index
    %56 = vector.load %arg17[%c8_49, %c32_50] : memref<64x128xf32, #tpu.memory_space<vmem>>, vector<8x16xf32>
    tpu.vector_store %arg17[%c8_49, %c32_50], %55 {strides = array<i32>} : memref<64x128xf32, #tpu.memory_space<vmem>>, vector<8x16xf32>,
    %57 = vector.extract_strided_slice %6 {offsets = [16, 32], sizes = [8, 16], strides = [1, 1]} : vector<64x128xf32> to vector<8x16xf32>
    %c16_51 = arith.constant 16 : index
    %c32_52 = arith.constant 32 : index
    %58 = vector.load %arg17[%c16_51, %c32_52] : memref<64x128xf32, #tpu.memory_space<vmem>>, vector<8x16xf32>
    tpu.vector_store %arg17[%c16_51, %c32_52], %57 {strides = array<i32>} : memref<64x128xf32, #tpu.memory_space<vmem>>, vector<8x16xf32>,
    %59 = vector.extract_strided_slice %6 {offsets = [16, 48], sizes = [8, 16], strides = [1, 1]} : vector<64x128xf32> to vector<8x16xf32>
    %c24_53 = arith.constant 24 : index
    %c32_54 = arith.constant 32 : index
    %60 = vector.load %arg17[%c24_53, %c32_54] : memref<64x128xf32, #tpu.memory_space<vmem>>, vector<8x16xf32>
    tpu.vector_store %arg17[%c24_53, %c32_54], %59 {strides = array<i32>} : memref<64x128xf32, #tpu.memory_space<vmem>>, vector<8x16xf32>,
    %61 = vector.extract_strided_slice %6 {offsets = [16, 64], sizes = [8, 16], strides = [1, 1]} : vector<64x128xf32> to vector<8x16xf32>
    %c32_55 = arith.constant 32 : index
    %c32_56 = arith.constant 32 : index
    %62 = vector.load %arg17[%c32_55, %c32_56] : memref<64x128xf32, #tpu.memory_space<vmem>>, vector<8x16xf32>
    tpu.vector_store %arg17[%c32_55, %c32_56], %61 {strides = array<i32>} : memref<64x128xf32, #tpu.memory_space<vmem>>, vector<8x16xf32>,
    %63 = vector.extract_strided_slice %6 {offsets = [16, 80], sizes = [8, 16], strides = [1, 1]} : vector<64x128xf32> to vector<8x16xf32>
    %c40_57 = arith.constant 40 : index
    %c32_58 = arith.constant 32 : index
    %64 = vector.load %arg17[%c40_57, %c32_58] : memref<64x128xf32, #tpu.memory_space<vmem>>, vector<8x16xf32>
    tpu.vector_store %arg17[%c40_57, %c32_58], %63 {strides = array<i32>} : memref<64x128xf32, #tpu.memory_space<vmem>>, vector<8x16xf32>,
    %65 = vector.extract_strided_slice %6 {offsets = [16, 96], sizes = [8, 16], strides = [1, 1]} : vector<64x128xf32> to vector<8x16xf32>
    %c48_59 = arith.constant 48 : index
    %c32_60 = arith.constant 32 : index
    %66 = vector.load %arg17[%c48_59, %c32_60] : memref<64x128xf32, #tpu.memory_space<vmem>>, vector<8x16xf32>
    tpu.vector_store %arg17[%c48_59, %c32_60], %65 {strides = array<i32>} : memref<64x128xf32, #tpu.memory_space<vmem>>, vector<8x16xf32>,
    %67 = vector.extract_strided_slice %6 {offsets = [16, 112], sizes = [8, 16], strides = [1, 1]} : vector<64x128xf32> to vector<8x16xf32>
    %c56_61 = arith.constant 56 : index
    %c32_62 = arith.constant 32 : index
    %68 = vector.load %arg17[%c56_61, %c32_62] : memref<64x128xf32, #tpu.memory_space<vmem>>, vector<8x16xf32>
    tpu.vector_store %arg17[%c56_61, %c32_62], %67 {strides = array<i32>} : memref<64x128xf32, #tpu.memory_space<vmem>>, vector<8x16xf32>,
    %69 = vector.extract_strided_slice %6 {offsets = [24, 0], sizes = [8, 16], strides = [1, 1]} : vector<64x128xf32> to vector<8x16xf32>
    %c0_63 = arith.constant 0 : index
    %c48_64 = arith.constant 48 : index
    %70 = vector.load %arg17[%c0_63, %c48_64] : memref<64x128xf32, #tpu.memory_space<vmem>>, vector<8x16xf32>
    tpu.vector_store %arg17[%c0_63, %c48_64], %69 {strides = array<i32>} : memref<64x128xf32, #tpu.memory_space<vmem>>, vector<8x16xf32>,
    %71 = vector.extract_strided_slice %6 {offsets = [24, 16], sizes = [8, 16], strides = [1, 1]} : vector<64x128xf32> to vector<8x16xf32>
    %c8_65 = arith.constant 8 : index
    %c48_66 = arith.constant 48 : index
    %72 = vector.load %arg17[%c8_65, %c48_66] : memref<64x128xf32, #tpu.memory_space<vmem>>, vector<8x16xf32>
    tpu.vector_store %arg17[%c8_65, %c48_66], %71 {strides = array<i32>} : memref<64x128xf32, #tpu.memory_space<vmem>>, vector<8x16xf32>,
    %73 = vector.extract_strided_slice %6 {offsets = [24, 32], sizes = [8, 16], strides = [1, 1]} : vector<64x128xf32> to vector<8x16xf32>
    %c16_67 = arith.constant 16 : index
    %c48_68 = arith.constant 48 : index
    %74 = vector.load %arg17[%c16_67, %c48_68] : memref<64x128xf32, #tpu.memory_space<vmem>>, vector<8x16xf32>
    tpu.vector_store %arg17[%c16_67, %c48_68], %73 {strides = array<i32>} : memref<64x128xf32, #tpu.memory_space<vmem>>, vector<8x16xf32>,
    %75 = vector.extract_strided_slice %6 {offsets = [24, 48], sizes = [8, 16], strides = [1, 1]} : vector<64x128xf32> to vector<8x16xf32>
    %c24_69 = arith.constant 24 : index
    %c48_70 = arith.constant 48 : index
    %76 = vector.load %arg17[%c24_69, %c48_70] : memref<64x128xf32, #tpu.memory_space<vmem>>, vector<8x16xf32>
    tpu.vector_store %arg17[%c24_69, %c48_70], %75 {strides = array<i32>} : memref<64x128xf32, #tpu.memory_space<vmem>>, vector<8x16xf32>,
    %77 = vector.extract_strided_slice %6 {offsets = [24, 64], sizes = [8, 16], strides = [1, 1]} : vector<64x128xf32> to vector<8x16xf32>
    %c32_71 = arith.constant 32 : index
    %c48_72 = arith.constant 48 : index
    %78 = vector.load %arg17[%c32_71, %c48_72] : memref<64x128xf32, #tpu.memory_space<vmem>>, vector<8x16xf32>
    tpu.vector_store %arg17[%c32_71, %c48_72], %77 {strides = array<i32>} : memref<64x128xf32, #tpu.memory_space<vmem>>, vector<8x16xf32>,
    %79 = vector.extract_strided_slice %6 {offsets = [24, 80], sizes = [8, 16], strides = [1, 1]} : vector<64x128xf32> to vector<8x16xf32>
    %c40_73 = arith.constant 40 : index
    %c48_74 = arith.constant 48 : index
    %80 = vector.load %arg17[%c40_73, %c48_74] : memref<64x128xf32, #tpu.memory_space<vmem>>, vector<8x16xf32>
    tpu.vector_store %arg17[%c40_73, %c48_74], %79 {strides = array<i32>} : memref<64x128xf32, #tpu.memory_space<vmem>>, vector<8x16xf32>,
    %81 = vector.extract_strided_slice %6 {offsets = [24, 96], sizes = [8, 16], strides = [1, 1]} : vector<64x128xf32> to vector<8x16xf32>
    %c48_75 = arith.constant 48 : index
    %c48_76 = arith.constant 48 : index
    %82 = vector.load %arg17[%c48_75, %c48_76] : memref<64x128xf32, #tpu.memory_space<vmem>>, vector<8x16xf32>
    tpu.vector_store %arg17[%c48_75, %c48_76], %81 {strides = array<i32>} : memref<64x128xf32, #tpu.memory_space<vmem>>, vector<8x16xf32>,
    %83 = vector.extract_strided_slice %6 {offsets = [24, 112], sizes = [8, 16], strides = [1, 1]} : vector<64x128xf32> to vector<8x16xf32>
    %c56_77 = arith.constant 56 : index
    %c48_78 = arith.constant 48 : index
    %84 = vector.load %arg17[%c56_77, %c48_78] : memref<64x128xf32, #tpu.memory_space<vmem>>, vector<8x16xf32>
    tpu.vector_store %arg17[%c56_77, %c48_78], %83 {strides = array<i32>} : memref<64x128xf32, #tpu.memory_space<vmem>>, vector<8x16xf32>,
    %85 = vector.extract_strided_slice %6 {offsets = [32, 0], sizes = [8, 16], strides = [1, 1]} : vector<64x128xf32> to vector<8x16xf32>
    %c0_79 = arith.constant 0 : index
    %c64 = arith.constant 64 : index
    %86 = vector.load %arg17[%c0_79, %c64] : memref<64x128xf32, #tpu.memory_space<vmem>>, vector<8x16xf32>
    tpu.vector_store %arg17[%c0_79, %c64], %85 {strides = array<i32>} : memref<64x128xf32, #tpu.memory_space<vmem>>, vector<8x16xf32>,
    %87 = vector.extract_strided_slice %6 {offsets = [32, 16], sizes = [8, 16], strides = [1, 1]} : vector<64x128xf32> to vector<8x16xf32>
    %c8_80 = arith.constant 8 : index
    %c64_81 = arith.constant 64 : index
    %88 = vector.load %arg17[%c8_80, %c64_81] : memref<64x128xf32, #tpu.memory_space<vmem>>, vector<8x16xf32>
    tpu.vector_store %arg17[%c8_80, %c64_81], %87 {strides = array<i32>} : memref<64x128xf32, #tpu.memory_space<vmem>>, vector<8x16xf32>,
    %89 = vector.extract_strided_slice %6 {offsets = [32, 32], sizes = [8, 16], strides = [1, 1]} : vector<64x128xf32> to vector<8x16xf32>
    %c16_82 = arith.constant 16 : index
    %c64_83 = arith.constant 64 : index
    %90 = vector.load %arg17[%c16_82, %c64_83] : memref<64x128xf32, #tpu.memory_space<vmem>>, vector<8x16xf32>
    tpu.vector_store %arg17[%c16_82, %c64_83], %89 {strides = array<i32>} : memref<64x128xf32, #tpu.memory_space<vmem>>, vector<8x16xf32>,
    %91 = vector.extract_strided_slice %6 {offsets = [32, 48], sizes = [8, 16], strides = [1, 1]} : vector<64x128xf32> to vector<8x16xf32>
    %c24_84 = arith.constant 24 : index
    %c64_85 = arith.constant 64 : index
    %92 = vector.load %arg17[%c24_84, %c64_85] : memref<64x128xf32, #tpu.memory_space<vmem>>, vector<8x16xf32>
    tpu.vector_store %arg17[%c24_84, %c64_85], %91 {strides = array<i32>} : memref<64x128xf32, #tpu.memory_space<vmem>>, vector<8x16xf32>,
    %93 = vector.extract_strided_slice %6 {offsets = [32, 64], sizes = [8, 16], strides = [1, 1]} : vector<64x128xf32> to vector<8x16xf32>
    %c32_86 = arith.constant 32 : index
    %c64_87 = arith.constant 64 : index
    %94 = vector.load %arg17[%c32_86, %c64_87] : memref<64x128xf32, #tpu.memory_space<vmem>>, vector<8x16xf32>
    tpu.vector_store %arg17[%c32_86, %c64_87], %93 {strides = array<i32>} : memref<64x128xf32, #tpu.memory_space<vmem>>, vector<8x16xf32>,
    %95 = vector.extract_strided_slice %6 {offsets = [32, 80], sizes = [8, 16], strides = [1, 1]} : vector<64x128xf32> to vector<8x16xf32>
    %c40_88 = arith.constant 40 : index
    %c64_89 = arith.constant 64 : index
    %96 = vector.load %arg17[%c40_88, %c64_89] : memref<64x128xf32, #tpu.memory_space<vmem>>, vector<8x16xf32>
    tpu.vector_store %arg17[%c40_88, %c64_89], %95 {strides = array<i32>} : memref<64x128xf32, #tpu.memory_space<vmem>>, vector<8x16xf32>,
    %97 = vector.extract_strided_slice %6 {offsets = [32, 96], sizes = [8, 16], strides = [1, 1]} : vector<64x128xf32> to vector<8x16xf32>
    %c48_90 = arith.constant 48 : index
    %c64_91 = arith.constant 64 : index
    %98 = vector.load %arg17[%c48_90, %c64_91] : memref<64x128xf32, #tpu.memory_space<vmem>>, vector<8x16xf32>
    tpu.vector_store %arg17[%c48_90, %c64_91], %97 {strides = array<i32>} : memref<64x128xf32, #tpu.memory_space<vmem>>, vector<8x16xf32>,
    %99 = vector.extract_strided_slice %6 {offsets = [32, 112], sizes = [8, 16], strides = [1, 1]} : vector<64x128xf32> to vector<8x16xf32>
    %c56_92 = arith.constant 56 : index
    %c64_93 = arith.constant 64 : index
    %100 = vector.load %arg17[%c56_92, %c64_93] : memref<64x128xf32, #tpu.memory_space<vmem>>, vector<8x16xf32>
    tpu.vector_store %arg17[%c56_92, %c64_93], %99 {strides = array<i32>} : memref<64x128xf32, #tpu.memory_space<vmem>>, vector<8x16xf32>,
    %101 = vector.extract_strided_slice %6 {offsets = [40, 0], sizes = [8, 16], strides = [1, 1]} : vector<64x128xf32> to vector<8x16xf32>
    %c0_94 = arith.constant 0 : index
    %c80 = arith.constant 80 : index
    %102 = vector.load %arg17[%c0_94, %c80] : memref<64x128xf32, #tpu.memory_space<vmem>>, vector<8x16xf32>
    tpu.vector_store %arg17[%c0_94, %c80], %101 {strides = array<i32>} : memref<64x128xf32, #tpu.memory_space<vmem>>, vector<8x16xf32>,
    %103 = vector.extract_strided_slice %6 {offsets = [40, 16], sizes = [8, 16], strides = [1, 1]} : vector<64x128xf32> to vector<8x16xf32>
    %c8_95 = arith.constant 8 : index
    %c80_96 = arith.constant 80 : index
    %104 = vector.load %arg17[%c8_95, %c80_96] : memref<64x128xf32, #tpu.memory_space<vmem>>, vector<8x16xf32>
    tpu.vector_store %arg17[%c8_95, %c80_96], %103 {strides = array<i32>} : memref<64x128xf32, #tpu.memory_space<vmem>>, vector<8x16xf32>,
    %105 = vector.extract_strided_slice %6 {offsets = [40, 32], sizes = [8, 16], strides = [1, 1]} : vector<64x128xf32> to vector<8x16xf32>
    %c16_97 = arith.constant 16 : index
    %c80_98 = arith.constant 80 : index
    %106 = vector.load %arg17[%c16_97, %c80_98] : memref<64x128xf32, #tpu.memory_space<vmem>>, vector<8x16xf32>
    tpu.vector_store %arg17[%c16_97, %c80_98], %105 {strides = array<i32>} : memref<64x128xf32, #tpu.memory_space<vmem>>, vector<8x16xf32>,
    %107 = vector.extract_strided_slice %6 {offsets = [40, 48], sizes = [8, 16], strides = [1, 1]} : vector<64x128xf32> to vector<8x16xf32>
    %c24_99 = arith.constant 24 : index
    %c80_100 = arith.constant 80 : index
    %108 = vector.load %arg17[%c24_99, %c80_100] : memref<64x128xf32, #tpu.memory_space<vmem>>, vector<8x16xf32>
    tpu.vector_store %arg17[%c24_99, %c80_100], %107 {strides = array<i32>} : memref<64x128xf32, #tpu.memory_space<vmem>>, vector<8x16xf32>,
    %109 = vector.extract_strided_slice %6 {offsets = [40, 64], sizes = [8, 16], strides = [1, 1]} : vector<64x128xf32> to vector<8x16xf32>
    %c32_101 = arith.constant 32 : index
    %c80_102 = arith.constant 80 : index
    %110 = vector.load %arg17[%c32_101, %c80_102] : memref<64x128xf32, #tpu.memory_space<vmem>>, vector<8x16xf32>
    tpu.vector_store %arg17[%c32_101, %c80_102], %109 {strides = array<i32>} : memref<64x128xf32, #tpu.memory_space<vmem>>, vector<8x16xf32>,
    %111 = vector.extract_strided_slice %6 {offsets = [40, 80], sizes = [8, 16], strides = [1, 1]} : vector<64x128xf32> to vector<8x16xf32>
    %c40_103 = arith.constant 40 : index
    %c80_104 = arith.constant 80 : index
    %112 = vector.load %arg17[%c40_103, %c80_104] : memref<64x128xf32, #tpu.memory_space<vmem>>, vector<8x16xf32>
    tpu.vector_store %arg17[%c40_103, %c80_104], %111 {strides = array<i32>} : memref<64x128xf32, #tpu.memory_space<vmem>>, vector<8x16xf32>,
    %113 = vector.extract_strided_slice %6 {offsets = [40, 96], sizes = [8, 16], strides = [1, 1]} : vector<64x128xf32> to vector<8x16xf32>
    %c48_105 = arith.constant 48 : index
    %c80_106 = arith.constant 80 : index
    %114 = vector.load %arg17[%c48_105, %c80_106] : memref<64x128xf32, #tpu.memory_space<vmem>>, vector<8x16xf32>
    tpu.vector_store %arg17[%c48_105, %c80_106], %113 {strides = array<i32>} : memref<64x128xf32, #tpu.memory_space<vmem>>, vector<8x16xf32>,
    %115 = vector.extract_strided_slice %6 {offsets = [40, 112], sizes = [8, 16], strides = [1, 1]} : vector<64x128xf32> to vector<8x16xf32>
    %c56_107 = arith.constant 56 : index
    %c80_108 = arith.constant 80 : index
    %116 = vector.load %arg17[%c56_107, %c80_108] : memref<64x128xf32, #tpu.memory_space<vmem>>, vector<8x16xf32>
    tpu.vector_store %arg17[%c56_107, %c80_108], %115 {strides = array<i32>} : memref<64x128xf32, #tpu.memory_space<vmem>>, vector<8x16xf32>,
    %117 = vector.extract_strided_slice %6 {offsets = [48, 0], sizes = [8, 16], strides = [1, 1]} : vector<64x128xf32> to vector<8x16xf32>
    %c0_109 = arith.constant 0 : index
    %c96 = arith.constant 96 : index
    %118 = vector.load %arg17[%c0_109, %c96] : memref<64x128xf32, #tpu.memory_space<vmem>>, vector<8x16xf32>
    tpu.vector_store %arg17[%c0_109, %c96], %117 {strides = array<i32>} : memref<64x128xf32, #tpu.memory_space<vmem>>, vector<8x16xf32>,
    %119 = vector.extract_strided_slice %6 {offsets = [48, 16], sizes = [8, 16], strides = [1, 1]} : vector<64x128xf32> to vector<8x16xf32>
    %c8_110 = arith.constant 8 : index
    %c96_111 = arith.constant 96 : index
    %120 = vector.load %arg17[%c8_110, %c96_111] : memref<64x128xf32, #tpu.memory_space<vmem>>, vector<8x16xf32>
    tpu.vector_store %arg17[%c8_110, %c96_111], %119 {strides = array<i32>} : memref<64x128xf32, #tpu.memory_space<vmem>>, vector<8x16xf32>,
    %121 = vector.extract_strided_slice %6 {offsets = [48, 32], sizes = [8, 16], strides = [1, 1]} : vector<64x128xf32> to vector<8x16xf32>
    %c16_112 = arith.constant 16 : index
    %c96_113 = arith.constant 96 : index
    %122 = vector.load %arg17[%c16_112, %c96_113] : memref<64x128xf32, #tpu.memory_space<vmem>>, vector<8x16xf32>
    tpu.vector_store %arg17[%c16_112, %c96_113], %121 {strides = array<i32>} : memref<64x128xf32, #tpu.memory_space<vmem>>, vector<8x16xf32>,
    %123 = vector.extract_strided_slice %6 {offsets = [48, 48], sizes = [8, 16], strides = [1, 1]} : vector<64x128xf32> to vector<8x16xf32>
    %c24_114 = arith.constant 24 : index
    %c96_115 = arith.constant 96 : index
    %124 = vector.load %arg17[%c24_114, %c96_115] : memref<64x128xf32, #tpu.memory_space<vmem>>, vector<8x16xf32>
    tpu.vector_store %arg17[%c24_114, %c96_115], %123 {strides = array<i32>} : memref<64x128xf32, #tpu.memory_space<vmem>>, vector<8x16xf32>,
    %125 = vector.extract_strided_slice %6 {offsets = [48, 64], sizes = [8, 16], strides = [1, 1]} : vector<64x128xf32> to vector<8x16xf32>
    %c32_116 = arith.constant 32 : index
    %c96_117 = arith.constant 96 : index
    %126 = vector.load %arg17[%c32_116, %c96_117] : memref<64x128xf32, #tpu.memory_space<vmem>>, vector<8x16xf32>
    tpu.vector_store %arg17[%c32_116, %c96_117], %125 {strides = array<i32>} : memref<64x128xf32, #tpu.memory_space<vmem>>, vector<8x16xf32>,
    %127 = vector.extract_strided_slice %6 {offsets = [48, 80], sizes = [8, 16], strides = [1, 1]} : vector<64x128xf32> to vector<8x16xf32>
    %c40_118 = arith.constant 40 : index
    %c96_119 = arith.constant 96 : index
    %128 = vector.load %arg17[%c40_118, %c96_119] : memref<64x128xf32, #tpu.memory_space<vmem>>, vector<8x16xf32>
    tpu.vector_store %arg17[%c40_118, %c96_119], %127 {strides = array<i32>} : memref<64x128xf32, #tpu.memory_space<vmem>>, vector<8x16xf32>,
    %129 = vector.extract_strided_slice %6 {offsets = [48, 96], sizes = [8, 16], strides = [1, 1]} : vector<64x128xf32> to vector<8x16xf32>
    %c48_120 = arith.constant 48 : index
    %c96_121 = arith.constant 96 : index
    %130 = vector.load %arg17[%c48_120, %c96_121] : memref<64x128xf32, #tpu.memory_space<vmem>>, vector<8x16xf32>
    tpu.vector_store %arg17[%c48_120, %c96_121], %129 {strides = array<i32>} : memref<64x128xf32, #tpu.memory_space<vmem>>, vector<8x16xf32>,
    %131 = vector.extract_strided_slice %6 {offsets = [48, 112], sizes = [8, 16], strides = [1, 1]} : vector<64x128xf32> to vector<8x16xf32>
    %c56_122 = arith.constant 56 : index
    %c96_123 = arith.constant 96 : index
    %132 = vector.load %arg17[%c56_122, %c96_123] : memref<64x128xf32, #tpu.memory_space<vmem>>, vector<8x16xf32>
    tpu.vector_store %arg17[%c56_122, %c96_123], %131 {strides = array<i32>} : memref<64x128xf32, #tpu.memory_space<vmem>>, vector<8x16xf32>,
    %133 = vector.extract_strided_slice %6 {offsets = [56, 0], sizes = [8, 16], strides = [1, 1]} : vector<64x128xf32> to vector<8x16xf32>
    %c0_124 = arith.constant 0 : index
    %c112 = arith.constant 112 : index
    %134 = vector.load %arg17[%c0_124, %c112] : memref<64x128xf32, #tpu.memory_space<vmem>>, vector<8x16xf32>
    tpu.vector_store %arg17[%c0_124, %c112], %133 {strides = array<i32>} : memref<64x128xf32, #tpu.memory_space<vmem>>, vector<8x16xf32>,
    %135 = vector.extract_strided_slice %6 {offsets = [56, 16], sizes = [8, 16], strides = [1, 1]} : vector<64x128xf32> to vector<8x16xf32>
    %c8_125 = arith.constant 8 : index
    %c112_126 = arith.constant 112 : index
    %136 = vector.load %arg17[%c8_125, %c112_126] : memref<64x128xf32, #tpu.memory_space<vmem>>, vector<8x16xf32>
    tpu.vector_store %arg17[%c8_125, %c112_126], %135 {strides = array<i32>} : memref<64x128xf32, #tpu.memory_space<vmem>>, vector<8x16xf32>,
    %137 = vector.extract_strided_slice %6 {offsets = [56, 32], sizes = [8, 16], strides = [1, 1]} : vector<64x128xf32> to vector<8x16xf32>
    %c16_127 = arith.constant 16 : index
    %c112_128 = arith.constant 112 : index
    %138 = vector.load %arg17[%c16_127, %c112_128] : memref<64x128xf32, #tpu.memory_space<vmem>>, vector<8x16xf32>
    tpu.vector_store %arg17[%c16_127, %c112_128], %137 {strides = array<i32>} : memref<64x128xf32, #tpu.memory_space<vmem>>, vector<8x16xf32>,
    %139 = vector.extract_strided_slice %6 {offsets = [56, 48], sizes = [8, 16], strides = [1, 1]} : vector<64x128xf32> to vector<8x16xf32>
    %c24_129 = arith.constant 24 : index
    %c112_130 = arith.constant 112 : index
    %140 = vector.load %arg17[%c24_129, %c112_130] : memref<64x128xf32, #tpu.memory_space<vmem>>, vector<8x16xf32>
    tpu.vector_store %arg17[%c24_129, %c112_130], %139 {strides = array<i32>} : memref<64x128xf32, #tpu.memory_space<vmem>>, vector<8x16xf32>,
    %141 = vector.extract_strided_slice %6 {offsets = [56, 64], sizes = [8, 16], strides = [1, 1]} : vector<64x128xf32> to vector<8x16xf32>
    %c32_131 = arith.constant 32 : index
    %c112_132 = arith.constant 112 : index
    %142 = vector.load %arg17[%c32_131, %c112_132] : memref<64x128xf32, #tpu.memory_space<vmem>>, vector<8x16xf32>
    tpu.vector_store %arg17[%c32_131, %c112_132], %141 {strides = array<i32>} : memref<64x128xf32, #tpu.memory_space<vmem>>, vector<8x16xf32>,
    %143 = vector.extract_strided_slice %6 {offsets = [56, 80], sizes = [8, 16], strides = [1, 1]} : vector<64x128xf32> to vector<8x16xf32>
    %c40_133 = arith.constant 40 : index
    %c112_134 = arith.constant 112 : index
    %144 = vector.load %arg17[%c40_133, %c112_134] : memref<64x128xf32, #tpu.memory_space<vmem>>, vector<8x16xf32>
    tpu.vector_store %arg17[%c40_133, %c112_134], %143 {strides = array<i32>} : memref<64x128xf32, #tpu.memory_space<vmem>>, vector<8x16xf32>,
    %145 = vector.extract_strided_slice %6 {offsets = [56, 96], sizes = [8, 16], strides = [1, 1]} : vector<64x128xf32> to vector<8x16xf32>
    %c48_135 = arith.constant 48 : index
    %c112_136 = arith.constant 112 : index
    %146 = vector.load %arg17[%c48_135, %c112_136] : memref<64x128xf32, #tpu.memory_space<vmem>>, vector<8x16xf32>
    tpu.vector_store %arg17[%c48_135, %c112_136], %145 {strides = array<i32>} : memref<64x128xf32, #tpu.memory_space<vmem>>, vector<8x16xf32>,
    %147 = vector.extract_strided_slice %6 {offsets = [56, 112], sizes = [8, 16], strides = [1, 1]} : vector<64x128xf32> to vector<8x16xf32>
    %c56_137 = arith.constant 56 : index
    %c112_138 = arith.constant 112 : index
    %148 = vector.load %arg17[%c56_137, %c112_138] : memref<64x128xf32, #tpu.memory_space<vmem>>, vector<8x16xf32>
    tpu.vector_store %arg17[%c56_137, %c112_138], %147 {strides = array<i32>} : memref<64x128xf32, #tpu.memory_space<vmem>>, vector<8x16xf32>,
    %149 = vector.extract_strided_slice %13 {offsets = [0, 0], sizes = [8, 16], strides = [1, 1]} : vector<64x128xf32> to vector<8x16xf32>
    %c0_139 = arith.constant 0 : index
    %c0_140 = arith.constant 0 : index
    %150 = vector.load %arg18[%c0_139, %c0_140] : memref<64x128xf32, #tpu.memory_space<vmem>>, vector<8x16xf32>
    tpu.vector_store %arg18[%c0_139, %c0_140], %149 {strides = array<i32>} : memref<64x128xf32, #tpu.memory_space<vmem>>, vector<8x16xf32>,
    %151 = vector.extract_strided_slice %13 {offsets = [0, 16], sizes = [8, 16], strides = [1, 1]} : vector<64x128xf32> to vector<8x16xf32>
    %c8_141 = arith.constant 8 : index
    %c0_142 = arith.constant 0 : index
    %152 = vector.load %arg18[%c8_141, %c0_142] : memref<64x128xf32, #tpu.memory_space<vmem>>, vector<8x16xf32>
    tpu.vector_store %arg18[%c8_141, %c0_142], %151 {strides = array<i32>} : memref<64x128xf32, #tpu.memory_space<vmem>>, vector<8x16xf32>,
    %153 = vector.extract_strided_slice %13 {offsets = [0, 32], sizes = [8, 16], strides = [1, 1]} : vector<64x128xf32> to vector<8x16xf32>
    %c16_143 = arith.constant 16 : index
    %c0_144 = arith.constant 0 : index
    %154 = vector.load %arg18[%c16_143, %c0_144] : memref<64x128xf32, #tpu.memory_space<vmem>>, vector<8x16xf32>
    tpu.vector_store %arg18[%c16_143, %c0_144], %153 {strides = array<i32>} : memref<64x128xf32, #tpu.memory_space<vmem>>, vector<8x16xf32>,
    %155 = vector.extract_strided_slice %13 {offsets = [0, 48], sizes = [8, 16], strides = [1, 1]} : vector<64x128xf32> to vector<8x16xf32>
    %c24_145 = arith.constant 24 : index
    %c0_146 = arith.constant 0 : index
    %156 = vector.load %arg18[%c24_145, %c0_146] : memref<64x128xf32, #tpu.memory_space<vmem>>, vector<8x16xf32>
    tpu.vector_store %arg18[%c24_145, %c0_146], %155 {strides = array<i32>} : memref<64x128xf32, #tpu.memory_space<vmem>>, vector<8x16xf32>,
    %157 = vector.extract_strided_slice %13 {offsets = [0, 64], sizes = [8, 16], strides = [1, 1]} : vector<64x128xf32> to vector<8x16xf32>
    %c32_147 = arith.constant 32 : index
    %c0_148 = arith.constant 0 : index
    %158 = vector.load %arg18[%c32_147, %c0_148] : memref<64x128xf32, #tpu.memory_space<vmem>>, vector<8x16xf32>
    tpu.vector_store %arg18[%c32_147, %c0_148], %157 {strides = array<i32>} : memref<64x128xf32, #tpu.memory_space<vmem>>, vector<8x16xf32>,
    %159 = vector.extract_strided_slice %13 {offsets = [0, 80], sizes = [8, 16], strides = [1, 1]} : vector<64x128xf32> to vector<8x16xf32>
    %c40_149 = arith.constant 40 : index
    %c0_150 = arith.constant 0 : index
    %160 = vector.load %arg18[%c40_149, %c0_150] : memref<64x128xf32, #tpu.memory_space<vmem>>, vector<8x16xf32>
    tpu.vector_store %arg18[%c40_149, %c0_150], %159 {strides = array<i32>} : memref<64x128xf32, #tpu.memory_space<vmem>>, vector<8x16xf32>,
    %161 = vector.extract_strided_slice %13 {offsets = [0, 96], sizes = [8, 16], strides = [1, 1]} : vector<64x128xf32> to vector<8x16xf32>
    %c48_151 = arith.constant 48 : index
    %c0_152 = arith.constant 0 : index
    %162 = vector.load %arg18[%c48_151, %c0_152] : memref<64x128xf32, #tpu.memory_space<vmem>>, vector<8x16xf32>
    tpu.vector_store %arg18[%c48_151, %c0_152], %161 {strides = array<i32>} : memref<64x128xf32, #tpu.memory_space<vmem>>, vector<8x16xf32>,
    %163 = vector.extract_strided_slice %13 {offsets = [0, 112], sizes = [8, 16], strides = [1, 1]} : vector<64x128xf32> to vector<8x16xf32>
    %c56_153 = arith.constant 56 : index
    %c0_154 = arith.constant 0 : index
    %164 = vector.load %arg18[%c56_153, %c0_154] : memref<64x128xf32, #tpu.memory_space<vmem>>, vector<8x16xf32>
    tpu.vector_store %arg18[%c56_153, %c0_154], %163 {strides = array<i32>} : memref<64x128xf32, #tpu.memory_space<vmem>>, vector<8x16xf32>,
    %165 = vector.extract_strided_slice %13 {offsets = [8, 0], sizes = [8, 16], strides = [1, 1]} : vector<64x128xf32> to vector<8x16xf32>
    %c0_155 = arith.constant 0 : index
    %c16_156 = arith.constant 16 : index
    %166 = vector.load %arg18[%c0_155, %c16_156] : memref<64x128xf32, #tpu.memory_space<vmem>>, vector<8x16xf32>
    tpu.vector_store %arg18[%c0_155, %c16_156], %165 {strides = array<i32>} : memref<64x128xf32, #tpu.memory_space<vmem>>, vector<8x16xf32>,
    %167 = vector.extract_strided_slice %13 {offsets = [8, 16], sizes = [8, 16], strides = [1, 1]} : vector<64x128xf32> to vector<8x16xf32>
    %c8_157 = arith.constant 8 : index
    %c16_158 = arith.constant 16 : index
    %168 = vector.load %arg18[%c8_157, %c16_158] : memref<64x128xf32, #tpu.memory_space<vmem>>, vector<8x16xf32>
    tpu.vector_store %arg18[%c8_157, %c16_158], %167 {strides = array<i32>} : memref<64x128xf32, #tpu.memory_space<vmem>>, vector<8x16xf32>,
    %169 = vector.extract_strided_slice %13 {offsets = [8, 32], sizes = [8, 16], strides = [1, 1]} : vector<64x128xf32> to vector<8x16xf32>
    %c16_159 = arith.constant 16 : index
    %c16_160 = arith.constant 16 : index
    %170 = vector.load %arg18[%c16_159, %c16_160] : memref<64x128xf32, #tpu.memory_space<vmem>>, vector<8x16xf32>
    tpu.vector_store %arg18[%c16_159, %c16_160], %169 {strides = array<i32>} : memref<64x128xf32, #tpu.memory_space<vmem>>, vector<8x16xf32>,
    %171 = vector.extract_strided_slice %13 {offsets = [8, 48], sizes = [8, 16], strides = [1, 1]} : vector<64x128xf32> to vector<8x16xf32>
    %c24_161 = arith.constant 24 : index
    %c16_162 = arith.constant 16 : index
    %172 = vector.load %arg18[%c24_161, %c16_162] : memref<64x128xf32, #tpu.memory_space<vmem>>, vector<8x16xf32>
    tpu.vector_store %arg18[%c24_161, %c16_162], %171 {strides = array<i32>} : memref<64x128xf32, #tpu.memory_space<vmem>>, vector<8x16xf32>,
    %173 = vector.extract_strided_slice %13 {offsets = [8, 64], sizes = [8, 16], strides = [1, 1]} : vector<64x128xf32> to vector<8x16xf32>
    %c32_163 = arith.constant 32 : index
    %c16_164 = arith.constant 16 : index
    %174 = vector.load %arg18[%c32_163, %c16_164] : memref<64x128xf32, #tpu.memory_space<vmem>>, vector<8x16xf32>
    tpu.vector_store %arg18[%c32_163, %c16_164], %173 {strides = array<i32>} : memref<64x128xf32, #tpu.memory_space<vmem>>, vector<8x16xf32>,
    %175 = vector.extract_strided_slice %13 {offsets = [8, 80], sizes = [8, 16], strides = [1, 1]} : vector<64x128xf32> to vector<8x16xf32>
    %c40_165 = arith.constant 40 : index
    %c16_166 = arith.constant 16 : index
    %176 = vector.load %arg18[%c40_165, %c16_166] : memref<64x128xf32, #tpu.memory_space<vmem>>, vector<8x16xf32>
    tpu.vector_store %arg18[%c40_165, %c16_166], %175 {strides = array<i32>} : memref<64x128xf32, #tpu.memory_space<vmem>>, vector<8x16xf32>,
    %177 = vector.extract_strided_slice %13 {offsets = [8, 96], sizes = [8, 16], strides = [1, 1]} : vector<64x128xf32> to vector<8x16xf32>
    %c48_167 = arith.constant 48 : index
    %c16_168 = arith.constant 16 : index
    %178 = vector.load %arg18[%c48_167, %c16_168] : memref<64x128xf32, #tpu.memory_space<vmem>>, vector<8x16xf32>
    tpu.vector_store %arg18[%c48_167, %c16_168], %177 {strides = array<i32>} : memref<64x128xf32, #tpu.memory_space<vmem>>, vector<8x16xf32>,
    %179 = vector.extract_strided_slice %13 {offsets = [8, 112], sizes = [8, 16], strides = [1, 1]} : vector<64x128xf32> to vector<8x16xf32>
    %c56_169 = arith.constant 56 : index
    %c16_170 = arith.constant 16 : index
    %180 = vector.load %arg18[%c56_169, %c16_170] : memref<64x128xf32, #tpu.memory_space<vmem>>, vector<8x16xf32>
    tpu.vector_store %arg18[%c56_169, %c16_170], %179 {strides = array<i32>} : memref<64x128xf32, #tpu.memory_space<vmem>>, vector<8x16xf32>,
    %181 = vector.extract_strided_slice %13 {offsets = [16, 0], sizes = [8, 16], strides = [1, 1]} : vector<64x128xf32> to vector<8x16xf32>
    %c0_171 = arith.constant 0 : index
    %c32_172 = arith.constant 32 : index
    %182 = vector.load %arg18[%c0_171, %c32_172] : memref<64x128xf32, #tpu.memory_space<vmem>>, vector<8x16xf32>
    tpu.vector_store %arg18[%c0_171, %c32_172], %181 {strides = array<i32>} : memref<64x128xf32, #tpu.memory_space<vmem>>, vector<8x16xf32>,
    %183 = vector.extract_strided_slice %13 {offsets = [16, 16], sizes = [8, 16], strides = [1, 1]} : vector<64x128xf32> to vector<8x16xf32>
    %c8_173 = arith.constant 8 : index
    %c32_174 = arith.constant 32 : index
    %184 = vector.load %arg18[%c8_173, %c32_174] : memref<64x128xf32, #tpu.memory_space<vmem>>, vector<8x16xf32>
    tpu.vector_store %arg18[%c8_173, %c32_174], %183 {strides = array<i32>} : memref<64x128xf32, #tpu.memory_space<vmem>>, vector<8x16xf32>,
    %185 = vector.extract_strided_slice %13 {offsets = [16, 32], sizes = [8, 16], strides = [1, 1]} : vector<64x128xf32> to vector<8x16xf32>
    %c16_175 = arith.constant 16 : index
    %c32_176 = arith.constant 32 : index
    %186 = vector.load %arg18[%c16_175, %c32_176] : memref<64x128xf32, #tpu.memory_space<vmem>>, vector<8x16xf32>
    tpu.vector_store %arg18[%c16_175, %c32_176], %185 {strides = array<i32>} : memref<64x128xf32, #tpu.memory_space<vmem>>, vector<8x16xf32>,
    %187 = vector.extract_strided_slice %13 {offsets = [16, 48], sizes = [8, 16], strides = [1, 1]} : vector<64x128xf32> to vector<8x16xf32>
    %c24_177 = arith.constant 24 : index
    %c32_178 = arith.constant 32 : index
    %188 = vector.load %arg18[%c24_177, %c32_178] : memref<64x128xf32, #tpu.memory_space<vmem>>, vector<8x16xf32>
    tpu.vector_store %arg18[%c24_177, %c32_178], %187 {strides = array<i32>} : memref<64x128xf32, #tpu.memory_space<vmem>>, vector<8x16xf32>,
    %189 = vector.extract_strided_slice %13 {offsets = [16, 64], sizes = [8, 16], strides = [1, 1]} : vector<64x128xf32> to vector<8x16xf32>
    %c32_179 = arith.constant 32 : index
    %c32_180 = arith.constant 32 : index
    %190 = vector.load %arg18[%c32_179, %c32_180] : memref<64x128xf32, #tpu.memory_space<vmem>>, vector<8x16xf32>
    tpu.vector_store %arg18[%c32_179, %c32_180], %189 {strides = array<i32>} : memref<64x128xf32, #tpu.memory_space<vmem>>, vector<8x16xf32>,
    %191 = vector.extract_strided_slice %13 {offsets = [16, 80], sizes = [8, 16], strides = [1, 1]} : vector<64x128xf32> to vector<8x16xf32>
    %c40_181 = arith.constant 40 : index
    %c32_182 = arith.constant 32 : index
    %192 = vector.load %arg18[%c40_181, %c32_182] : memref<64x128xf32, #tpu.memory_space<vmem>>, vector<8x16xf32>
    tpu.vector_store %arg18[%c40_181, %c32_182], %191 {strides = array<i32>} : memref<64x128xf32, #tpu.memory_space<vmem>>, vector<8x16xf32>,
    %193 = vector.extract_strided_slice %13 {offsets = [16, 96], sizes = [8, 16], strides = [1, 1]} : vector<64x128xf32> to vector<8x16xf32>
    %c48_183 = arith.constant 48 : index
    %c32_184 = arith.constant 32 : index
    %194 = vector.load %arg18[%c48_183, %c32_184] : memref<64x128xf32, #tpu.memory_space<vmem>>, vector<8x16xf32>
    tpu.vector_store %arg18[%c48_183, %c32_184], %193 {strides = array<i32>} : memref<64x128xf32, #tpu.memory_space<vmem>>, vector<8x16xf32>,
    %195 = vector.extract_strided_slice %13 {offsets = [16, 112], sizes = [8, 16], strides = [1, 1]} : vector<64x128xf32> to vector<8x16xf32>
    %c56_185 = arith.constant 56 : index
    %c32_186 = arith.constant 32 : index
    %196 = vector.load %arg18[%c56_185, %c32_186] : memref<64x128xf32, #tpu.memory_space<vmem>>, vector<8x16xf32>
    tpu.vector_store %arg18[%c56_185, %c32_186], %195 {strides = array<i32>} : memref<64x128xf32, #tpu.memory_space<vmem>>, vector<8x16xf32>,
    %197 = vector.extract_strided_slice %13 {offsets = [24, 0], sizes = [8, 16], strides = [1, 1]} : vector<64x128xf32> to vector<8x16xf32>
    %c0_187 = arith.constant 0 : index
    %c48_188 = arith.constant 48 : index
    %198 = vector.load %arg18[%c0_187, %c48_188] : memref<64x128xf32, #tpu.memory_space<vmem>>, vector<8x16xf32>
    tpu.vector_store %arg18[%c0_187, %c48_188], %197 {strides = array<i32>} : memref<64x128xf32, #tpu.memory_space<vmem>>, vector<8x16xf32>,
    %199 = vector.extract_strided_slice %13 {offsets = [24, 16], sizes = [8, 16], strides = [1, 1]} : vector<64x128xf32> to vector<8x16xf32>
    %c8_189 = arith.constant 8 : index
    %c48_190 = arith.constant 48 : index
    %200 = vector.load %arg18[%c8_189, %c48_190] : memref<64x128xf32, #tpu.memory_space<vmem>>, vector<8x16xf32>
    tpu.vector_store %arg18[%c8_189, %c48_190], %199 {strides = array<i32>} : memref<64x128xf32, #tpu.memory_space<vmem>>, vector<8x16xf32>,
    %201 = vector.extract_strided_slice %13 {offsets = [24, 32], sizes = [8, 16], strides = [1, 1]} : vector<64x128xf32> to vector<8x16xf32>
    %c16_191 = arith.constant 16 : index
    %c48_192 = arith.constant 48 : index
    %202 = vector.load %arg18[%c16_191, %c48_192] : memref<64x128xf32, #tpu.memory_space<vmem>>, vector<8x16xf32>
    tpu.vector_store %arg18[%c16_191, %c48_192], %201 {strides = array<i32>} : memref<64x128xf32, #tpu.memory_space<vmem>>, vector<8x16xf32>,
    %203 = vector.extract_strided_slice %13 {offsets = [24, 48], sizes = [8, 16], strides = [1, 1]} : vector<64x128xf32> to vector<8x16xf32>
    %c24_193 = arith.constant 24 : index
    %c48_194 = arith.constant 48 : index
    %204 = vector.load %arg18[%c24_193, %c48_194] : memref<64x128xf32, #tpu.memory_space<vmem>>, vector<8x16xf32>
    tpu.vector_store %arg18[%c24_193, %c48_194], %203 {strides = array<i32>} : memref<64x128xf32, #tpu.memory_space<vmem>>, vector<8x16xf32>,
    %205 = vector.extract_strided_slice %13 {offsets = [24, 64], sizes = [8, 16], strides = [1, 1]} : vector<64x128xf32> to vector<8x16xf32>
    %c32_195 = arith.constant 32 : index
    %c48_196 = arith.constant 48 : index
    %206 = vector.load %arg18[%c32_195, %c48_196] : memref<64x128xf32, #tpu.memory_space<vmem>>, vector<8x16xf32>
    tpu.vector_store %arg18[%c32_195, %c48_196], %205 {strides = array<i32>} : memref<64x128xf32, #tpu.memory_space<vmem>>, vector<8x16xf32>,
    %207 = vector.extract_strided_slice %13 {offsets = [24, 80], sizes = [8, 16], strides = [1, 1]} : vector<64x128xf32> to vector<8x16xf32>
    %c40_197 = arith.constant 40 : index
    %c48_198 = arith.constant 48 : index
    %208 = vector.load %arg18[%c40_197, %c48_198] : memref<64x128xf32, #tpu.memory_space<vmem>>, vector<8x16xf32>
    tpu.vector_store %arg18[%c40_197, %c48_198], %207 {strides = array<i32>} : memref<64x128xf32, #tpu.memory_space<vmem>>, vector<8x16xf32>,
    %209 = vector.extract_strided_slice %13 {offsets = [24, 96], sizes = [8, 16], strides = [1, 1]} : vector<64x128xf32> to vector<8x16xf32>
    %c48_199 = arith.constant 48 : index
    %c48_200 = arith.constant 48 : index
    %210 = vector.load %arg18[%c48_199, %c48_200] : memref<64x128xf32, #tpu.memory_space<vmem>>, vector<8x16xf32>
    tpu.vector_store %arg18[%c48_199, %c48_200], %209 {strides = array<i32>} : memref<64x128xf32, #tpu.memory_space<vmem>>, vector<8x16xf32>,
    %211 = vector.extract_strided_slice %13 {offsets = [24, 112], sizes = [8, 16], strides = [1, 1]} : vector<64x128xf32> to vector<8x16xf32>
    %c56_201 = arith.constant 56 : index
    %c48_202 = arith.constant 48 : index
    %212 = vector.load %arg18[%c56_201, %c48_202] : memref<64x128xf32, #tpu.memory_space<vmem>>, vector<8x16xf32>
    tpu.vector_store %arg18[%c56_201, %c48_202], %211 {strides = array<i32>} : memref<64x128xf32, #tpu.memory_space<vmem>>, vector<8x16xf32>,
    %213 = vector.extract_strided_slice %13 {offsets = [32, 0], sizes = [8, 16], strides = [1, 1]} : vector<64x128xf32> to vector<8x16xf32>
    %c0_203 = arith.constant 0 : index
    %c64_204 = arith.constant 64 : index
    %214 = vector.load %arg18[%c0_203, %c64_204] : memref<64x128xf32, #tpu.memory_space<vmem>>, vector<8x16xf32>
    tpu.vector_store %arg18[%c0_203, %c64_204], %213 {strides = array<i32>} : memref<64x128xf32, #tpu.memory_space<vmem>>, vector<8x16xf32>,
    %215 = vector.extract_strided_slice %13 {offsets = [32, 16], sizes = [8, 16], strides = [1, 1]} : vector<64x128xf32> to vector<8x16xf32>
    %c8_205 = arith.constant 8 : index
    %c64_206 = arith.constant 64 : index
    %216 = vector.load %arg18[%c8_205, %c64_206] : memref<64x128xf32, #tpu.memory_space<vmem>>, vector<8x16xf32>
    tpu.vector_store %arg18[%c8_205, %c64_206], %215 {strides = array<i32>} : memref<64x128xf32, #tpu.memory_space<vmem>>, vector<8x16xf32>,
    %217 = vector.extract_strided_slice %13 {offsets = [32, 32], sizes = [8, 16], strides = [1, 1]} : vector<64x128xf32> to vector<8x16xf32>
    %c16_207 = arith.constant 16 : index
    %c64_208 = arith.constant 64 : index
    %218 = vector.load %arg18[%c16_207, %c64_208] : memref<64x128xf32, #tpu.memory_space<vmem>>, vector<8x16xf32>
    tpu.vector_store %arg18[%c16_207, %c64_208], %217 {strides = array<i32>} : memref<64x128xf32, #tpu.memory_space<vmem>>, vector<8x16xf32>,
    %219 = vector.extract_strided_slice %13 {offsets = [32, 48], sizes = [8, 16], strides = [1, 1]} : vector<64x128xf32> to vector<8x16xf32>
    %c24_209 = arith.constant 24 : index
    %c64_210 = arith.constant 64 : index
    %220 = vector.load %arg18[%c24_209, %c64_210] : memref<64x128xf32, #tpu.memory_space<vmem>>, vector<8x16xf32>
    tpu.vector_store %arg18[%c24_209, %c64_210], %219 {strides = array<i32>} : memref<64x128xf32, #tpu.memory_space<vmem>>, vector<8x16xf32>,
    %221 = vector.extract_strided_slice %13 {offsets = [32, 64], sizes = [8, 16], strides = [1, 1]} : vector<64x128xf32> to vector<8x16xf32>
    %c32_211 = arith.constant 32 : index
    %c64_212 = arith.constant 64 : index
    %222 = vector.load %arg18[%c32_211, %c64_212] : memref<64x128xf32, #tpu.memory_space<vmem>>, vector<8x16xf32>
    tpu.vector_store %arg18[%c32_211, %c64_212], %221 {strides = array<i32>} : memref<64x128xf32, #tpu.memory_space<vmem>>, vector<8x16xf32>,
    %223 = vector.extract_strided_slice %13 {offsets = [32, 80], sizes = [8, 16], strides = [1, 1]} : vector<64x128xf32> to vector<8x16xf32>
    %c40_213 = arith.constant 40 : index
    %c64_214 = arith.constant 64 : index
    %224 = vector.load %arg18[%c40_213, %c64_214] : memref<64x128xf32, #tpu.memory_space<vmem>>, vector<8x16xf32>
    tpu.vector_store %arg18[%c40_213, %c64_214], %223 {strides = array<i32>} : memref<64x128xf32, #tpu.memory_space<vmem>>, vector<8x16xf32>,
    %225 = vector.extract_strided_slice %13 {offsets = [32, 96], sizes = [8, 16], strides = [1, 1]} : vector<64x128xf32> to vector<8x16xf32>
    %c48_215 = arith.constant 48 : index
    %c64_216 = arith.constant 64 : index
    %226 = vector.load %arg18[%c48_215, %c64_216] : memref<64x128xf32, #tpu.memory_space<vmem>>, vector<8x16xf32>
    tpu.vector_store %arg18[%c48_215, %c64_216], %225 {strides = array<i32>} : memref<64x128xf32, #tpu.memory_space<vmem>>, vector<8x16xf32>,
    %227 = vector.extract_strided_slice %13 {offsets = [32, 112], sizes = [8, 16], strides = [1, 1]} : vector<64x128xf32> to vector<8x16xf32>
    %c56_217 = arith.constant 56 : index
    %c64_218 = arith.constant 64 : index
    %228 = vector.load %arg18[%c56_217, %c64_218] : memref<64x128xf32, #tpu.memory_space<vmem>>, vector<8x16xf32>
    tpu.vector_store %arg18[%c56_217, %c64_218], %227 {strides = array<i32>} : memref<64x128xf32, #tpu.memory_space<vmem>>, vector<8x16xf32>,
    %229 = vector.extract_strided_slice %13 {offsets = [40, 0], sizes = [8, 16], strides = [1, 1]} : vector<64x128xf32> to vector<8x16xf32>
    %c0_219 = arith.constant 0 : index
    %c80_220 = arith.constant 80 : index
    %230 = vector.load %arg18[%c0_219, %c80_220] : memref<64x128xf32, #tpu.memory_space<vmem>>, vector<8x16xf32>
    tpu.vector_store %arg18[%c0_219, %c80_220], %229 {strides = array<i32>} : memref<64x128xf32, #tpu.memory_space<vmem>>, vector<8x16xf32>,
    %231 = vector.extract_strided_slice %13 {offsets = [40, 16], sizes = [8, 16], strides = [1, 1]} : vector<64x128xf32> to vector<8x16xf32>
    %c8_221 = arith.constant 8 : index
    %c80_222 = arith.constant 80 : index
    %232 = vector.load %arg18[%c8_221, %c80_222] : memref<64x128xf32, #tpu.memory_space<vmem>>, vector<8x16xf32>
    tpu.vector_store %arg18[%c8_221, %c80_222], %231 {strides = array<i32>} : memref<64x128xf32, #tpu.memory_space<vmem>>, vector<8x16xf32>,
    %233 = vector.extract_strided_slice %13 {offsets = [40, 32], sizes = [8, 16], strides = [1, 1]} : vector<64x128xf32> to vector<8x16xf32>
    %c16_223 = arith.constant 16 : index
    %c80_224 = arith.constant 80 : index
    %234 = vector.load %arg18[%c16_223, %c80_224] : memref<64x128xf32, #tpu.memory_space<vmem>>, vector<8x16xf32>
    tpu.vector_store %arg18[%c16_223, %c80_224], %233 {strides = array<i32>} : memref<64x128xf32, #tpu.memory_space<vmem>>, vector<8x16xf32>,
    %235 = vector.extract_strided_slice %13 {offsets = [40, 48], sizes = [8, 16], strides = [1, 1]} : vector<64x128xf32> to vector<8x16xf32>
    %c24_225 = arith.constant 24 : index
    %c80_226 = arith.constant 80 : index
    %236 = vector.load %arg18[%c24_225, %c80_226] : memref<64x128xf32, #tpu.memory_space<vmem>>, vector<8x16xf32>
    tpu.vector_store %arg18[%c24_225, %c80_226], %235 {strides = array<i32>} : memref<64x128xf32, #tpu.memory_space<vmem>>, vector<8x16xf32>,
    %237 = vector.extract_strided_slice %13 {offsets = [40, 64], sizes = [8, 16], strides = [1, 1]} : vector<64x128xf32> to vector<8x16xf32>
    %c32_227 = arith.constant 32 : index
    %c80_228 = arith.constant 80 : index
    %238 = vector.load %arg18[%c32_227, %c80_228] : memref<64x128xf32, #tpu.memory_space<vmem>>, vector<8x16xf32>
    tpu.vector_store %arg18[%c32_227, %c80_228], %237 {strides = array<i32>} : memref<64x128xf32, #tpu.memory_space<vmem>>, vector<8x16xf32>,
    %239 = vector.extract_strided_slice %13 {offsets = [40, 80], sizes = [8, 16], strides = [1, 1]} : vector<64x128xf32> to vector<8x16xf32>
    %c40_229 = arith.constant 40 : index
    %c80_230 = arith.constant 80 : index
    %240 = vector.load %arg18[%c40_229, %c80_230] : memref<64x128xf32, #tpu.memory_space<vmem>>, vector<8x16xf32>
    tpu.vector_store %arg18[%c40_229, %c80_230], %239 {strides = array<i32>} : memref<64x128xf32, #tpu.memory_space<vmem>>, vector<8x16xf32>,
    %241 = vector.extract_strided_slice %13 {offsets = [40, 96], sizes = [8, 16], strides = [1, 1]} : vector<64x128xf32> to vector<8x16xf32>
    %c48_231 = arith.constant 48 : index
    %c80_232 = arith.constant 80 : index
    %242 = vector.load %arg18[%c48_231, %c80_232] : memref<64x128xf32, #tpu.memory_space<vmem>>, vector<8x16xf32>
    tpu.vector_store %arg18[%c48_231, %c80_232], %241 {strides = array<i32>} : memref<64x128xf32, #tpu.memory_space<vmem>>, vector<8x16xf32>,
    %243 = vector.extract_strided_slice %13 {offsets = [40, 112], sizes = [8, 16], strides = [1, 1]} : vector<64x128xf32> to vector<8x16xf32>
    %c56_233 = arith.constant 56 : index
    %c80_234 = arith.constant 80 : index
    %244 = vector.load %arg18[%c56_233, %c80_234] : memref<64x128xf32, #tpu.memory_space<vmem>>, vector<8x16xf32>
    tpu.vector_store %arg18[%c56_233, %c80_234], %243 {strides = array<i32>} : memref<64x128xf32, #tpu.memory_space<vmem>>, vector<8x16xf32>,
    %245 = vector.extract_strided_slice %13 {offsets = [48, 0], sizes = [8, 16], strides = [1, 1]} : vector<64x128xf32> to vector<8x16xf32>
    %c0_235 = arith.constant 0 : index
    %c96_236 = arith.constant 96 : index
    %246 = vector.load %arg18[%c0_235, %c96_236] : memref<64x128xf32, #tpu.memory_space<vmem>>, vector<8x16xf32>
    tpu.vector_store %arg18[%c0_235, %c96_236], %245 {strides = array<i32>} : memref<64x128xf32, #tpu.memory_space<vmem>>, vector<8x16xf32>,
    %247 = vector.extract_strided_slice %13 {offsets = [48, 16], sizes = [8, 16], strides = [1, 1]} : vector<64x128xf32> to vector<8x16xf32>
    %c8_237 = arith.constant 8 : index
    %c96_238 = arith.constant 96 : index
    %248 = vector.load %arg18[%c8_237, %c96_238] : memref<64x128xf32, #tpu.memory_space<vmem>>, vector<8x16xf32>
    tpu.vector_store %arg18[%c8_237, %c96_238], %247 {strides = array<i32>} : memref<64x128xf32, #tpu.memory_space<vmem>>, vector<8x16xf32>,
    %249 = vector.extract_strided_slice %13 {offsets = [48, 32], sizes = [8, 16], strides = [1, 1]} : vector<64x128xf32> to vector<8x16xf32>
    %c16_239 = arith.constant 16 : index
    %c96_240 = arith.constant 96 : index
    %250 = vector.load %arg18[%c16_239, %c96_240] : memref<64x128xf32, #tpu.memory_space<vmem>>, vector<8x16xf32>
    tpu.vector_store %arg18[%c16_239, %c96_240], %249 {strides = array<i32>} : memref<64x128xf32, #tpu.memory_space<vmem>>, vector<8x16xf32>,
    %251 = vector.extract_strided_slice %13 {offsets = [48, 48], sizes = [8, 16], strides = [1, 1]} : vector<64x128xf32> to vector<8x16xf32>
    %c24_241 = arith.constant 24 : index
    %c96_242 = arith.constant 96 : index
    %252 = vector.load %arg18[%c24_241, %c96_242] : memref<64x128xf32, #tpu.memory_space<vmem>>, vector<8x16xf32>
    tpu.vector_store %arg18[%c24_241, %c96_242], %251 {strides = array<i32>} : memref<64x128xf32, #tpu.memory_space<vmem>>, vector<8x16xf32>,
    %253 = vector.extract_strided_slice %13 {offsets = [48, 64], sizes = [8, 16], strides = [1, 1]} : vector<64x128xf32> to vector<8x16xf32>
    %c32_243 = arith.constant 32 : index
    %c96_244 = arith.constant 96 : index
    %254 = vector.load %arg18[%c32_243, %c96_244] : memref<64x128xf32, #tpu.memory_space<vmem>>, vector<8x16xf32>
    tpu.vector_store %arg18[%c32_243, %c96_244], %253 {strides = array<i32>} : memref<64x128xf32, #tpu.memory_space<vmem>>, vector<8x16xf32>,
    %255 = vector.extract_strided_slice %13 {offsets = [48, 80], sizes = [8, 16], strides = [1, 1]} : vector<64x128xf32> to vector<8x16xf32>
    %c40_245 = arith.constant 40 : index
    %c96_246 = arith.constant 96 : index
    %256 = vector.load %arg18[%c40_245, %c96_246] : memref<64x128xf32, #tpu.memory_space<vmem>>, vector<8x16xf32>
    tpu.vector_store %arg18[%c40_245, %c96_246], %255 {strides = array<i32>} : memref<64x128xf32, #tpu.memory_space<vmem>>, vector<8x16xf32>,
    %257 = vector.extract_strided_slice %13 {offsets = [48, 96], sizes = [8, 16], strides = [1, 1]} : vector<64x128xf32> to vector<8x16xf32>
    %c48_247 = arith.constant 48 : index
    %c96_248 = arith.constant 96 : index
    %258 = vector.load %arg18[%c48_247, %c96_248] : memref<64x128xf32, #tpu.memory_space<vmem>>, vector<8x16xf32>
    tpu.vector_store %arg18[%c48_247, %c96_248], %257 {strides = array<i32>} : memref<64x128xf32, #tpu.memory_space<vmem>>, vector<8x16xf32>,
    %259 = vector.extract_strided_slice %13 {offsets = [48, 112], sizes = [8, 16], strides = [1, 1]} : vector<64x128xf32> to vector<8x16xf32>
    %c56_249 = arith.constant 56 : index
    %c96_250 = arith.constant 96 : index
    %260 = vector.load %arg18[%c56_249, %c96_250] : memref<64x128xf32, #tpu.memory_space<vmem>>, vector<8x16xf32>
    tpu.vector_store %arg18[%c56_249, %c96_250], %259 {strides = array<i32>} : memref<64x128xf32, #tpu.memory_space<vmem>>, vector<8x16xf32>,
    %261 = vector.extract_strided_slice %13 {offsets = [56, 0], sizes = [8, 16], strides = [1, 1]} : vector<64x128xf32> to vector<8x16xf32>
    %c0_251 = arith.constant 0 : index
    %c112_252 = arith.constant 112 : index
    %262 = vector.load %arg18[%c0_251, %c112_252] : memref<64x128xf32, #tpu.memory_space<vmem>>, vector<8x16xf32>
    tpu.vector_store %arg18[%c0_251, %c112_252], %261 {strides = array<i32>} : memref<64x128xf32, #tpu.memory_space<vmem>>, vector<8x16xf32>,
    %263 = vector.extract_strided_slice %13 {offsets = [56, 16], sizes = [8, 16], strides = [1, 1]} : vector<64x128xf32> to vector<8x16xf32>
    %c8_253 = arith.constant 8 : index
    %c112_254 = arith.constant 112 : index
    %264 = vector.load %arg18[%c8_253, %c112_254] : memref<64x128xf32, #tpu.memory_space<vmem>>, vector<8x16xf32>
    tpu.vector_store %arg18[%c8_253, %c112_254], %263 {strides = array<i32>} : memref<64x128xf32, #tpu.memory_space<vmem>>, vector<8x16xf32>,
    %265 = vector.extract_strided_slice %13 {offsets = [56, 32], sizes = [8, 16], strides = [1, 1]} : vector<64x128xf32> to vector<8x16xf32>
    %c16_255 = arith.constant 16 : index
    %c112_256 = arith.constant 112 : index
    %266 = vector.load %arg18[%c16_255, %c112_256] : memref<64x128xf32, #tpu.memory_space<vmem>>, vector<8x16xf32>
    tpu.vector_store %arg18[%c16_255, %c112_256], %265 {strides = array<i32>} : memref<64x128xf32, #tpu.memory_space<vmem>>, vector<8x16xf32>,
    %267 = vector.extract_strided_slice %13 {offsets = [56, 48], sizes = [8, 16], strides = [1, 1]} : vector<64x128xf32> to vector<8x16xf32>
    %c24_257 = arith.constant 24 : index
    %c112_258 = arith.constant 112 : index
    %268 = vector.load %arg18[%c24_257, %c112_258] : memref<64x128xf32, #tpu.memory_space<vmem>>, vector<8x16xf32>
    tpu.vector_store %arg18[%c24_257, %c112_258], %267 {strides = array<i32>} : memref<64x128xf32, #tpu.memory_space<vmem>>, vector<8x16xf32>,
    %269 = vector.extract_strided_slice %13 {offsets = [56, 64], sizes = [8, 16], strides = [1, 1]} : vector<64x128xf32> to vector<8x16xf32>
    %c32_259 = arith.constant 32 : index
    %c112_260 = arith.constant 112 : index
    %270 = vector.load %arg18[%c32_259, %c112_260] : memref<64x128xf32, #tpu.memory_space<vmem>>, vector<8x16xf32>
    tpu.vector_store %arg18[%c32_259, %c112_260], %269 {strides = array<i32>} : memref<64x128xf32, #tpu.memory_space<vmem>>, vector<8x16xf32>,
    %271 = vector.extract_strided_slice %13 {offsets = [56, 80], sizes = [8, 16], strides = [1, 1]} : vector<64x128xf32> to vector<8x16xf32>
    %c40_261 = arith.constant 40 : index
    %c112_262 = arith.constant 112 : index
    %272 = vector.load %arg18[%c40_261, %c112_262] : memref<64x128xf32, #tpu.memory_space<vmem>>, vector<8x16xf32>
    tpu.vector_store %arg18[%c40_261, %c112_262], %271 {strides = array<i32>} : memref<64x128xf32, #tpu.memory_space<vmem>>, vector<8x16xf32>,
    %273 = vector.extract_strided_slice %13 {offsets = [56, 96], sizes = [8, 16], strides = [1, 1]} : vector<64x128xf32> to vector<8x16xf32>
    %c48_263 = arith.constant 48 : index
    %c112_264 = arith.constant 112 : index
    %274 = vector.load %arg18[%c48_263, %c112_264] : memref<64x128xf32, #tpu.memory_space<vmem>>, vector<8x16xf32>
    tpu.vector_store %arg18[%c48_263, %c112_264], %273 {strides = array<i32>} : memref<64x128xf32, #tpu.memory_space<vmem>>, vector<8x16xf32>,
    %275 = vector.extract_strided_slice %13 {offsets = [56, 112], sizes = [8, 16], strides = [1, 1]} : vector<64x128xf32> to vector<8x16xf32>
    %c56_265 = arith.constant 56 : index
    %c112_266 = arith.constant 112 : index
    %276 = vector.load %arg18[%c56_265, %c112_266] : memref<64x128xf32, #tpu.memory_space<vmem>>, vector<8x16xf32>
    tpu.vector_store %arg18[%c56_265, %c112_266], %275 {strides = array<i32>} : memref<64x128xf32, #tpu.memory_space<vmem>>, vector<8x16xf32>,
    %c0_267 = arith.constant 0 : index
    %c0_268 = arith.constant 0 : index
    %277 = vector.load %arg18[%c0_267, %c0_268] : memref<64x128xf32, #tpu.memory_space<vmem>>, vector<1x128xf32>
    %c0_269 = arith.constant 0 : index
    %c0_270 = arith.constant 0 : index
    %278 = vector.load %arg19[%c0_269, %c0_270] : memref<64x128xf32, #tpu.memory_space<vmem>>, vector<1x128xf32>
    tpu.vector_store %arg19[%c0_269, %c0_270], %277 {strides = array<i32>} : memref<64x128xf32, #tpu.memory_space<vmem>>, vector<1x128xf32>,
    %c8_271 = arith.constant 8 : index
    %c0_272 = arith.constant 0 : index
    %279 = vector.load %arg18[%c8_271, %c0_272] : memref<64x128xf32, #tpu.memory_space<vmem>>, vector<1x128xf32>
    %c1 = arith.constant 1 : index
    %c0_273 = arith.constant 0 : index
    %280 = vector.load %arg19[%c1, %c0_273] : memref<64x128xf32, #tpu.memory_space<vmem>>, vector<1x128xf32>
    tpu.vector_store %arg19[%c1, %c0_273], %279 {strides = array<i32>} : memref<64x128xf32, #tpu.memory_space<vmem>>, vector<1x128xf32>,
    %c16_274 = arith.constant 16 : index
    %c0_275 = arith.constant 0 : index
    %281 = vector.load %arg18[%c16_274, %c0_275] : memref<64x128xf32, #tpu.memory_space<vmem>>, vector<1x128xf32>
    %c2 = arith.constant 2 : index
    %c0_276 = arith.constant 0 : index
    %282 = vector.load %arg19[%c2, %c0_276] : memref<64x128xf32, #tpu.memory_space<vmem>>, vector<1x128xf32>
    tpu.vector_store %arg19[%c2, %c0_276], %281 {strides = array<i32>} : memref<64x128xf32, #tpu.memory_space<vmem>>, vector<1x128xf32>,
    %c24_277 = arith.constant 24 : index
    %c0_278 = arith.constant 0 : index
    %283 = vector.load %arg18[%c24_277, %c0_278] : memref<64x128xf32, #tpu.memory_space<vmem>>, vector<1x128xf32>
    %c3 = arith.constant 3 : index
    %c0_279 = arith.constant 0 : index
    %284 = vector.load %arg19[%c3, %c0_279] : memref<64x128xf32, #tpu.memory_space<vmem>>, vector<1x128xf32>
    tpu.vector_store %arg19[%c3, %c0_279], %283 {strides = array<i32>} : memref<64x128xf32, #tpu.memory_space<vmem>>, vector<1x128xf32>,
    %c32_280 = arith.constant 32 : index
    %c0_281 = arith.constant 0 : index
    %285 = vector.load %arg18[%c32_280, %c0_281] : memref<64x128xf32, #tpu.memory_space<vmem>>, vector<1x128xf32>
    %c4 = arith.constant 4 : index
    %c0_282 = arith.constant 0 : index
    %286 = vector.load %arg19[%c4, %c0_282] : memref<64x128xf32, #tpu.memory_space<vmem>>, vector<1x128xf32>
    tpu.vector_store %arg19[%c4, %c0_282], %285 {strides = array<i32>} : memref<64x128xf32, #tpu.memory_space<vmem>>, vector<1x128xf32>,
    %c40_283 = arith.constant 40 : index
    %c0_284 = arith.constant 0 : index
    %287 = vector.load %arg18[%c40_283, %c0_284] : memref<64x128xf32, #tpu.memory_space<vmem>>, vector<1x128xf32>
    %c5 = arith.constant 5 : index
    %c0_285 = arith.constant 0 : index
    %288 = vector.load %arg19[%c5, %c0_285] : memref<64x128xf32, #tpu.memory_space<vmem>>, vector<1x128xf32>
    tpu.vector_store %arg19[%c5, %c0_285], %287 {strides = array<i32>} : memref<64x128xf32, #tpu.memory_space<vmem>>, vector<1x128xf32>,
    %c48_286 = arith.constant 48 : index
    %c0_287 = arith.constant 0 : index
    %289 = vector.load %arg18[%c48_286, %c0_287] : memref<64x128xf32, #tpu.memory_space<vmem>>, vector<1x128xf32>
    %c6 = arith.constant 6 : index
    %c0_288 = arith.constant 0 : index
    %290 = vector.load %arg19[%c6, %c0_288] : memref<64x128xf32, #tpu.memory_space<vmem>>, vector<1x128xf32>
    tpu.vector_store %arg19[%c6, %c0_288], %289 {strides = array<i32>} : memref<64x128xf32, #tpu.memory_space<vmem>>, vector<1x128xf32>,
    %c56_289 = arith.constant 56 : index
    %c0_290 = arith.constant 0 : index
    %291 = vector.load %arg18[%c56_289, %c0_290] : memref<64x128xf32, #tpu.memory_space<vmem>>, vector<1x128xf32>
    %c7 = arith.constant 7 : index
    %c0_291 = arith.constant 0 : index
    %292 = vector.load %arg19[%c7, %c0_291] : memref<64x128xf32, #tpu.memory_space<vmem>>, vector<1x128xf32>
    tpu.vector_store %arg19[%c7, %c0_291], %291 {strides = array<i32>} : memref<64x128xf32, #tpu.memory_space<vmem>>, vector<1x128xf32>,
    %c1_292 = arith.constant 1 : index
    %c0_293 = arith.constant 0 : index
    %293 = vector.load %arg18[%c1_292, %c0_293] : memref<64x128xf32, #tpu.memory_space<vmem>>, vector<1x128xf32>
    %c8_294 = arith.constant 8 : index
    %c0_295 = arith.constant 0 : index
    %294 = vector.load %arg19[%c8_294, %c0_295] : memref<64x128xf32, #tpu.memory_space<vmem>>, vector<1x128xf32>
    tpu.vector_store %arg19[%c8_294, %c0_295], %293 {strides = array<i32>} : memref<64x128xf32, #tpu.memory_space<vmem>>, vector<1x128xf32>,
    %c9 = arith.constant 9 : index
    %c0_296 = arith.constant 0 : index
    %295 = vector.load %arg18[%c9, %c0_296] : memref<64x128xf32, #tpu.memory_space<vmem>>, vector<1x128xf32>
    %c9_297 = arith.constant 9 : index
    %c0_298 = arith.constant 0 : index
    %296 = vector.load %arg19[%c9_297, %c0_298] : memref<64x128xf32, #tpu.memory_space<vmem>>, vector<1x128xf32>
    tpu.vector_store %arg19[%c9_297, %c0_298], %295 {strides = array<i32>} : memref<64x128xf32, #tpu.memory_space<vmem>>, vector<1x128xf32>,
    %c17 = arith.constant 17 : index
    %c0_299 = arith.constant 0 : index
    %297 = vector.load %arg18[%c17, %c0_299] : memref<64x128xf32, #tpu.memory_space<vmem>>, vector<1x128xf32>
    %c10 = arith.constant 10 : index
    %c0_300 = arith.constant 0 : index
    %298 = vector.load %arg19[%c10, %c0_300] : memref<64x128xf32, #tpu.memory_space<vmem>>, vector<1x128xf32>
    tpu.vector_store %arg19[%c10, %c0_300], %297 {strides = array<i32>} : memref<64x128xf32, #tpu.memory_space<vmem>>, vector<1x128xf32>,
    %c25 = arith.constant 25 : index
    %c0_301 = arith.constant 0 : index
    %299 = vector.load %arg18[%c25, %c0_301] : memref<64x128xf32, #tpu.memory_space<vmem>>, vector<1x128xf32>
    %c11 = arith.constant 11 : index
    %c0_302 = arith.constant 0 : index
    %300 = vector.load %arg19[%c11, %c0_302] : memref<64x128xf32, #tpu.memory_space<vmem>>, vector<1x128xf32>
    tpu.vector_store %arg19[%c11, %c0_302], %299 {strides = array<i32>} : memref<64x128xf32, #tpu.memory_space<vmem>>, vector<1x128xf32>,
    %c33 = arith.constant 33 : index
    %c0_303 = arith.constant 0 : index
    %301 = vector.load %arg18[%c33, %c0_303] : memref<64x128xf32, #tpu.memory_space<vmem>>, vector<1x128xf32>
    %c12 = arith.constant 12 : index
    %c0_304 = arith.constant 0 : index
    %302 = vector.load %arg19[%c12, %c0_304] : memref<64x128xf32, #tpu.memory_space<vmem>>, vector<1x128xf32>
    tpu.vector_store %arg19[%c12, %c0_304], %301 {strides = array<i32>} : memref<64x128xf32, #tpu.memory_space<vmem>>, vector<1x128xf32>,
    %c41 = arith.constant 41 : index
    %c0_305 = arith.constant 0 : index
    %303 = vector.load %arg18[%c41, %c0_305] : memref<64x128xf32, #tpu.memory_space<vmem>>, vector<1x128xf32>
    %c13 = arith.constant 13 : index
    %c0_306 = arith.constant 0 : index
    %304 = vector.load %arg19[%c13, %c0_306] : memref<64x128xf32, #tpu.memory_space<vmem>>, vector<1x128xf32>
    tpu.vector_store %arg19[%c13, %c0_306], %303 {strides = array<i32>} : memref<64x128xf32, #tpu.memory_space<vmem>>, vector<1x128xf32>,
    %c49 = arith.constant 49 : index
    %c0_307 = arith.constant 0 : index
    %305 = vector.load %arg18[%c49, %c0_307] : memref<64x128xf32, #tpu.memory_space<vmem>>, vector<1x128xf32>
    %c14 = arith.constant 14 : index
    %c0_308 = arith.constant 0 : index
    %306 = vector.load %arg19[%c14, %c0_308] : memref<64x128xf32, #tpu.memory_space<vmem>>, vector<1x128xf32>
    tpu.vector_store %arg19[%c14, %c0_308], %305 {strides = array<i32>} : memref<64x128xf32, #tpu.memory_space<vmem>>, vector<1x128xf32>,
    %c57 = arith.constant 57 : index
    %c0_309 = arith.constant 0 : index
    %307 = vector.load %arg18[%c57, %c0_309] : memref<64x128xf32, #tpu.memory_space<vmem>>, vector<1x128xf32>
    %c15 = arith.constant 15 : index
    %c0_310 = arith.constant 0 : index
    %308 = vector.load %arg19[%c15, %c0_310] : memref<64x128xf32, #tpu.memory_space<vmem>>, vector<1x128xf32>
    tpu.vector_store %arg19[%c15, %c0_310], %307 {strides = array<i32>} : memref<64x128xf32, #tpu.memory_space<vmem>>, vector<1x128xf32>,
    %c2_311 = arith.constant 2 : index
    %c0_312 = arith.constant 0 : index
    %309 = vector.load %arg18[%c2_311, %c0_312] : memref<64x128xf32, #tpu.memory_space<vmem>>, vector<1x128xf32>
    %c16_313 = arith.constant 16 : index
    %c0_314 = arith.constant 0 : index
    %310 = vector.load %arg19[%c16_313, %c0_314] : memref<64x128xf32, #tpu.memory_space<vmem>>, vector<1x128xf32>
    tpu.vector_store %arg19[%c16_313, %c0_314], %309 {strides = array<i32>} : memref<64x128xf32, #tpu.memory_space<vmem>>, vector<1x128xf32>,
    %c10_315 = arith.constant 10 : index
    %c0_316 = arith.constant 0 : index
    %311 = vector.load %arg18[%c10_315, %c0_316] : memref<64x128xf32, #tpu.memory_space<vmem>>, vector<1x128xf32>
    %c17_317 = arith.constant 17 : index
    %c0_318 = arith.constant 0 : index
    %312 = vector.load %arg19[%c17_317, %c0_318] : memref<64x128xf32, #tpu.memory_space<vmem>>, vector<1x128xf32>
    tpu.vector_store %arg19[%c17_317, %c0_318], %311 {strides = array<i32>} : memref<64x128xf32, #tpu.memory_space<vmem>>, vector<1x128xf32>,
    %c18 = arith.constant 18 : index
    %c0_319 = arith.constant 0 : index
    %313 = vector.load %arg18[%c18, %c0_319] : memref<64x128xf32, #tpu.memory_space<vmem>>, vector<1x128xf32>
    %c18_320 = arith.constant 18 : index
    %c0_321 = arith.constant 0 : index
    %314 = vector.load %arg19[%c18_320, %c0_321] : memref<64x128xf32, #tpu.memory_space<vmem>>, vector<1x128xf32>
    tpu.vector_store %arg19[%c18_320, %c0_321], %313 {strides = array<i32>} : memref<64x128xf32, #tpu.memory_space<vmem>>, vector<1x128xf32>,
    %c26 = arith.constant 26 : index
    %c0_322 = arith.constant 0 : index
    %315 = vector.load %arg18[%c26, %c0_322] : memref<64x128xf32, #tpu.memory_space<vmem>>, vector<1x128xf32>
    %c19 = arith.constant 19 : index
    %c0_323 = arith.constant 0 : index
    %316 = vector.load %arg19[%c19, %c0_323] : memref<64x128xf32, #tpu.memory_space<vmem>>, vector<1x128xf32>
    tpu.vector_store %arg19[%c19, %c0_323], %315 {strides = array<i32>} : memref<64x128xf32, #tpu.memory_space<vmem>>, vector<1x128xf32>,
    %c34 = arith.constant 34 : index
    %c0_324 = arith.constant 0 : index
    %317 = vector.load %arg18[%c34, %c0_324] : memref<64x128xf32, #tpu.memory_space<vmem>>, vector<1x128xf32>
    %c20 = arith.constant 20 : index
    %c0_325 = arith.constant 0 : index
    %318 = vector.load %arg19[%c20, %c0_325] : memref<64x128xf32, #tpu.memory_space<vmem>>, vector<1x128xf32>
    tpu.vector_store %arg19[%c20, %c0_325], %317 {strides = array<i32>} : memref<64x128xf32, #tpu.memory_space<vmem>>, vector<1x128xf32>,
    %c42 = arith.constant 42 : index
    %c0_326 = arith.constant 0 : index
    %319 = vector.load %arg18[%c42, %c0_326] : memref<64x128xf32, #tpu.memory_space<vmem>>, vector<1x128xf32>
    %c21 = arith.constant 21 : index
    %c0_327 = arith.constant 0 : index
    %320 = vector.load %arg19[%c21, %c0_327] : memref<64x128xf32, #tpu.memory_space<vmem>>, vector<1x128xf32>
    tpu.vector_store %arg19[%c21, %c0_327], %319 {strides = array<i32>} : memref<64x128xf32, #tpu.memory_space<vmem>>, vector<1x128xf32>,
    %c50 = arith.constant 50 : index
    %c0_328 = arith.constant 0 : index
    %321 = vector.load %arg18[%c50, %c0_328] : memref<64x128xf32, #tpu.memory_space<vmem>>, vector<1x128xf32>
    %c22 = arith.constant 22 : index
    %c0_329 = arith.constant 0 : index
    %322 = vector.load %arg19[%c22, %c0_329] : memref<64x128xf32, #tpu.memory_space<vmem>>, vector<1x128xf32>
    tpu.vector_store %arg19[%c22, %c0_329], %321 {strides = array<i32>} : memref<64x128xf32, #tpu.memory_space<vmem>>, vector<1x128xf32>,
    %c58 = arith.constant 58 : index
    %c0_330 = arith.constant 0 : index
    %323 = vector.load %arg18[%c58, %c0_330] : memref<64x128xf32, #tpu.memory_space<vmem>>, vector<1x128xf32>
    %c23 = arith.constant 23 : index
    %c0_331 = arith.constant 0 : index
    %324 = vector.load %arg19[%c23, %c0_331] : memref<64x128xf32, #tpu.memory_space<vmem>>, vector<1x128xf32>
    tpu.vector_store %arg19[%c23, %c0_331], %323 {strides = array<i32>} : memref<64x128xf32, #tpu.memory_space<vmem>>, vector<1x128xf32>,
    %c3_332 = arith.constant 3 : index
    %c0_333 = arith.constant 0 : index
    %325 = vector.load %arg18[%c3_332, %c0_333] : memref<64x128xf32, #tpu.memory_space<vmem>>, vector<1x128xf32>
    %c24_334 = arith.constant 24 : index
    %c0_335 = arith.constant 0 : index
    %326 = vector.load %arg19[%c24_334, %c0_335] : memref<64x128xf32, #tpu.memory_space<vmem>>, vector<1x128xf32>
    tpu.vector_store %arg19[%c24_334, %c0_335], %325 {strides = array<i32>} : memref<64x128xf32, #tpu.memory_space<vmem>>, vector<1x128xf32>,
    %c11_336 = arith.constant 11 : index
    %c0_337 = arith.constant 0 : index
    %327 = vector.load %arg18[%c11_336, %c0_337] : memref<64x128xf32, #tpu.memory_space<vmem>>, vector<1x128xf32>
    %c25_338 = arith.constant 25 : index
    %c0_339 = arith.constant 0 : index
    %328 = vector.load %arg19[%c25_338, %c0_339] : memref<64x128xf32, #tpu.memory_space<vmem>>, vector<1x128xf32>
    tpu.vector_store %arg19[%c25_338, %c0_339], %327 {strides = array<i32>} : memref<64x128xf32, #tpu.memory_space<vmem>>, vector<1x128xf32>,
    %c19_340 = arith.constant 19 : index
    %c0_341 = arith.constant 0 : index
    %329 = vector.load %arg18[%c19_340, %c0_341] : memref<64x128xf32, #tpu.memory_space<vmem>>, vector<1x128xf32>
    %c26_342 = arith.constant 26 : index
    %c0_343 = arith.constant 0 : index
    %330 = vector.load %arg19[%c26_342, %c0_343] : memref<64x128xf32, #tpu.memory_space<vmem>>, vector<1x128xf32>
    tpu.vector_store %arg19[%c26_342, %c0_343], %329 {strides = array<i32>} : memref<64x128xf32, #tpu.memory_space<vmem>>, vector<1x128xf32>,
    %c27 = arith.constant 27 : index
    %c0_344 = arith.constant 0 : index
    %331 = vector.load %arg18[%c27, %c0_344] : memref<64x128xf32, #tpu.memory_space<vmem>>, vector<1x128xf32>
    %c27_345 = arith.constant 27 : index
    %c0_346 = arith.constant 0 : index
    %332 = vector.load %arg19[%c27_345, %c0_346] : memref<64x128xf32, #tpu.memory_space<vmem>>, vector<1x128xf32>
    tpu.vector_store %arg19[%c27_345, %c0_346], %331 {strides = array<i32>} : memref<64x128xf32, #tpu.memory_space<vmem>>, vector<1x128xf32>,
    %c35 = arith.constant 35 : index
    %c0_347 = arith.constant 0 : index
    %333 = vector.load %arg18[%c35, %c0_347] : memref<64x128xf32, #tpu.memory_space<vmem>>, vector<1x128xf32>
    %c28 = arith.constant 28 : index
    %c0_348 = arith.constant 0 : index
    %334 = vector.load %arg19[%c28, %c0_348] : memref<64x128xf32, #tpu.memory_space<vmem>>, vector<1x128xf32>
    tpu.vector_store %arg19[%c28, %c0_348], %333 {strides = array<i32>} : memref<64x128xf32, #tpu.memory_space<vmem>>, vector<1x128xf32>,
    %c43 = arith.constant 43 : index
    %c0_349 = arith.constant 0 : index
    %335 = vector.load %arg18[%c43, %c0_349] : memref<64x128xf32, #tpu.memory_space<vmem>>, vector<1x128xf32>
    %c29 = arith.constant 29 : index
    %c0_350 = arith.constant 0 : index
    %336 = vector.load %arg19[%c29, %c0_350] : memref<64x128xf32, #tpu.memory_space<vmem>>, vector<1x128xf32>
    tpu.vector_store %arg19[%c29, %c0_350], %335 {strides = array<i32>} : memref<64x128xf32, #tpu.memory_space<vmem>>, vector<1x128xf32>,
    %c51 = arith.constant 51 : index
    %c0_351 = arith.constant 0 : index
    %337 = vector.load %arg18[%c51, %c0_351] : memref<64x128xf32, #tpu.memory_space<vmem>>, vector<1x128xf32>
    %c30 = arith.constant 30 : index
    %c0_352 = arith.constant 0 : index
    %338 = vector.load %arg19[%c30, %c0_352] : memref<64x128xf32, #tpu.memory_space<vmem>>, vector<1x128xf32>
    tpu.vector_store %arg19[%c30, %c0_352], %337 {strides = array<i32>} : memref<64x128xf32, #tpu.memory_space<vmem>>, vector<1x128xf32>,
    %c59 = arith.constant 59 : index
    %c0_353 = arith.constant 0 : index
    %339 = vector.load %arg18[%c59, %c0_353] : memref<64x128xf32, #tpu.memory_space<vmem>>, vector<1x128xf32>
    %c31 = arith.constant 31 : index
    %c0_354 = arith.constant 0 : index
    %340 = vector.load %arg19[%c31, %c0_354] : memref<64x128xf32, #tpu.memory_space<vmem>>, vector<1x128xf32>
    tpu.vector_store %arg19[%c31, %c0_354], %339 {strides = array<i32>} : memref<64x128xf32, #tpu.memory_space<vmem>>, vector<1x128xf32>,
    %c4_355 = arith.constant 4 : index
    %c0_356 = arith.constant 0 : index
    %341 = vector.load %arg18[%c4_355, %c0_356] : memref<64x128xf32, #tpu.memory_space<vmem>>, vector<1x128xf32>
    %c32_357 = arith.constant 32 : index
    %c0_358 = arith.constant 0 : index
    %342 = vector.load %arg19[%c32_357, %c0_358] : memref<64x128xf32, #tpu.memory_space<vmem>>, vector<1x128xf32>
    tpu.vector_store %arg19[%c32_357, %c0_358], %341 {strides = array<i32>} : memref<64x128xf32, #tpu.memory_space<vmem>>, vector<1x128xf32>,
    %c12_359 = arith.constant 12 : index
    %c0_360 = arith.constant 0 : index
    %343 = vector.load %arg18[%c12_359, %c0_360] : memref<64x128xf32, #tpu.memory_space<vmem>>, vector<1x128xf32>
    %c33_361 = arith.constant 33 : index
    %c0_362 = arith.constant 0 : index
    %344 = vector.load %arg19[%c33_361, %c0_362] : memref<64x128xf32, #tpu.memory_space<vmem>>, vector<1x128xf32>
    tpu.vector_store %arg19[%c33_361, %c0_362], %343 {strides = array<i32>} : memref<64x128xf32, #tpu.memory_space<vmem>>, vector<1x128xf32>,
    %c20_363 = arith.constant 20 : index
    %c0_364 = arith.constant 0 : index
    %345 = vector.load %arg18[%c20_363, %c0_364] : memref<64x128xf32, #tpu.memory_space<vmem>>, vector<1x128xf32>
    %c34_365 = arith.constant 34 : index
    %c0_366 = arith.constant 0 : index
    %346 = vector.load %arg19[%c34_365, %c0_366] : memref<64x128xf32, #tpu.memory_space<vmem>>, vector<1x128xf32>
    tpu.vector_store %arg19[%c34_365, %c0_366], %345 {strides = array<i32>} : memref<64x128xf32, #tpu.memory_space<vmem>>, vector<1x128xf32>,
    %c28_367 = arith.constant 28 : index
    %c0_368 = arith.constant 0 : index
    %347 = vector.load %arg18[%c28_367, %c0_368] : memref<64x128xf32, #tpu.memory_space<vmem>>, vector<1x128xf32>
    %c35_369 = arith.constant 35 : index
    %c0_370 = arith.constant 0 : index
    %348 = vector.load %arg19[%c35_369, %c0_370] : memref<64x128xf32, #tpu.memory_space<vmem>>, vector<1x128xf32>
    tpu.vector_store %arg19[%c35_369, %c0_370], %347 {strides = array<i32>} : memref<64x128xf32, #tpu.memory_space<vmem>>, vector<1x128xf32>,
    %c36 = arith.constant 36 : index
    %c0_371 = arith.constant 0 : index
    %349 = vector.load %arg18[%c36, %c0_371] : memref<64x128xf32, #tpu.memory_space<vmem>>, vector<1x128xf32>
    %c36_372 = arith.constant 36 : index
    %c0_373 = arith.constant 0 : index
    %350 = vector.load %arg19[%c36_372, %c0_373] : memref<64x128xf32, #tpu.memory_space<vmem>>, vector<1x128xf32>
    tpu.vector_store %arg19[%c36_372, %c0_373], %349 {strides = array<i32>} : memref<64x128xf32, #tpu.memory_space<vmem>>, vector<1x128xf32>,
    %c44 = arith.constant 44 : index
    %c0_374 = arith.constant 0 : index
    %351 = vector.load %arg18[%c44, %c0_374] : memref<64x128xf32, #tpu.memory_space<vmem>>, vector<1x128xf32>
    %c37 = arith.constant 37 : index
    %c0_375 = arith.constant 0 : index
    %352 = vector.load %arg19[%c37, %c0_375] : memref<64x128xf32, #tpu.memory_space<vmem>>, vector<1x128xf32>
    tpu.vector_store %arg19[%c37, %c0_375], %351 {strides = array<i32>} : memref<64x128xf32, #tpu.memory_space<vmem>>, vector<1x128xf32>,
    %c52 = arith.constant 52 : index
    %c0_376 = arith.constant 0 : index
    %353 = vector.load %arg18[%c52, %c0_376] : memref<64x128xf32, #tpu.memory_space<vmem>>, vector<1x128xf32>
    %c38 = arith.constant 38 : index
    %c0_377 = arith.constant 0 : index
    %354 = vector.load %arg19[%c38, %c0_377] : memref<64x128xf32, #tpu.memory_space<vmem>>, vector<1x128xf32>
    tpu.vector_store %arg19[%c38, %c0_377], %353 {strides = array<i32>} : memref<64x128xf32, #tpu.memory_space<vmem>>, vector<1x128xf32>,
    %c60 = arith.constant 60 : index
    %c0_378 = arith.constant 0 : index
    %355 = vector.load %arg18[%c60, %c0_378] : memref<64x128xf32, #tpu.memory_space<vmem>>, vector<1x128xf32>
    %c39 = arith.constant 39 : index
    %c0_379 = arith.constant 0 : index
    %356 = vector.load %arg19[%c39, %c0_379] : memref<64x128xf32, #tpu.memory_space<vmem>>, vector<1x128xf32>
    tpu.vector_store %arg19[%c39, %c0_379], %355 {strides = array<i32>} : memref<64x128xf32, #tpu.memory_space<vmem>>, vector<1x128xf32>,
    %c5_380 = arith.constant 5 : index
    %c0_381 = arith.constant 0 : index
    %357 = vector.load %arg18[%c5_380, %c0_381] : memref<64x128xf32, #tpu.memory_space<vmem>>, vector<1x128xf32>
    %c40_382 = arith.constant 40 : index
    %c0_383 = arith.constant 0 : index
    %358 = vector.load %arg19[%c40_382, %c0_383] : memref<64x128xf32, #tpu.memory_space<vmem>>, vector<1x128xf32>
    tpu.vector_store %arg19[%c40_382, %c0_383], %357 {strides = array<i32>} : memref<64x128xf32, #tpu.memory_space<vmem>>, vector<1x128xf32>,
    %c13_384 = arith.constant 13 : index
    %c0_385 = arith.constant 0 : index
    %359 = vector.load %arg18[%c13_384, %c0_385] : memref<64x128xf32, #tpu.memory_space<vmem>>, vector<1x128xf32>
    %c41_386 = arith.constant 41 : index
    %c0_387 = arith.constant 0 : index
    %360 = vector.load %arg19[%c41_386, %c0_387] : memref<64x128xf32, #tpu.memory_space<vmem>>, vector<1x128xf32>
    tpu.vector_store %arg19[%c41_386, %c0_387], %359 {strides = array<i32>} : memref<64x128xf32, #tpu.memory_space<vmem>>, vector<1x128xf32>,
    %c21_388 = arith.constant 21 : index
    %c0_389 = arith.constant 0 : index
    %361 = vector.load %arg18[%c21_388, %c0_389] : memref<64x128xf32, #tpu.memory_space<vmem>>, vector<1x128xf32>
    %c42_390 = arith.constant 42 : index
    %c0_391 = arith.constant 0 : index
    %362 = vector.load %arg19[%c42_390, %c0_391] : memref<64x128xf32, #tpu.memory_space<vmem>>, vector<1x128xf32>
    tpu.vector_store %arg19[%c42_390, %c0_391], %361 {strides = array<i32>} : memref<64x128xf32, #tpu.memory_space<vmem>>, vector<1x128xf32>,
    %c29_392 = arith.constant 29 : index
    %c0_393 = arith.constant 0 : index
    %363 = vector.load %arg18[%c29_392, %c0_393] : memref<64x128xf32, #tpu.memory_space<vmem>>, vector<1x128xf32>
    %c43_394 = arith.constant 43 : index
    %c0_395 = arith.constant 0 : index
    %364 = vector.load %arg19[%c43_394, %c0_395] : memref<64x128xf32, #tpu.memory_space<vmem>>, vector<1x128xf32>
    tpu.vector_store %arg19[%c43_394, %c0_395], %363 {strides = array<i32>} : memref<64x128xf32, #tpu.memory_space<vmem>>, vector<1x128xf32>,
    %c37_396 = arith.constant 37 : index
    %c0_397 = arith.constant 0 : index
    %365 = vector.load %arg18[%c37_396, %c0_397] : memref<64x128xf32, #tpu.memory_space<vmem>>, vector<1x128xf32>
    %c44_398 = arith.constant 44 : index
    %c0_399 = arith.constant 0 : index
    %366 = vector.load %arg19[%c44_398, %c0_399] : memref<64x128xf32, #tpu.memory_space<vmem>>, vector<1x128xf32>
    tpu.vector_store %arg19[%c44_398, %c0_399], %365 {strides = array<i32>} : memref<64x128xf32, #tpu.memory_space<vmem>>, vector<1x128xf32>,
    %c45 = arith.constant 45 : index
    %c0_400 = arith.constant 0 : index
    %367 = vector.load %arg18[%c45, %c0_400] : memref<64x128xf32, #tpu.memory_space<vmem>>, vector<1x128xf32>
    %c45_401 = arith.constant 45 : index
    %c0_402 = arith.constant 0 : index
    %368 = vector.load %arg19[%c45_401, %c0_402] : memref<64x128xf32, #tpu.memory_space<vmem>>, vector<1x128xf32>
    tpu.vector_store %arg19[%c45_401, %c0_402], %367 {strides = array<i32>} : memref<64x128xf32, #tpu.memory_space<vmem>>, vector<1x128xf32>,
    %c53 = arith.constant 53 : index
    %c0_403 = arith.constant 0 : index
    %369 = vector.load %arg18[%c53, %c0_403] : memref<64x128xf32, #tpu.memory_space<vmem>>, vector<1x128xf32>
    %c46 = arith.constant 46 : index
    %c0_404 = arith.constant 0 : index
    %370 = vector.load %arg19[%c46, %c0_404] : memref<64x128xf32, #tpu.memory_space<vmem>>, vector<1x128xf32>
    tpu.vector_store %arg19[%c46, %c0_404], %369 {strides = array<i32>} : memref<64x128xf32, #tpu.memory_space<vmem>>, vector<1x128xf32>,
    %c61 = arith.constant 61 : index
    %c0_405 = arith.constant 0 : index
    %371 = vector.load %arg18[%c61, %c0_405] : memref<64x128xf32, #tpu.memory_space<vmem>>, vector<1x128xf32>
    %c47 = arith.constant 47 : index
    %c0_406 = arith.constant 0 : index
    %372 = vector.load %arg19[%c47, %c0_406] : memref<64x128xf32, #tpu.memory_space<vmem>>, vector<1x128xf32>
    tpu.vector_store %arg19[%c47, %c0_406], %371 {strides = array<i32>} : memref<64x128xf32, #tpu.memory_space<vmem>>, vector<1x128xf32>,
    %c6_407 = arith.constant 6 : index
    %c0_408 = arith.constant 0 : index
    %373 = vector.load %arg18[%c6_407, %c0_408] : memref<64x128xf32, #tpu.memory_space<vmem>>, vector<1x128xf32>
    %c48_409 = arith.constant 48 : index
    %c0_410 = arith.constant 0 : index
    %374 = vector.load %arg19[%c48_409, %c0_410] : memref<64x128xf32, #tpu.memory_space<vmem>>, vector<1x128xf32>
    tpu.vector_store %arg19[%c48_409, %c0_410], %373 {strides = array<i32>} : memref<64x128xf32, #tpu.memory_space<vmem>>, vector<1x128xf32>,
    %c14_411 = arith.constant 14 : index
    %c0_412 = arith.constant 0 : index
    %375 = vector.load %arg18[%c14_411, %c0_412] : memref<64x128xf32, #tpu.memory_space<vmem>>, vector<1x128xf32>
    %c49_413 = arith.constant 49 : index
    %c0_414 = arith.constant 0 : index
    %376 = vector.load %arg19[%c49_413, %c0_414] : memref<64x128xf32, #tpu.memory_space<vmem>>, vector<1x128xf32>
    tpu.vector_store %arg19[%c49_413, %c0_414], %375 {strides = array<i32>} : memref<64x128xf32, #tpu.memory_space<vmem>>, vector<1x128xf32>,
    %c22_415 = arith.constant 22 : index
    %c0_416 = arith.constant 0 : index
    %377 = vector.load %arg18[%c22_415, %c0_416] : memref<64x128xf32, #tpu.memory_space<vmem>>, vector<1x128xf32>
    %c50_417 = arith.constant 50 : index
    %c0_418 = arith.constant 0 : index
    %378 = vector.load %arg19[%c50_417, %c0_418] : memref<64x128xf32, #tpu.memory_space<vmem>>, vector<1x128xf32>
    tpu.vector_store %arg19[%c50_417, %c0_418], %377 {strides = array<i32>} : memref<64x128xf32, #tpu.memory_space<vmem>>, vector<1x128xf32>,
    %c30_419 = arith.constant 30 : index
    %c0_420 = arith.constant 0 : index
    %379 = vector.load %arg18[%c30_419, %c0_420] : memref<64x128xf32, #tpu.memory_space<vmem>>, vector<1x128xf32>
    %c51_421 = arith.constant 51 : index
    %c0_422 = arith.constant 0 : index
    %380 = vector.load %arg19[%c51_421, %c0_422] : memref<64x128xf32, #tpu.memory_space<vmem>>, vector<1x128xf32>
    tpu.vector_store %arg19[%c51_421, %c0_422], %379 {strides = array<i32>} : memref<64x128xf32, #tpu.memory_space<vmem>>, vector<1x128xf32>,
    %c38_423 = arith.constant 38 : index
    %c0_424 = arith.constant 0 : index
    %381 = vector.load %arg18[%c38_423, %c0_424] : memref<64x128xf32, #tpu.memory_space<vmem>>, vector<1x128xf32>
    %c52_425 = arith.constant 52 : index
    %c0_426 = arith.constant 0 : index
    %382 = vector.load %arg19[%c52_425, %c0_426] : memref<64x128xf32, #tpu.memory_space<vmem>>, vector<1x128xf32>
    tpu.vector_store %arg19[%c52_425, %c0_426], %381 {strides = array<i32>} : memref<64x128xf32, #tpu.memory_space<vmem>>, vector<1x128xf32>,
    %c46_427 = arith.constant 46 : index
    %c0_428 = arith.constant 0 : index
    %383 = vector.load %arg18[%c46_427, %c0_428] : memref<64x128xf32, #tpu.memory_space<vmem>>, vector<1x128xf32>
    %c53_429 = arith.constant 53 : index
    %c0_430 = arith.constant 0 : index
    %384 = vector.load %arg19[%c53_429, %c0_430] : memref<64x128xf32, #tpu.memory_space<vmem>>, vector<1x128xf32>
    tpu.vector_store %arg19[%c53_429, %c0_430], %383 {strides = array<i32>} : memref<64x128xf32, #tpu.memory_space<vmem>>, vector<1x128xf32>,
    %c54 = arith.constant 54 : index
    %c0_431 = arith.constant 0 : index
    %385 = vector.load %arg18[%c54, %c0_431] : memref<64x128xf32, #tpu.memory_space<vmem>>, vector<1x128xf32>
    %c54_432 = arith.constant 54 : index
    %c0_433 = arith.constant 0 : index
    %386 = vector.load %arg19[%c54_432, %c0_433] : memref<64x128xf32, #tpu.memory_space<vmem>>, vector<1x128xf32>
    tpu.vector_store %arg19[%c54_432, %c0_433], %385 {strides = array<i32>} : memref<64x128xf32, #tpu.memory_space<vmem>>, vector<1x128xf32>,
    %c62 = arith.constant 62 : index
    %c0_434 = arith.constant 0 : index
    %387 = vector.load %arg18[%c62, %c0_434] : memref<64x128xf32, #tpu.memory_space<vmem>>, vector<1x128xf32>
    %c55 = arith.constant 55 : index
    %c0_435 = arith.constant 0 : index
    %388 = vector.load %arg19[%c55, %c0_435] : memref<64x128xf32, #tpu.memory_space<vmem>>, vector<1x128xf32>
    tpu.vector_store %arg19[%c55, %c0_435], %387 {strides = array<i32>} : memref<64x128xf32, #tpu.memory_space<vmem>>, vector<1x128xf32>,
    %c7_436 = arith.constant 7 : index
    %c0_437 = arith.constant 0 : index
    %389 = vector.load %arg18[%c7_436, %c0_437] : memref<64x128xf32, #tpu.memory_space<vmem>>, vector<1x128xf32>
    %c56_438 = arith.constant 56 : index
    %c0_439 = arith.constant 0 : index
    %390 = vector.load %arg19[%c56_438, %c0_439] : memref<64x128xf32, #tpu.memory_space<vmem>>, vector<1x128xf32>
    tpu.vector_store %arg19[%c56_438, %c0_439], %389 {strides = array<i32>} : memref<64x128xf32, #tpu.memory_space<vmem>>, vector<1x128xf32>,
    %c15_440 = arith.constant 15 : index
    %c0_441 = arith.constant 0 : index
    %391 = vector.load %arg18[%c15_440, %c0_441] : memref<64x128xf32, #tpu.memory_space<vmem>>, vector<1x128xf32>
    %c57_442 = arith.constant 57 : index
    %c0_443 = arith.constant 0 : index
    %392 = vector.load %arg19[%c57_442, %c0_443] : memref<64x128xf32, #tpu.memory_space<vmem>>, vector<1x128xf32>
    tpu.vector_store %arg19[%c57_442, %c0_443], %391 {strides = array<i32>} : memref<64x128xf32, #tpu.memory_space<vmem>>, vector<1x128xf32>,
    %c23_444 = arith.constant 23 : index
    %c0_445 = arith.constant 0 : index
    %393 = vector.load %arg18[%c23_444, %c0_445] : memref<64x128xf32, #tpu.memory_space<vmem>>, vector<1x128xf32>
    %c58_446 = arith.constant 58 : index
    %c0_447 = arith.constant 0 : index
    %394 = vector.load %arg19[%c58_446, %c0_447] : memref<64x128xf32, #tpu.memory_space<vmem>>, vector<1x128xf32>
    tpu.vector_store %arg19[%c58_446, %c0_447], %393 {strides = array<i32>} : memref<64x128xf32, #tpu.memory_space<vmem>>, vector<1x128xf32>,
    %c31_448 = arith.constant 31 : index
    %c0_449 = arith.constant 0 : index
    %395 = vector.load %arg18[%c31_448, %c0_449] : memref<64x128xf32, #tpu.memory_space<vmem>>, vector<1x128xf32>
    %c59_450 = arith.constant 59 : index
    %c0_451 = arith.constant 0 : index
    %396 = vector.load %arg19[%c59_450, %c0_451] : memref<64x128xf32, #tpu.memory_space<vmem>>, vector<1x128xf32>
    tpu.vector_store %arg19[%c59_450, %c0_451], %395 {strides = array<i32>} : memref<64x128xf32, #tpu.memory_space<vmem>>, vector<1x128xf32>,
    %c39_452 = arith.constant 39 : index
    %c0_453 = arith.constant 0 : index
    %397 = vector.load %arg18[%c39_452, %c0_453] : memref<64x128xf32, #tpu.memory_space<vmem>>, vector<1x128xf32>
    %c60_454 = arith.constant 60 : index
    %c0_455 = arith.constant 0 : index
    %398 = vector.load %arg19[%c60_454, %c0_455] : memref<64x128xf32, #tpu.memory_space<vmem>>, vector<1x128xf32>
    tpu.vector_store %arg19[%c60_454, %c0_455], %397 {strides = array<i32>} : memref<64x128xf32, #tpu.memory_space<vmem>>, vector<1x128xf32>,
    %c47_456 = arith.constant 47 : index
    %c0_457 = arith.constant 0 : index
    %399 = vector.load %arg18[%c47_456, %c0_457] : memref<64x128xf32, #tpu.memory_space<vmem>>, vector<1x128xf32>
    %c61_458 = arith.constant 61 : index
    %c0_459 = arith.constant 0 : index
    %400 = vector.load %arg19[%c61_458, %c0_459] : memref<64x128xf32, #tpu.memory_space<vmem>>, vector<1x128xf32>
    tpu.vector_store %arg19[%c61_458, %c0_459], %399 {strides = array<i32>} : memref<64x128xf32, #tpu.memory_space<vmem>>, vector<1x128xf32>,
    %c55_460 = arith.constant 55 : index
    %c0_461 = arith.constant 0 : index
    %401 = vector.load %arg18[%c55_460, %c0_461] : memref<64x128xf32, #tpu.memory_space<vmem>>, vector<1x128xf32>
    %c62_462 = arith.constant 62 : index
    %c0_463 = arith.constant 0 : index
    %402 = vector.load %arg19[%c62_462, %c0_463] : memref<64x128xf32, #tpu.memory_space<vmem>>, vector<1x128xf32>
    tpu.vector_store %arg19[%c62_462, %c0_463], %401 {strides = array<i32>} : memref<64x128xf32, #tpu.memory_space<vmem>>, vector<1x128xf32>,
    %c63 = arith.constant 63 : index
    %c0_464 = arith.constant 0 : index
    %403 = vector.load %arg18[%c63, %c0_464] : memref<64x128xf32, #tpu.memory_space<vmem>>, vector<1x128xf32>
    %c63_465 = arith.constant 63 : index
    %c0_466 = arith.constant 0 : index
    %404 = vector.load %arg19[%c63_465, %c0_466] : memref<64x128xf32, #tpu.memory_space<vmem>>, vector<1x128xf32>
    tpu.vector_store %arg19[%c63_465, %c0_466], %403 {strides = array<i32>} : memref<64x128xf32, #tpu.memory_space<vmem>>, vector<1x128xf32>,
    %c0_467 = arith.constant 0 : index
    %c0_468 = arith.constant 0 : index
    %405 = vector.load %arg17[%c0_467, %c0_468] : memref<64x128xf32, #tpu.memory_space<vmem>>, vector<64x128xf32>
    %c0_469 = arith.constant 0 : index
    %c0_470 = arith.constant 0 : index
    %406 = vector.load %arg19[%c0_469, %c0_470] : memref<64x128xf32, #tpu.memory_space<vmem>>, vector<64x128xf32>
    %407 = arith.addf %405, %406 : vector<64x128xf32>
    %408 = arith.addf %407, %20 : vector<64x128xf32>
    %cst_471 = arith.constant dense<0.000000e+00> : vector<128xf32>
    %409 = vector.multi_reduction <add>, %408, %cst_471 [0] : vector<64x128xf32> to vector<128xf32>
    %410 = vector.shape_cast %409 : vector<128xf32> to vector<1x128xf32>
    %cst_472 = arith.constant 1.562500e-02 : f32
    %411 = vector.broadcast %cst_472 : f32 to vector<1x128xf32>
    %412 = arith.mulf %410, %411 : vector<1x128xf32>
    %413 = vector.shape_cast %412 : vector<1x128xf32> to vector<1x128xf32>
    %414 = vector.broadcast %413 : vector<1x128xf32> to vector<8x128xf32>
    %c0_473 = arith.constant 0 : index
    %c0_474 = arith.constant 0 : index
    %415 = vector.load %arg10[%c0_473, %c0_474] : memref<128x32xf32, #tpu.memory_space<vmem>>, vector<128x32xf32>
    %cst_475 = arith.constant dense<0.000000e+00> : vector<8x32xf32>
    %416 = tpu.matmul %414, %415, %cst_475 {dimension_numbers = #tpu.dot_dimension_numbers<[1], [0], [0], [1], [0, 0, 1, 1], [], []>} : vector<8x128xf32>, vector<128x32xf32>, vector<8x32xf32> -> vector<8x32xf32>
    %c0_476 = arith.constant 0 : index
    %c0_477 = arith.constant 0 : index
    %417 = vector.load %arg11[%c0_476, %c0_477] : memref<1x32xf32, #tpu.memory_space<vmem>>, vector<1x32xf32>
    %418 = vector.broadcast %417 : vector<1x32xf32> to vector<8x32xf32>
    %419 = arith.addf %416, %418 : vector<8x32xf32>
    %cst_478 = arith.constant 5.000000e-01 : f32
    %420 = vector.broadcast %cst_478 : f32 to vector<8x32xf32>
    %421 = arith.mulf %420, %419 : vector<8x32xf32>
    %cst_479 = arith.constant 1.41421354 : f32
    %422 = vector.broadcast %cst_479 : f32 to vector<8x32xf32>
    %423 = arith.divf %419, %422 : vector<8x32xf32>
    %424 = math.absf %423 : vector<8x32xf32>
    %cst_480 = arith.constant 0.327591091 : f32
    %425 = vector.broadcast %cst_480 : f32 to vector<8x32xf32>
    %426 = arith.mulf %425, %424 : vector<8x32xf32>
    %cst_481 = arith.constant 1.000000e+00 : f32
    %427 = vector.broadcast %cst_481 : f32 to vector<8x32xf32>
    %428 = arith.addf %427, %426 : vector<8x32xf32>
    %cst_482 = arith.constant 1.000000e+00 : f32
    %429 = vector.broadcast %cst_482 : f32 to vector<8x32xf32>
    %430 = arith.divf %429, %428 : vector<8x32xf32>
    %cst_483 = arith.constant 1.06140542 : f32
    %431 = vector.broadcast %cst_483 : f32 to vector<8x32xf32>
    %432 = arith.mulf %431, %430 : vector<8x32xf32>
    %cst_484 = arith.constant -1.45315206 : f32
    %433 = vector.broadcast %cst_484 : f32 to vector<8x32xf32>
    %434 = arith.addf %432, %433 : vector<8x32xf32>
    %435 = arith.mulf %434, %430 : vector<8x32xf32>
    %cst_485 = arith.constant 1.42141378 : f32
    %436 = vector.broadcast %cst_485 : f32 to vector<8x32xf32>
    %437 = arith.addf %435, %436 : vector<8x32xf32>
    %438 = arith.mulf %437, %430 : vector<8x32xf32>
    %cst_486 = arith.constant -0.284496725 : f32
    %439 = vector.broadcast %cst_486 : f32 to vector<8x32xf32>
    %440 = arith.addf %438, %439 : vector<8x32xf32>
    %441 = arith.mulf %440, %430 : vector<8x32xf32>
    %cst_487 = arith.constant 0.254829586 : f32
    %442 = vector.broadcast %cst_487 : f32 to vector<8x32xf32>
    %443 = arith.addf %441, %442 : vector<8x32xf32>
    %444 = arith.mulf %443, %430 : vector<8x32xf32>
    %cst_488 = arith.constant 0.000000e+00 : f32
    %445 = vector.broadcast %cst_488 : f32 to vector<8x32xf32>
    %446 = arith.subf %445, %424 : vector<8x32xf32>
    %447 = arith.mulf %446, %424 : vector<8x32xf32>
    %448 = math.exp %447 : vector<8x32xf32>
    %449 = arith.mulf %444, %448 : vector<8x32xf32>
    %cst_489 = arith.constant 1.000000e+00 : f32
    %450 = vector.broadcast %cst_489 : f32 to vector<8x32xf32>
    %451 = arith.subf %450, %449 : vector<8x32xf32>
    %cst_490 = arith.constant 0.000000e+00 : f32
    %452 = vector.broadcast %cst_490 : f32 to vector<8x32xf32>
    %453 = arith.cmpf oge, %423, %452 : vector<8x32xf32>
    %cst_491 = arith.constant 0.000000e+00 : f32
    %454 = vector.broadcast %cst_491 : f32 to vector<8x32xf32>
    %455 = arith.subf %454, %451 : vector<8x32xf32>
    %456 = arith.select %453, %451, %455 : vector<8x32xi1>, vector<8x32xf32>
    %cst_492 = arith.constant 1.000000e+00 : f32
    %457 = vector.broadcast %cst_492 : f32 to vector<8x32xf32>
    %458 = arith.addf %457, %456 : vector<8x32xf32>
    %459 = arith.mulf %421, %458 : vector<8x32xf32>
    %c0_493 = arith.constant 0 : index
    %c0_494 = arith.constant 0 : index
    %460 = vector.load %arg12[%c0_493, %c0_494] : memref<32x384xf32, #tpu.memory_space<vmem>>, vector<32x384xf32>
    %cst_495 = arith.constant dense<0.000000e+00> : vector<8x384xf32>
    %461 = tpu.matmul %459, %460, %cst_495 {dimension_numbers = #tpu.dot_dimension_numbers<[1], [0], [0], [1], [0, 0, 1, 1], [], []>} : vector<8x32xf32>, vector<32x384xf32>, vector<8x384xf32> -> vector<8x384xf32>
    %c0_496 = arith.constant 0 : index
    %c0_497 = arith.constant 0 : index
    %462 = vector.load %arg13[%c0_496, %c0_497] : memref<1x384xf32, #tpu.memory_space<vmem>>, vector<1x384xf32>
    %463 = vector.broadcast %462 : vector<1x384xf32> to vector<8x384xf32>
    %464 = arith.addf %461, %463 : vector<8x384xf32>
    %465 = vector.extract_strided_slice %464 {offsets = [0, 0], sizes = [1, 128], strides = [1, 1]} : vector<8x384xf32> to vector<1x128xf32>
    %466 = vector.extract_strided_slice %464 {offsets = [0, 128], sizes = [1, 128], strides = [1, 1]} : vector<8x384xf32> to vector<1x128xf32>
    %467 = vector.extract_strided_slice %464 {offsets = [0, 256], sizes = [1, 128], strides = [1, 1]} : vector<8x384xf32> to vector<1x128xf32>
    %468 = arith.maximumf %465, %466 : vector<1x128xf32>
    %469 = arith.maximumf %468, %467 : vector<1x128xf32>
    %470 = arith.subf %465, %469 : vector<1x128xf32>
    %471 = math.exp %470 : vector<1x128xf32>
    %472 = arith.subf %466, %469 : vector<1x128xf32>
    %473 = math.exp %472 : vector<1x128xf32>
    %474 = arith.subf %467, %469 : vector<1x128xf32>
    %475 = math.exp %474 : vector<1x128xf32>
    %476 = arith.addf %471, %473 : vector<1x128xf32>
    %477 = arith.addf %476, %475 : vector<1x128xf32>
    %478 = arith.divf %471, %477 : vector<1x128xf32>
    %479 = arith.divf %473, %477 : vector<1x128xf32>
    %480 = arith.divf %475, %477 : vector<1x128xf32>
    %481 = vector.broadcast %478 : vector<1x128xf32> to vector<64x128xf32>
    %482 = arith.mulf %405, %481 : vector<64x128xf32>
    %483 = vector.broadcast %479 : vector<1x128xf32> to vector<64x128xf32>
    %484 = arith.mulf %406, %483 : vector<64x128xf32>
    %485 = arith.addf %482, %484 : vector<64x128xf32>
    %486 = vector.broadcast %480 : vector<1x128xf32> to vector<64x128xf32>
    %487 = arith.mulf %20, %486 : vector<64x128xf32>
    %488 = arith.addf %485, %487 : vector<64x128xf32>
    %489 = arith.truncf %488 : vector<64x128xf32> to vector<64x128xbf16>
    %c0_498 = arith.constant 0 : index
    %c0_499 = arith.constant 0 : index
    %490 = vector.load %arg14[%c0_498, %c0_499] : memref<128x128xbf16, #tpu.memory_space<vmem>>, vector<128x128xbf16>
    %cst_500 = arith.constant dense<0.000000e+00> : vector<64x128xf32>
    %491 = tpu.matmul %489, %490, %cst_500 {dimension_numbers = #tpu.dot_dimension_numbers<[1], [0], [0], [1], [0, 0, 1, 1], [], []>} : vector<64x128xbf16>, vector<128x128xbf16>, vector<64x128xf32> -> vector<64x128xf32>
    %c0_501 = arith.constant 0 : index
    %c0_502 = arith.constant 0 : index
    %492 = vector.load %arg15[%c0_501, %c0_502] : memref<1x128xf32, #tpu.memory_space<vmem>>, vector<1x128xf32>
    %493 = vector.broadcast %492 : vector<1x128xf32> to vector<64x128xf32>
    %494 = arith.addf %491, %493 : vector<64x128xf32>
    %c0_503 = arith.constant 0 : index
    %c0_504 = arith.constant 0 : index
    %c0_505 = arith.constant 0 : index
    %495 = vector.load %arg16[%c0_503, %c0_504, %c0_505] : memref<1x64x128xf32, #tpu.memory_space<vmem>>, vector<1x64x128xf32>
    %496 = vector.shape_cast %495 : vector<1x64x128xf32> to vector<64x128xf32>
    %497 = vector.shape_cast %494 : vector<64x128xf32> to vector<1x64x128xf32>
    tpu.vector_store %arg16[%c0_503, %c0_504, %c0_505], %497 {strides = array<i32>} : memref<1x64x128xf32, #tpu.memory_space<vmem>>, vector<1x64x128xf32>,
    return
  }
  func.func @transform_0(%arg0: i32) -> (i32, i32, i32) {
    %c0_i32 = arith.constant 0 : i32
    %c0_i32_0 = arith.constant 0 : i32
    %c0_i32_1 = arith.constant 0 : i32
    return %arg0, %c0_i32, %c0_i32_0 : i32, i32, i32
  }
  func.func @transform_1(%arg0: i32) -> (i32, i32, i32) {
    %c0_i32 = arith.constant 0 : i32
    %c0_i32_0 = arith.constant 0 : i32
    %c0_i32_1 = arith.constant 0 : i32
    return %arg0, %c0_i32, %c0_i32_0 : i32, i32, i32
  }
  func.func @transform_2(%arg0: i32) -> (i32, i32, i32) {
    %c0_i32 = arith.constant 0 : i32
    %c0_i32_0 = arith.constant 0 : i32
    %c0_i32_1 = arith.constant 0 : i32
    return %arg0, %c0_i32, %c0_i32_0 : i32, i32, i32
  }
  func.func @transform_3(%arg0: i32) -> (i32, i32) {
    %c0_i32 = arith.constant 0 : i32
    %c0_i32_0 = arith.constant 0 : i32
    %c0_i32_1 = arith.constant 0 : i32
    return %c0_i32, %c0_i32_0 : i32, i32
  }
  func.func @transform_4(%arg0: i32) -> (i32, i32) {
    %c0_i32 = arith.constant 0 : i32
    %c0_i32_0 = arith.constant 0 : i32
    %c0_i32_1 = arith.constant 0 : i32
    return %c0_i32, %c0_i32_0 : i32, i32
  }
  func.func @transform_5(%arg0: i32) -> (i32, i32) {
    %c0_i32 = arith.constant 0 : i32
    %c0_i32_0 = arith.constant 0 : i32
    %c0_i32_1 = arith.constant 0 : i32
    return %c0_i32, %c0_i32_0 : i32, i32
  }
  func.func @transform_6(%arg0: i32) -> (i32, i32) {
    %c0_i32 = arith.constant 0 : i32
    %c0_i32_0 = arith.constant 0 : i32
    %c0_i32_1 = arith.constant 0 : i32
    return %c0_i32, %c0_i32_0 : i32, i32
  }
  func.func @transform_7(%arg0: i32) -> (i32, i32) {
    %c0_i32 = arith.constant 0 : i32
    %c0_i32_0 = arith.constant 0 : i32
    %c0_i32_1 = arith.constant 0 : i32
    return %c0_i32, %c0_i32_0 : i32, i32
  }
  func.func @transform_8(%arg0: i32) -> (i32, i32) {
    %c0_i32 = arith.constant 0 : i32
    %c0_i32_0 = arith.constant 0 : i32
    %c0_i32_1 = arith.constant 0 : i32
    return %c0_i32, %c0_i32_0 : i32, i32
  }
  func.func @transform_9(%arg0: i32) -> (i32, i32) {
    %c0_i32 = arith.constant 0 : i32
    %c0_i32_0 = arith.constant 0 : i32
    %c0_i32_1 = arith.constant 0 : i32
    return %c0_i32, %c0_i32_0 : i32, i32
  }
  func.func @transform_10(%arg0: i32) -> (i32, i32) {
    %c0_i32 = arith.constant 0 : i32
    %c0_i32_0 = arith.constant 0 : i32
    %c0_i32_1 = arith.constant 0 : i32
    return %c0_i32, %c0_i32_0 : i32, i32
  }
  func.func @transform_11(%arg0: i32) -> (i32, i32) {
    %c0_i32 = arith.constant 0 : i32
    %c0_i32_0 = arith.constant 0 : i32
    %c0_i32_1 = arith.constant 0 : i32
    return %c0_i32, %c0_i32_0 : i32, i32
  }
  func.func @transform_12(%arg0: i32) -> (i32, i32) {
    %c0_i32 = arith.constant 0 : i32
    %c0_i32_0 = arith.constant 0 : i32
    %c0_i32_1 = arith.constant 0 : i32
    return %c0_i32, %c0_i32_0 : i32, i32
  }
  func.func @transform_13(%arg0: i32) -> (i32, i32) {
    %c0_i32 = arith.constant 0 : i32
    %c0_i32_0 = arith.constant 0 : i32
    %c0_i32_1 = arith.constant 0 : i32
    return %c0_i32, %c0_i32_0 : i32, i32
  }
  func.func @transform_14(%arg0: i32) -> (i32, i32) {
    %c0_i32 = arith.constant 0 : i32
    %c0_i32_0 = arith.constant 0 : i32
    %c0_i32_1 = arith.constant 0 : i32
    return %c0_i32, %c0_i32_0 : i32, i32
  }
  func.func @transform_15(%arg0: i32) -> (i32, i32, i32) {
    %c0_i32 = arith.constant 0 : i32
    %c0_i32_0 = arith.constant 0 : i32
    %c0_i32_1 = arith.constant 0 : i32
    return %arg0, %c0_i32, %c0_i32_0 : i32, i32, i32
  }
}

</mosaic_0001>

<bundles_post_ra>
// kernel: weighted_permute_mlp.1
= control target key start
LH: loop header
LB: loop body
LE: loop exit
PB: predicated region body
PF: predicated region fallthrough
CT: control target
= control target key end

     0   :  { %s3868_s0 = inlined_call_operand.vmem [shape: bf16[2,64,128], index: 0, kind: input, shape index: {}]   ;;  %s3869_s1 = inlined_call_operand.vmem [shape: bf16[2,64,128], index: 1, kind: input, shape index: {}]   ;;  %s3870_s2 = inlined_call_operand.vmem [shape: bf16[2,64,128], index: 2, kind: input, shape index: {}]   ;;  %s3871_s3 = inlined_call_operand.vmem [shape: bf16[128,128], index: 3, kind: input, shape index: {}]   ;;  %s3872_s4 = inlined_call_operand.vmem [shape: f32[1,128], index: 4, kind: input, shape index: {}]   ;;  %s3873_s5 = inlined_call_operand.vmem [shape: bf16[128,128], index: 5, kind: input, shape index: {}]   ;;  %s3874_s6 = inlined_call_operand.vmem [shape: f32[1,128], index: 6, kind: input, shape index: {}]   ;;  %s3875_s7 = inlined_call_operand.vmem [shape: bf16[128,128], index: 7, kind: input, shape index: {}]   ;;  %s3876_s8 = inlined_call_operand.vmem [shape: f32[1,128], index: 8, kind: input, shape index: {}]   ;;  %s3877_s9 = inlined_call_operand.vmem [shape: f32[128,32], index: 9, kind: input, shape index: {}]   ;;  %s3878_s10 = inlined_call_operand.vmem [shape: f32[1,32], index: 10, kind: input, shape index: {}]   ;;  %s3879_s11 = inlined_call_operand.vmem [shape: f32[32,384], index: 11, kind: input, shape index: {}]   ;;  %s3880_s12 = inlined_call_operand.vmem [shape: f32[1,384], index: 12, kind: input, shape index: {}]   ;;  %s3881_s13 = inlined_call_operand.vmem [shape: bf16[128,128], index: 13, kind: input, shape index: {}]   ;;  %s3882_s14 = inlined_call_operand.vmem [shape: f32[1,128], index: 14, kind: input, shape index: {}]   ;;  %s3883_s15 = inlined_call_operand.hbm [shape: f32[2,64,128], index: 15, kind: output, shape index: {}]  }
   0x1   :  { %3888 = sst [smem:[#allocation12_spill]] %s3869_s1 }
   0x2   :  { %20 = vsyncpa [#allocation6], 0 }
   0x3   :  { %22 = vsyncpa [#allocation6 + $0x1], 0  ;;  %s2897_s18 = smov 0   ;;  %s2899_s19 = smov 0  }
   0x4   :  { %s2901_s20 = smov 0   ;;  %s2903_s21 = smov 0  }
   0x5 LB: > { %3889 = sst [smem:[#allocation8_spill]] %s2798_s20  ;;  %s2918_s22 = sadd.s32 4294967295, %s2802_s21   ;;  %s2802_s21 = sphi %s2903_s21, %s3897_s21   ;;  %s2798_s20 = sphi %s2901_s20, %s3899_s20   ;;  %s2794_s19 = sphi %s2899_s19, %s3901_s19   ;;  %s2790_s18 = sphi %s2897_s18, %s3900_s18  }
   0x6   : > { %s2312_s23 = sadd.s32 4294967294, %s2802_s21   ;;  %s2922_s24 = sadd.s32 1, %s2802_s21  }
   0x7   : > { %3890 = sst [smem:[#allocation9_spill]] %s2922_s24  ;;  %s365_s25 = sadd.s32 1, %s2798_s20 }
   0x8   : > { %s362_s26 = ssub.s32 %s2802_s21, %s2922_s24  ;;  %p375_p0 = scmp.ne.s32.totalorder %s2798_s20, %s2794_s19 }
   0x9   : > { %p363_p1 = scmp.eq.s32.totalorder %s362_s26, 0  ;;  %p376_p2 = scmp.eq.s32.totalorder %s2918_s22, 1 }
   0xa   : > { %p381_p3 = scmp.ne.s32.totalorder %s2794_s19, %s2790_s18  ;;  %p382_p4 = scmp.eq.s32.totalorder %s2312_s23, 1 }
   0xb   : > { %s2933_s27 = scalar_select %p363_p1, %s2798_s20, %s365_s25  }
   0xc   : > { %p2935_p5 = por %p376_p2, %p375_p0  ;;  %p2939_p6 = por %p382_p4, %p381_p3 }
   0xd   : > { %3891 = sst [smem:[#allocation10_spill]] %s2933_s27  ;;  %p2315_p7 = scmp.ge.s32.totalorder %s2802_s21, 1 }
   0xe   : > { %s3893_s29 = scalar_select %p2939_p6, 1, 0 }
   0xf   : > { %p460_p8 = scmp.lt.s32.totalorder %s2802_s21, 3 }
  0x10   : > { %3894 = sst [smem:[#allocation11_spill]] %s3893_s29 }
  0x11   : > { %p461_p9 = pnand %p2315_p7, %p460_p8 }
  0x12   : > { %v2684_v0 = vld [vmem:[%s3873_s5] sm:$0xff] (!%p461_p9)   ;;  %p518_p10 = scmp.lt.s32.totalorder (!%p461_p9), %s2918_s22, 1  ;;  %v2685_v1 = vld [vmem:[%s3873_s5 + $0x8] sm:$0xff] (!%p461_p9)   ;;  %v2686_v3 = vld [vmem:[%s3873_s5 + $0x10] sm:$0xff] (!%p461_p9)   ;;  %s3895_s1 = sld [smem:[#allocation12_spill]] (!%p461_p9)  ;;  %vm1038_vm0 = vcmask (!%p461_p9), 130048  }
  0x13   : > { %464 = sbr.rel (%p461_p9) target bundleno = 1424 (0x590), region = 80  ;;  %2477 = vmatprep.subr.bf16.mxu1 (!%p461_p9), %v2684_v0  ;;  %v2687_v2 = vld [vmem:[%s3871_s3] sm:$0xff] (!%p461_p9)   ;;  %v2689_v4 = vld [vmem:[%s3871_s3 + $0x8] sm:$0xff] (!%p461_p9)   ;;  %v2691_v5 = vld [vmem:[%s3871_s3 + $0x10] sm:$0xff] (!%p461_p9)   ;;  %s2805_s24 = smov (!%p461_p9), 32   ;;  %vm1073_vm1 = vcmask (!%p461_p9), 261248  }
  0x14   : > { %2478 = vmatpush3.bf16.msra.mxu1 (!%p461_p9), %v2684_v0  ;;  %2453 = vmatprep.subr.bf16.mxu0 (!%p461_p9), %v2687_v2  ;;  %v2688_v6 = vld [vmem:[%s3873_s5 + $0x18] sm:$0xff] (!%p461_p9)   ;;  %v2690_v8 = vld [vmem:[%s3873_s5 + $0x20] sm:$0xff] (!%p461_p9)   ;;  %v2692_v11 = vld [vmem:[%s3873_s5 + $0x28] sm:$0xff] (!%p461_p9)   ;;  %s2806_s27 = smov (!%p461_p9), 96   ;;  %s2807_s16 = smov (!%p461_p9), 112   ;;  %vm1104_vm2 = vcmask (!%p461_p9), 392448  }
  0x15   : > { %2479 = vmatprep.subr.bf16.mxu1 (!%p461_p9), %v2685_v1  ;;  %2454 = vmatpush3.bf16.msra.mxu0 (!%p461_p9), %v2687_v2  ;;  %v2693_v7 = vld [vmem:[%s3871_s3 + $0x18] sm:$0xff] (!%p461_p9)   ;;  %v2695_v10 = vld [vmem:[%s3871_s3 + $0x20] sm:$0xff] (!%p461_p9)   ;;  %v2697_v13 = vld [vmem:[%s3871_s3 + $0x28] sm:$0xff] (!%p461_p9)   ;;  %vm1135_vm3 = vcmask (!%p461_p9), 523648   ;;  %vm1166_vm4 = vcmask (!%p461_p9), 654848   ;;  %vm2812_vm5 = vmmov (!%p461_p9), 0  }
  0x16   : > { %2455 = vmatprep.subr.bf16.mxu0 (!%p461_p9), %v2689_v4  ;;  %v2694_v14 = vld [vmem:[%s3873_s5 + $0x30] sm:$0xff] (!%p461_p9)   ;;  %v2696_v15 = vld [vmem:[%s3873_s5 + $0x38] sm:$0xff] (!%p461_p9)   ;;  %v2708_v24 = vld [vmem:[%s3875_s7] sm:$0xff] (!%p461_p9)   ;;  %vm1197_vm6 = vcmask (!%p461_p9), 786048   ;;  %vm1228_vm7 = vcmask (!%p461_p9), 917248   ;;  %vm1259_vm8 = vcmask (!%p461_p9), 1048448  }
  0x17   : > { %v2700_v16 = vld [vmem:[%s3871_s3 + $0x30] sm:$0xff] (!%p461_p9)   ;;  %v2701_v17 = vld [vmem:[%s3871_s3 + $0x38] sm:$0xff] (!%p461_p9)   ;;  %v2709_v25 = vld [vmem:[%s3875_s7 + $0x8] sm:$0xff] (!%p461_p9)   ;;  %vm1850_vm10 = vcmask (!%p461_p9), 261120  }
  0x18   : > { %2480 = vmatpush3.bf16.msra.mxu1 (!%p461_p9), %v2685_v1  ;;  %v2710_v26 = vld [vmem:[%s3875_s7 + $0x10] sm:$0xff] (!%p461_p9)   ;;  %v2711_v27 = vld [vmem:[%s3875_s7 + $0x18] sm:$0xff] (!%p461_p9)   ;;  %v2712_v28 = vld [vmem:[%s3875_s7 + $0x20] sm:$0xff] (!%p461_p9)  }
  0x19   : > { %2481 = vmatprep.subr.bf16.mxu1 (!%p461_p9), %v2686_v3  ;;  %2456 = vmatpush3.bf16.msra.mxu0 (!%p461_p9), %v2689_v4  ;;  %v2713_v29 = vld [vmem:[%s3875_s7 + $0x28] sm:$0xff] (!%p461_p9)   ;;  %v2714_v30 = vld [vmem:[%s3875_s7 + $0x30] sm:$0xff] (!%p461_p9)   ;;  %v2715_v31 = vld [vmem:[%s3875_s7 + $0x38] sm:$0xff] (!%p461_p9)  }
  0x1a   : > { %s519_s30 = scalar_select %p518_p10, %s2918_s22, 1  ;;  %2457 = vmatprep.subr.bf16.mxu0 %v2691_v5  ;;  %v3048_v36 = vld [vmem:[%s3874_s6] ss:$0 sm:$0xff] }
  0x1b   : > { %v3057_v42 = vld [vmem:[%s3872_s4] ss:$0 sm:$0xff] }
  0x1c   : > { %s2968_s20 = sshll.u32 %s519_s30, 5  ;;  %2482 = vmatpush3.bf16.msra.mxu1 %v2686_v3 }
  0x1d   : > { %s2977_s17 = scalar_lea.vmem %s3895_s1, %s2968_s20  ;;  %2483 = vmatprep.subr.bf16.mxu1 %v2688_v6  ;;  %2458 = vmatpush3.bf16.msra.mxu0 %v2691_v5  ;;  %s2990_s29 = scalar_lea.vmem %s3868_s0, %s2968_s20 }
  0x1e   : > { %v2698_v9 = vld [vmem:[%s2977_s17] sm:$0xff]   ;;  %2459 = vmatprep.subr.bf16.mxu0 %v2693_v7  ;;  %v2699_v18 = vld [vmem:[%s2977_s17 + $0x8] sm:$0xff]   ;;  %v2704_v19 = vld [vmem:[%s2977_s17 + $0x10] sm:$0xff]   ;;  %s532_s23 = scalar_lea.vmem %s3870_s2, %s2968_s20  ;;  %s2804_s1 = smov 16  }
  0x1f   : > { %2493 = vmatprep.mubr.bf16.mxu1 %v2698_v9  ;;  %v2702_v12 = vld [vmem:[%s2990_s29] sm:$0xff]   ;;  %v2703_v20 = vld [vmem:[%s2990_s29 + $0x8] sm:$0xff]   ;;  %v2706_v21 = vld [vmem:[%s2990_s29 + $0x10] sm:$0xff]  }
  0x20   : > { %2484 = vmatpush3.bf16.msra.mxu1 %v2688_v6  ;;  %2469 = vmatprep.mubr.bf16.mxu0 %v2702_v12  ;;  %v2705_v22 = vld [vmem:[%s2977_s17 + $0x18] sm:$0xff]   ;;  %v2716_v32 = vld [vmem:[%s532_s23] sm:$0xff]   ;;  %v2717_v33 = vld [vmem:[%s532_s23 + $0x8] sm:$0xff]   ;;  %s2808_s17 = smov 64  }
  0x21   : > { %2485 = vmatprep.subr.bf16.mxu1 %v2690_v8  ;;  %2460 = vmatpush3.bf16.msra.mxu0 %v2693_v7  ;;  %v2707_v23 = vld [vmem:[%s2990_s29 + $0x18] sm:$0xff]   ;;  %v2718_v34 = vld [vmem:[%s532_s23 + $0x10] sm:$0xff]   ;;  %s2809_s29 = smov 80  }
  0x22   : > { %2461 = vmatprep.subr.bf16.mxu0 %v2695_v10  ;;  %v2719_v35 = vld [vmem:[%s532_s23 + $0x18] sm:$0xff]   ;;  %s2810_s23 = smov 48  }
  0x24   : > { %2486 = vmatpush3.bf16.msra.mxu1 %v2690_v8 }
  0x25   : > { %2487 = vmatprep.subr.bf16.mxu1 %v2692_v11  ;;  %2462 = vmatpush3.bf16.msra.mxu0 %v2695_v10 }
  0x26   : > { %2463 = vmatprep.subr.bf16.mxu0 %v2697_v13 }
  0x28   : > { %2488 = vmatpush3.bf16.msra.mxu1 %v2692_v11 }
  0x29   : > { %2489 = vmatprep.subr.bf16.mxu1 %v2694_v14  ;;  %2464 = vmatpush3.bf16.msra.mxu0 %v2697_v13 }
  0x2a   : > { %2465 = vmatprep.subr.bf16.mxu0 %v2700_v16 }
  0x2c   : > { %2490 = vmatpush3.bf16.msra.mxu1 %v2694_v14 }
  0x2d   : > { %2491 = vmatprep.subr.bf16.mxu1 %v2696_v15  ;;  %2466 = vmatpush3.bf16.msra.mxu0 %v2700_v16 }
  0x2e   : > { %2467 = vmatprep.subr.bf16.mxu0 %v2701_v17 }
  0x30   : > { %2492 = vmatpush3.bf16.msra.mxu1 %v2696_v15 }
  0x31   : > { %2468 = vmatpush3.bf16.msra.mxu0 %v2701_v17 }
  0x32   : > { %2501 = vmatprep.subr.bf16.mxu0 %v2708_v24 }
  0x33   : > { %2494 = vmatmul.mubr.bf16.vlgmr.msra.gmra.mrb[0].mxu1 %v2699_v18 }
  0x34   : > { %2497 = vmatprep.mubr.bf16.mxu1 %v2704_v19  ;;  %2470 = vmatmul.mubr.bf16.vlgmr.msra.gmra.mrb[0].mxu0 %v2703_v20 }
  0x35   : > { %2473 = vmatprep.mubr.bf16.mxu0 %v2706_v21  ;;  %2502 = vmatpush3.bf16.msra.mxu0 %v2708_v24 }
  0x36   : > { %2503 = vmatprep.subr.bf16.mxu0 %v2709_v25 }
  0x39   : > { %2504 = vmatpush3.bf16.msra.mxu0 %v2709_v25 }
  0x3a   : > { %2505 = vmatprep.subr.bf16.mxu0 %v2710_v26 }
  0x3b   : > { %2498 = vmatmul.mubr.bf16.gmra.mrb[4].mxu1 %v2705_v22 }
  0x3c   : > { %2474 = vmatmul.mubr.bf16.gmra.mrb[4].mxu0 %v2707_v23 }
  0x3d   : > { %2506 = vmatpush3.bf16.msra.mxu0 %v2710_v26  ;;  %2517 = vmatprep.mubr.bf16.mxu0 %v2716_v32 }
  0x3e   : > { %2507 = vmatprep.subr.bf16.mxu0 %v2711_v27 }
  0x41   : > { %2508 = vmatpush3.bf16.msra.mxu0 %v2711_v27 }
  0x42   : > { %2509 = vmatprep.subr.bf16.mxu0 %v2712_v28 }
  0x45   : > { %2510 = vmatpush3.bf16.msra.mxu0 %v2712_v28 }
  0x46   : > { %2511 = vmatprep.subr.bf16.mxu0 %v2713_v29 }
  0x49   : > { %2512 = vmatpush3.bf16.msra.mxu0 %v2713_v29 }
  0x4a   : > { %2513 = vmatprep.subr.bf16.mxu0 %v2714_v30 }
  0x4d   : > { %2514 = vmatpush3.bf16.msra.mxu0 %v2714_v30 }
  0x4e   : > { %2515 = vmatprep.subr.bf16.mxu0 %v2715_v31 }
  0x51   : > { %2516 = vmatpush3.bf16.msra.mxu0 %v2715_v31 }
  0x54   : > { %2518 = vmatmul.mubr.bf16.vlgmr.msra.gmra.mrb[8].mxu0 %v2717_v33 }
  0x55   : > { %2521 = vmatprep.mubr.bf16.mxu0 %v2718_v34 }
  0x5c   : > { %2522 = vmatmul.mubr.bf16.gmra.mrb[12].mxu0 %v2719_v35 }
 0x106   : > { %v2495_v37 = vpop.f32.mrb[0].mxu1 }
 0x107   : > { %v3051_v38 = vadd.f32 %v2495_v37, %v3048_v36  ;;  %v839_v39 = vpop.f32.mrb[1].mxu1  ;;  %v2471_v44 = vpop.f32.mrb[0].mxu0 }
 0x108   : > { %v840_v40 = vadd.f32 %v3048_v36, %v839_v39  ;;  %v2496_v41 = vpop.f32.mrb[2].mxu1  ;;  %v671_v46 = vpop.f32.mrb[1].mxu0  ;;  %v3083_v56 = vadd.f32 %v2471_v44, %v3057_v42 }
 0x109   : > { %1351 = vrot.lane.b32.xlu1 %v3051_v38, %s2804_s1  ;;  %1347 = vrot.lane.b32.xlu0 %v3051_v38, %s2805_s24  ;;  %v842_v43 = vpop.f32.mrb[3].mxu1  ;;  %v672_v47 = vadd.f32 %v3057_v42, %v671_v46  ;;  %v2472_v48 = vpop.f32.mrb[2].mxu0  ;;  %v3132_v4 = vadd.f32 %v2496_v41, %v3048_v36 }
 0x10a   : > { %v3064_v45 = vadd.f32 %v3048_v36, %v842_v43  ;;  %1286 = vst.msk [vmem:[#allocation3] sm:$0xff] %vm1038_vm0, %v840_v40  ;;  %v674_v49 = vpop.f32.mrb[3].mxu0  ;;  %v3147_v5 = vadd.f32 %v2472_v48, %v3057_v42 }
 0x10b   : > { %v3073_v50 = vadd.f32 %v3057_v42, %v674_v49  ;;  %1039 = vst.msk [vmem:[#allocation2] sm:$0xff] %vm1038_vm0, %v672_v47 }
 0x10d   : > { %1360 = vrot.lane.b32.xlu1 %v3051_v38, %s2806_s27  ;;  %1356 = vrot.lane.b32.xlu0 %v3051_v38, %s2807_s16 }
 0x10e   : > { %v2499_v51 = vpop.f32.mrb[4].mxu1 }
 0x10f   : > { %v3077_v52 = vadd.f32 %v2499_v51, %v3048_v36  ;;  %v855_v53 = vpop.f32.mrb[5].mxu1  ;;  %v2475_v59 = vpop.f32.mrb[4].mxu0 }
 0x110   : > { %v3080_v54 = vadd.f32 %v3048_v36, %v855_v53  ;;  %v2500_v55 = vpop.f32.mrb[6].mxu1  ;;  %v3096_v61 = vadd.f32 %v2475_v59, %v3057_v42  ;;  %v687_v62 = vpop.f32.mrb[5].mxu0 }
 0x111   : > { %1368 = vrot.lane.b32.xlu1 %v3051_v38, %s2808_s17  ;;  %1364 = vrot.lane.b32.xlu0 %v3051_v38, %s2809_s29  ;;  %v3090_v57 = vadd.f32 %v2500_v55, %v3048_v36  ;;  %v858_v58 = vpop.f32.mrb[7].mxu1  ;;  %v3099_v63 = vadd.f32 %v3057_v42, %v687_v62  ;;  %v2476_v0 = vpop.f32.mrb[6].mxu0 }
 0x112   : > { %v3093_v60 = vadd.f32 %v3048_v36, %v858_v58  ;;  %v3102_v1 = vadd.f32 %v2476_v0, %v3057_v42  ;;  %v690_v2 = vpop.f32.mrb[7].mxu0 }
 0x113   : > { %v3109_v3 = vadd.f32 %v3057_v42, %v690_v2 }
 0x115   : > { %1372 = vrot.lane.b32.xlu0 %v3051_v38, %s2810_s23  ;;  %1101 = vrot.lane.b32.xlu1 %v3083_v56, %s2805_s24 }
 0x119   : > { %1106 = vrot.lane.b32.xlu0 %v3083_v56, %s2804_s1  ;;  %1115 = vrot.lane.b32.xlu1 %v3083_v56, %s2806_s27 }
 0x11d   : > { %1111 = vrot.lane.b32.xlu0 %v3083_v56, %s2807_s16  ;;  %1119 = vrot.lane.b32.xlu1 %v3083_v56, %s2809_s29 }
 0x121   : > { %1123 = vrot.lane.b32.xlu0 %v3083_v56, %s2808_s17  ;;  %1296 = vrot.lane.b32.xlu1 %v840_v40, %s2809_s29 }
 0x125   : > { %1127 = vrot.lane.b32.xlu0 %v3083_v56, %s2810_s23  ;;  %1300 = vrot.lane.b32.xlu1 %v840_v40, %s2808_s17 }
 0x127   : > { %v3356_v49 = vpop.f32.mrb[8].mxu0 }
 0x128   : > { %v3365_v53 = vpop.f32.mrb[9].mxu0 }
 0x129   : > { %1288 = vrot.lane.b32.xlu0 %v840_v40, %s2807_s16  ;;  %1308 = vrot.lane.b32.xlu1 %v840_v40, %s2805_s24  ;;  %v3368_v55 = vpop.f32.mrb[10].mxu0 }
 0x12a   : > { %v3373_v62 = vpop.f32.mrb[11].mxu0 }
 0x12d   : > { %1292 = vrot.lane.b32.xlu0 %v840_v40, %s2806_s27  ;;  %1053 = vrot.lane.b32.xlu1 %v672_v47, %s2808_s17 }
 0x12f   : > { %v3381_v0 = vpop.f32.mrb[12].mxu0 }
 0x130   : > { %v3384_v2 = vpop.f32.mrb[13].mxu0 }
 0x131   : > { %1304 = vrot.lane.b32.xlu0 %v840_v40, %s2810_s23  ;;  %1065 = vrot.lane.b32.xlu1 %v672_v47, %s2804_s1 }
 0x135   : > { %1312 = vrot.lane.b32.xlu0 %v840_v40, %s2804_s1  ;;  %1377 = vrot.lane.b32.xlu1 %v3132_v4, %s2810_s23 }
 0x139   : > { %1385 = vrot.lane.b32.xlu1 %v3132_v4, %s2804_s1  ;;  %1041 = vrot.lane.b32.xlu0 %v672_v47, %s2807_s16 }
 0x13d   : > { %1394 = vrot.lane.b32.xlu1 %v3132_v4, %s2806_s27  ;;  %1045 = vrot.lane.b32.xlu0 %v672_v47, %s2806_s27 }
 0x141   : > { %1402 = vrot.lane.b32.xlu1 %v3132_v4, %s2808_s17  ;;  %1049 = vrot.lane.b32.xlu0 %v672_v47, %s2809_s29 }
 0x145   : > { %1137 = vrot.lane.b32.xlu1 %v3147_v5, %s2805_s24  ;;  %1057 = vrot.lane.b32.xlu0 %v672_v47, %s2810_s23 }
 0x149   : > { %1146 = vrot.lane.b32.xlu1 %v3147_v5, %s2807_s16  ;;  %1061 = vrot.lane.b32.xlu0 %v672_v47, %s2805_s24 }
 0x14d   : > { %1158 = vrot.lane.b32.xlu1 %v3147_v5, %s2808_s17  ;;  %1381 = vrot.lane.b32.xlu0 %v3132_v4, %s2805_s24 }
 0x151   : > { %1317 = vrot.lane.b32.xlu1 %v3064_v45, %s2804_s1  ;;  %1390 = vrot.lane.b32.xlu0 %v3132_v4, %s2807_s16 }
 0x155   : > { %1326 = vrot.lane.b32.xlu1 %v3064_v45, %s2806_s27  ;;  %1398 = vrot.lane.b32.xlu0 %v3132_v4, %s2809_s29 }
 0x159   : > { %1334 = vrot.lane.b32.xlu1 %v3064_v45, %s2808_s17  ;;  %1132 = vrot.lane.b32.xlu0 %v3147_v5, %s2810_s23 }
 0x15d   : > { %1342 = vrot.lane.b32.xlu1 %v3064_v45, %s2805_s24  ;;  %1141 = vrot.lane.b32.xlu0 %v3147_v5, %s2804_s1 }
 0x161   : > { %1070 = vrot.lane.b32.xlu1 %v3073_v50, %s2804_s1  ;;  %1150 = vrot.lane.b32.xlu0 %v3147_v5, %s2806_s27 }
 0x165   : > { %1076 = vrot.lane.b32.xlu1 %v3073_v50, %s2807_s16  ;;  %1154 = vrot.lane.b32.xlu0 %v3147_v5, %s2809_s29 }
 0x169   : > { %1080 = vrot.lane.b32.xlu1 %v3073_v50, %s2806_s27  ;;  %1322 = vrot.lane.b32.xlu0 %v3064_v45, %s2807_s16 }
 0x16d   : > { %1092 = vrot.lane.b32.xlu1 %v3073_v50, %s2810_s23  ;;  %1330 = vrot.lane.b32.xlu0 %v3064_v45, %s2809_s29 }
 0x171   : > { %1096 = vrot.lane.b32.xlu1 %v3073_v50, %s2805_s24  ;;  %1338 = vrot.lane.b32.xlu0 %v3064_v45, %s2810_s23 }
 0x175   : > { %1471 = vrot.lane.b32.xlu1 %v3077_v52, %s2809_s29  ;;  %1084 = vrot.lane.b32.xlu0 %v3073_v50, %s2809_s29 }
 0x179   : > { %1479 = vrot.lane.b32.xlu1 %v3077_v52, %s2810_s23  ;;  %1088 = vrot.lane.b32.xlu0 %v3073_v50, %s2808_s17 }
 0x17b   : > { %v1352_v6 = vpop.permute.xlu1 %1351  ;;  %v3203_v7 = vpop.permute.xlu0 %1347 }
 0x17d   : > { %1487 = vrot.lane.b32.xlu1 %v3077_v52, %s2804_s1  ;;  %1467 = vrot.lane.b32.xlu0 %v3077_v52, %s2806_s27 }
 0x17f   : > { %v3209_v8 = vpop.permute.xlu1 %1360  ;;  %v3211_v9 = vpop.permute.xlu0 %1356 }
 0x181   : > { %1230 = vrot.lane.b32.xlu1 %v3096_v61, %s2809_s29  ;;  %1475 = vrot.lane.b32.xlu0 %v3077_v52, %s2808_s17 }
 0x183   : > { %v3217_v10 = vpop.permute.xlu1 %1368  ;;  %v3219_v11 = vpop.permute.xlu0 %1364 }
 0x185   : > { %1234 = vrot.lane.b32.xlu1 %v3096_v61, %s2808_s17  ;;  %1483 = vrot.lane.b32.xlu0 %v3077_v52, %s2805_s24 }
 0x187   : > { %v3225_v12 = vpop.permute.xlu0 %1372  ;;  %v3227_v13 = vpop.permute.xlu1 %1101 }
 0x189   : > { %1411 = vrot.lane.b32.xlu1 %v3080_v54, %s2810_s23  ;;  %1492 = vrot.lane.b32.xlu0 %v3077_v52, %s2807_s16 }
 0x18b   : > { %v1107_v14 = vpop.permute.xlu0 %1106  ;;  %v3233_v15 = vpop.permute.xlu1 %1115 }
 0x18d   : > { %1419 = vrot.lane.b32.xlu1 %v3080_v54, %s2804_s1  ;;  %1225 = vrot.lane.b32.xlu0 %v3096_v61, %s2806_s27 }
 0x18f   : > { %v3239_v16 = vpop.permute.xlu0 %1111  ;;  %v3241_v17 = vpop.permute.xlu1 %1119 }
 0x191   : > { %1428 = vrot.lane.b32.xlu1 %v3080_v54, %s2806_s27  ;;  %1238 = vrot.lane.b32.xlu0 %v3096_v61, %s2810_s23 }
 0x193   : > { %v3247_v18 = vpop.permute.xlu0 %1123  ;;  %v1297_v19 = vpop.permute.xlu1 %1296 }
 0x194   : > { %1299 = vst.msk [vmem:[#allocation3 + $0x18] sm:$0xff] %vm1038_vm0, %v1297_v19 }
 0x195   : > { %1163 = vrot.lane.b32.xlu1 %v3099_v63, %s2808_s17  ;;  %1242 = vrot.lane.b32.xlu0 %v3096_v61, %s2805_s24 }
 0x197   : > { %v3254_v20 = vpop.permute.xlu0 %1127  ;;  %v1301_v21 = vpop.permute.xlu1 %1300 }
 0x198   : > { %1303 = vst.msk [vmem:[#allocation3 + $0x20] sm:$0xff] %vm1038_vm0, %v1301_v21  ;;  %v1703_v21 = vld [vmem:[%s3877_s9 + $0x18] sm:$0xff] }
 0x199   : > { %1172 = vrot.lane.b32.xlu1 %v3099_v63, %s2805_s24  ;;  %1246 = vrot.lane.b32.xlu0 %v3096_v61, %s2804_s1 }
 0x19b   : > { %v1289_v22 = vpop.permute.xlu0 %1288  ;;  %v1309_v23 = vpop.permute.xlu1 %1308 }
 0x19c   : > { %1291 = vst.msk [vmem:[#allocation3 + $0x8] sm:$0xff] %vm1038_vm0, %v1289_v22  ;;  %1311 = vst.msk [vmem:[#allocation3 + $0x30] sm:$0xff] %vm1038_vm0, %v1309_v23  ;;  %v1705_v23 = vld [vmem:[%s3877_s9 + $0x28] sm:$0xff] }
 0x19d   : > { %1321 = vst.msk [vmem:[#allocation3 + $0x8] sm:$0xff] %vm1073_vm1, %v3064_v45  ;;  %1181 = vrot.lane.b32.xlu1 %v3099_v63, %s2807_s16  ;;  %1407 = vrot.lane.b32.xlu0 %v3080_v54, %s2808_s17 }
 0x19e   : > { %1354 = vst.msk [vmem:[#allocation3 + $0x8] sm:$0xff] %vm1104_vm2, %v1352_v6 }
 0x19f   : > { %v1293_v24 = vpop.permute.xlu0 %1292  ;;  %v1054_v25 = vpop.permute.xlu1 %1053 }
 0x1a0   : > { %1295 = vst.msk [vmem:[#allocation3 + $0x10] sm:$0xff] %vm1038_vm0, %v1293_v24  ;;  %1056 = vst.msk [vmem:[#allocation2 + $0x20] sm:$0xff] %vm1038_vm0, %v1054_v25  ;;  %v2813_v24 = vmov 0.0  }
 0x1a1   : > { %1185 = vrot.lane.b32.xlu1 %v3099_v63, %s2806_s27  ;;  %1415 = vrot.lane.b32.xlu0 %v3080_v54, %s2805_s24 }
 0x1a2   : > { %2557 = vmatprep.mubr.msk.f32.mxu0 %vm2812_vm5, %v2813_v24  ;;  %1918 = vmatprep.mubr.f32.mxu1 %v2813_v24 }
 0x1a3   : > { %v1305_v26 = vpop.permute.xlu0 %1304  ;;  %v1066_v27 = vpop.permute.xlu1 %1065 }
 0x1a4   : > { %1307 = vst.msk [vmem:[#allocation3 + $0x28] sm:$0xff] %vm1038_vm0, %v1305_v26  ;;  %1068 = vst.msk [vmem:[#allocation2 + $0x38] sm:$0xff] %vm1038_vm0, %v1066_v27  ;;  %v1707_v27 = vld [vmem:[%s3877_s9 + $0x38] sm:$0xff] }
 0x1a5   : > { %1497 = vrot.lane.b32.xlu1 %v3090_v57, %s2807_s16  ;;  %1424 = vrot.lane.b32.xlu0 %v3080_v54, %s2807_s16 }
 0x1a7   : > { %v1313_v28 = vpop.permute.xlu0 %1312  ;;  %v1378_v29 = vpop.permute.xlu1 %1377 }
 0x1a8   : > { %1315 = vst.msk [vmem:[#allocation3 + $0x38] sm:$0xff] %vm1038_vm0, %v1313_v28 }
 0x1a9   : > { %1505 = vrot.lane.b32.xlu1 %v3090_v57, %s2809_s29  ;;  %1432 = vrot.lane.b32.xlu0 %v3080_v54, %s2809_s29 }
 0x1ab   : > { %v3287_v30 = vpop.permute.xlu1 %1385  ;;  %v1042_v31 = vpop.permute.xlu0 %1041 }
 0x1ac   : > { %1044 = vst.msk [vmem:[#allocation2 + $0x8] sm:$0xff] %vm1038_vm0, %v1042_v31  ;;  %v1708_v31 = vld [vmem:[%s3877_s9 + $0x40] sm:$0xff] }
 0x1ad   : > { %1075 = vst.msk [vmem:[#allocation2 + $0x8] sm:$0xff] %vm1073_vm1, %v3073_v50  ;;  %1513 = vrot.lane.b32.xlu1 %v3090_v57, %s2810_s23  ;;  %1168 = vrot.lane.b32.xlu0 %v3099_v63, %s2810_s23 }
 0x1ae   : > { %1109 = vst.msk [vmem:[#allocation2 + $0x8] sm:$0xff] %vm1104_vm2, %v1107_v14 }
 0x1af   : > { %v1395_v32 = vpop.permute.xlu1 %1394  ;;  %v1046_v33 = vpop.permute.xlu0 %1045 }
 0x1b0   : > { %1048 = vst.msk [vmem:[#allocation2 + $0x10] sm:$0xff] %vm1038_vm0, %v1046_v33 }
 0x1b1   : > { %1521 = vrot.lane.b32.xlu1 %v3090_v57, %s2804_s1  ;;  %1176 = vrot.lane.b32.xlu0 %v3099_v63, %s2804_s1 }
 0x1b3   : > { %v1403_v34 = vpop.permute.xlu1 %1402  ;;  %v1050_v35 = vpop.permute.xlu0 %1049 }
 0x1b4   : > { %1052 = vst.msk [vmem:[#allocation2 + $0x18] sm:$0xff] %vm1038_vm0, %v1050_v35  ;;  %v1711_v35 = vld [vmem:[%s3877_s9 + $0x58] sm:$0xff] }
 0x1b5   : > { %1261 = vrot.lane.b32.xlu1 %v3102_v1, %s2806_s27  ;;  %1501 = vrot.lane.b32.xlu0 %v3090_v57, %s2806_s27 }
 0x1b7   : > { %v1138_v36 = vpop.permute.xlu1 %1137  ;;  %v1058_v37 = vpop.permute.xlu0 %1057 }
 0x1b8   : > { %1140 = vst.msk [vmem:[#allocation2 + $0x8] sm:$0xff] %vm1135_vm3, %v1138_v36 }
 0x1b9   : > { %1060 = vst.msk [vmem:[#allocation2 + $0x28] sm:$0xff] %vm1038_vm0, %v1058_v37  ;;  %1265 = vrot.lane.b32.xlu1 %v3102_v1, %s2809_s29  ;;  %1509 = vrot.lane.b32.xlu0 %v3090_v57, %s2808_s17 }
 0x1bb   : > { %v3313_v39 = vpop.permute.xlu1 %1146  ;;  %v1062_v40 = vpop.permute.xlu0 %1061 }
 0x1bc   : > { %1064 = vst.msk [vmem:[#allocation2 + $0x30] sm:$0xff] %vm1038_vm0, %v1062_v40  ;;  %v1713_v40 = vld [vmem:[%s3877_s9 + $0x68] sm:$0xff] }
 0x1bd   : > { %1273 = vrot.lane.b32.xlu1 %v3102_v1, %s2810_s23  ;;  %1517 = vrot.lane.b32.xlu0 %v3090_v57, %s2805_s24 }
 0x1bf   : > { %v3320_v41 = vpop.permute.xlu1 %1158  ;;  %v1382_v42 = vpop.permute.xlu0 %1381 }
 0x1c0   : > { %1384 = vst.msk [vmem:[#allocation3 + $0x8] sm:$0xff] %vm1135_vm3, %v1382_v42 }
 0x1c1   : > { %1437 = vrot.lane.b32.xlu1 %v3093_v60, %s2809_s29  ;;  %1256 = vrot.lane.b32.xlu0 %v3102_v1, %s2807_s16 }
 0x1c3   : > { %v1318_v43 = vpop.permute.xlu1 %1317  ;;  %v3327_v44 = vpop.permute.xlu0 %1390 }
 0x1c4   : > { %1320 = vst.msk [vmem:[#allocation3] sm:$0xff] %vm1073_vm1, %v1318_v43 }
 0x1c5   : > { %1350 = vst.msk [vmem:[#allocation3] sm:$0xff] %vm1104_vm2, %v3203_v7  ;;  %1445 = vrot.lane.b32.xlu1 %v3093_v60, %s2810_s23  ;;  %1269 = vrot.lane.b32.xlu0 %v3102_v1, %s2808_s17 }
 0x1c6   : > { %1380 = vst.msk [vmem:[#allocation3] sm:$0xff] %vm1135_vm3, %v1378_v29 }
 0x1c7   : > { %v1327_v45 = vpop.permute.xlu1 %1326  ;;  %v3337_v46 = vpop.permute.xlu0 %1398 }
 0x1c8   : > { %1329 = vst.msk [vmem:[#allocation3 + $0x18] sm:$0xff] %vm1073_vm1, %v1327_v45  ;;  %v1715_v45 = vld [vmem:[%s3877_s9 + $0x78] sm:$0xff] }
 0x1c9   : > { %1359 = vst.msk [vmem:[#allocation3 + $0x18] sm:$0xff] %vm1104_vm2, %v3211_v9  ;;  %1453 = vrot.lane.b32.xlu1 %v3093_v60, %s2804_s1  ;;  %1441 = vrot.lane.b32.xlu0 %v3093_v60, %s2808_s17 }
 0x1ca   : > { %1389 = vst.msk [vmem:[#allocation3 + $0x18] sm:$0xff] %vm1135_vm3, %v3132_v4 }
 0x1cb   : > { %v1335_v47 = vpop.permute.xlu1 %1334  ;;  %v1133_v48 = vpop.permute.xlu0 %1132 }
 0x1cc   : > { %1337 = vst.msk [vmem:[#allocation3 + $0x28] sm:$0xff] %vm1073_vm1, %v1335_v47 }
 0x1cd   : > { %1367 = vst.msk [vmem:[#allocation3 + $0x28] sm:$0xff] %vm1104_vm2, %v3219_v11  ;;  %1462 = vrot.lane.b32.xlu1 %v3093_v60, %s2806_s27  ;;  %1449 = vrot.lane.b32.xlu0 %v3093_v60, %s2805_s24 }
 0x1ce   : > { %1397 = vst.msk [vmem:[#allocation3 + $0x28] sm:$0xff] %vm1135_vm3, %v1395_v32 }
 0x1cf   : > { %v1343_v50 = vpop.permute.xlu1 %1342  ;;  %v1142_v51 = vpop.permute.xlu0 %1141 }
 0x1d0   : > { %1345 = vst.msk [vmem:[#allocation3 + $0x38] sm:$0xff] %vm1073_vm1, %v1343_v50 }
 0x1d1   : > { %1375 = vst.msk [vmem:[#allocation3 + $0x38] sm:$0xff] %vm1104_vm2, %v3225_v12  ;;  %1277 = vrot.lane.b32.xlu1 %v3102_v1, %s2805_s24  ;;  %1458 = vrot.lane.b32.xlu0 %v3093_v60, %s2807_s16 }
 0x1d2   : > { %1405 = vst.msk [vmem:[#allocation3 + $0x38] sm:$0xff] %vm1135_vm3, %v1403_v34  ;;  %v1710_v34 = vld [vmem:[%s3877_s9 + $0x50] sm:$0xff] }
 0x1d3   : > { %v1071_v58 = vpop.permute.xlu1 %1070  ;;  %v3370_v59 = vpop.permute.xlu0 %1150  ;;  %v2611_v37 = vpack.c.bf16 %v1711_v35, %v1710_v34 }
 0x1d4   : > { %1074 = vst.msk [vmem:[#allocation2] sm:$0xff] %vm1073_vm1, %v1071_v58 }
 0x1d5   : > { %1105 = vst.msk [vmem:[#allocation2] sm:$0xff] %vm1104_vm2, %v3227_v13  ;;  %1194 = vrot.lane.b32.xlu1 %v3109_v3, %s2809_s29  ;;  %1189 = vrot.lane.b32.xlu0 %v3099_v63, %s2809_s29  ;;  %v1700_v13 = vld [vmem:[%s3877_s9] sm:$0xff] }
 0x1d6   : > { %1136 = vst.msk [vmem:[#allocation2] sm:$0xff] %vm1135_vm3, %v1133_v48 }
 0x1d7   : > { %v1077_v4 = vpop.permute.xlu1 %1076  ;;  %v1155_v6 = vpop.permute.xlu0 %1154 }
 0x1d8   : > { %1079 = vst.msk [vmem:[#allocation2 + $0x10] sm:$0xff] %vm1073_vm1, %v1077_v4 }
 0x1d9   : > { %1110 = vst.msk [vmem:[#allocation2 + $0x10] sm:$0xff] %vm1104_vm2, %v3083_v56  ;;  %1203 = vrot.lane.b32.xlu1 %v3109_v3, %s2810_s23  ;;  %1199 = vrot.lane.b32.xlu0 %v3109_v3, %s2808_s17  ;;  %v3408_v56 = vpop.f32.mrb[14].mxu0  ;;  %s2382_s17 = sshll.u32 %s2918_s22, 10 }
 0x1da   : > { %1144 = vst.msk [vmem:[#allocation2 + $0x10] sm:$0xff] %vm1135_vm3, %v1142_v51  ;;  %s3821_s30 = scalar_lea.hbm %s3883_s15, %s2382_s17 }
 0x1db   : > { %v1081_v7 = vpop.permute.xlu1 %1080  ;;  %v1323_v9 = vpop.permute.xlu0 %1322 }
 0x1dc   : > { %1083 = vst.msk [vmem:[#allocation2 + $0x18] sm:$0xff] %vm1073_vm1, %v1081_v7  ;;  %1325 = vst.msk [vmem:[#allocation3 + $0x10] sm:$0xff] %vm1073_vm1, %v1323_v9 }
 0x1dd   : > { %1114 = vst.msk [vmem:[#allocation2 + $0x18] sm:$0xff] %vm1104_vm2, %v3239_v16  ;;  %1355 = vst.msk [vmem:[#allocation3 + $0x10] sm:$0xff] %vm1104_vm2, %v3051_v38  ;;  %1211 = vrot.lane.b32.xlu1 %v3109_v3, %s2804_s1  ;;  %1207 = vrot.lane.b32.xlu0 %v3109_v3, %s2805_s24  ;;  %v3412_v38 = vpop.f32.mrb[15].mxu0  ;;  %v2811_v16 = vmov 0.0|0.0  }
 0x1de   : > { %1145 = vst.msk [vmem:[#allocation2 + $0x18] sm:$0xff] %vm1135_vm3, %v3147_v5  ;;  %1388 = vst.msk [vmem:[#allocation3 + $0x10] sm:$0xff] %vm1135_vm3, %v3287_v30  ;;  %v1701_v5 = vld [vmem:[%s3877_s9 + $0x8] sm:$0xff]  ;;  %2595 = vmatprep.subr.bf16.mxu0 %v2811_v16 }
 0x1df   : > { %v1093_v11 = vpop.permute.xlu1 %1092  ;;  %v1331_v12 = vpop.permute.xlu0 %1330  ;;  %v2596_v14 = vpack.c.bf16 %v1701_v5, %v1700_v13 }
 0x1e0   : > { %1095 = vst.msk [vmem:[#allocation2 + $0x30] sm:$0xff] %vm1073_vm1, %v1093_v11  ;;  %1333 = vst.msk [vmem:[#allocation3 + $0x20] sm:$0xff] %vm1073_vm1, %v1331_v12 }
 0x1e1   : > { %1126 = vst.msk [vmem:[#allocation2 + $0x30] sm:$0xff] %vm1104_vm2, %v3247_v18  ;;  %1363 = vst.msk [vmem:[#allocation3 + $0x20] sm:$0xff] %vm1104_vm2, %v3209_v8  ;;  %1220 = vrot.lane.b32.xlu1 %v3109_v3, %s2806_s27  ;;  %1216 = vrot.lane.b32.xlu0 %v3109_v3, %s2807_s16  ;;  %v1702_v8 = vld [vmem:[%s3877_s9 + $0x10] sm:$0xff] }
 0x1e2   : > { %1157 = vst.msk [vmem:[#allocation2 + $0x30] sm:$0xff] %vm1135_vm3, %v1155_v6  ;;  %1393 = vst.msk [vmem:[#allocation3 + $0x20] sm:$0xff] %vm1135_vm3, %v3327_v44  ;;  %2597 = vmatpush3.bf16.msra.mxu0 %v2596_v14  ;;  %v2599_v22 = vpack.c.bf16 %v1703_v21, %v1702_v8  ;;  %v1714_v44 = vld [vmem:[%s3877_s9 + $0x70] sm:$0xff] }
 0x1e3   : > { %v1097_v19 = vpop.permute.xlu1 %1096  ;;  %v1339_v18 = vpop.permute.xlu0 %1338  ;;  %1423 = vst.msk [vmem:[#allocation3 + $0x20] sm:$0xff] %vm1166_vm4, %v3080_v54  ;;  %2598 = vmatprep.subr.bf16.mxu0 %v2811_v16  ;;  %v1704_v54 = vld [vmem:[%s3877_s9 + $0x20] sm:$0xff]  ;;  %v2617_v48 = vpack.c.bf16 %v1715_v45, %v1714_v44 }
 0x1e4   : > { %1099 = vst.msk [vmem:[#allocation2 + $0x38] sm:$0xff] %vm1073_vm1, %v1097_v19  ;;  %1341 = vst.msk [vmem:[#allocation3 + $0x30] sm:$0xff] %vm1073_vm1, %v1339_v18  ;;  %v2602_v26 = vpack.c.bf16 %v1705_v23, %v1704_v54 }
 0x1e5   : > { %1130 = vst.msk [vmem:[#allocation2 + $0x38] sm:$0xff] %vm1104_vm2, %v3254_v20  ;;  %1371 = vst.msk [vmem:[#allocation3 + $0x30] sm:$0xff] %vm1104_vm2, %v3217_v10  ;;  %1251 = vrot.lane.b32.xlu1 %v3096_v61, %s2807_s16  ;;  %1281 = vrot.lane.b32.xlu0 %v3102_v1, %s2804_s1  ;;  %v1706_v10 = vld [vmem:[%s3877_s9 + $0x30] sm:$0xff]  ;;  %s515_s16 = sand.u32 1, %s2794_s19  }
 0x1e6   : > { %1161 = vst.msk [vmem:[#allocation2 + $0x38] sm:$0xff] %vm1135_vm3, %v3320_v41  ;;  %1401 = vst.msk [vmem:[#allocation3 + $0x30] sm:$0xff] %vm1135_vm3, %v3337_v46  ;;  %2600 = vmatpush3.bf16.msra.mxu0 %v2599_v22  ;;  %v2605_v30 = vpack.c.bf16 %v1707_v27, %v1706_v10  ;;  %s2316_s26 = sshll.u32 %s515_s16, 6  ;;  %s3827_s22 = scalar_lea.sflag [#allocation6], %s515_s16 }
 0x1e7   : > { %v3464_v25 = vpop.permute.xlu1 %1471  ;;  %v1085_v20 = vpop.permute.xlu0 %1084  ;;  %2601 = vmatprep.subr.bf16.mxu0 %v2811_v16  ;;  %s517_s27 = scalar_lea.vmem [#allocation5], %s2316_s26  ;;  %s2814_s26 = smov [#allocation5]  }
 0x1e8   : > { %1087 = vst.msk [vmem:[#allocation2 + $0x20] sm:$0xff] %vm1073_vm1, %v1085_v20  ;;  %s2226_s29 = sshll.u32 %s517_s27, 4  ;;  %s2744_s1 = sshll.u32 %s2814_s26, 4  ;;  %s3823_s29 = int_to_ptr.vmem [resolvable:$true] %s2226_s29  ;;  %s2745_s1 = int_to_ptr.vmem [resolvable:$false] %s2744_s1 }
 0x1e9   : > { %1118 = vst.msk [vmem:[#allocation2 + $0x20] sm:$0xff] %vm1104_vm2, %v3233_v15  ;;  %v1709_v15 = vld [vmem:[%s3877_s9 + $0x48] sm:$0xff]  ;;  %s2740_s20 = scalar_lea.vmem %s3823_s29, 1024  ;;  %s2746_s24 = scalar_lea.vmem %s2745_s1, 2048 }
 0x1ea   : > { %1149 = vst.msk [vmem:[#allocation2 + $0x20] sm:$0xff] %vm1135_vm3, %v3313_v39  ;;  %2603 = vmatpush3.bf16.msra.mxu0 %v2602_v26  ;;  %v2608_v33 = vpack.c.bf16 %v1709_v15, %v1708_v31  ;;  %v1712_v39 = vld [vmem:[%s3877_s9 + $0x60] sm:$0xff]  ;;  %p2741_p11 = scmp.ne.s32.totalorder %s3823_s29, %s2740_s20  ;;  %p2747_p0 = scmp.lt.s32.totalorder %s3823_s29, %s2745_s1 }
 0x1eb   : > { %v3478_v28 = vpop.permute.xlu1 %1479  ;;  %v1089_v29 = vpop.permute.xlu0 %1088  ;;  %1180 = vst.msk [vmem:[#allocation2 + $0x20] sm:$0xff] %vm1166_vm4, %v3099_v63  ;;  %2604 = vmatprep.subr.bf16.mxu0 %v2811_v16  ;;  %v2614_v43 = vpack.c.bf16 %v1713_v40, %v1712_v39  ;;  %p2748_p1 = scmp.lt.s32.totalorder %s2746_s24, %s2740_s20 }
 0x1ec   : > { %1091 = vst.msk [vmem:[#allocation2 + $0x28] sm:$0xff] %vm1073_vm1, %v1089_v29  ;;  %p2742_p12 = pnand %p2741_p11, %p2935_p5 }
 0x1ed   : > { %1122 = vst.msk [vmem:[#allocation2 + $0x28] sm:$0xff] %vm1104_vm2, %v3241_v17  ;;  %p2749_p2 = por %p2748_p1, %p2747_p0 }
 0x1ee   : > { %1153 = vst.msk [vmem:[#allocation2 + $0x28] sm:$0xff] %vm1135_vm3, %v3370_v59  ;;  %2606 = vmatpush3.bf16.msra.mxu0 %v2605_v30  ;;  %p2743_p13 = pneg %p2742_p12 }
 0x1ef   : > { %v1488_v63 = vpop.permute.xlu1 %1487  ;;  %v3494_v32 = vpop.permute.xlu0 %1467  ;;  %2607 = vmatprep.subr.bf16.mxu0 %v2811_v16 }
 0x1f0   : > { %p2750_p3 = pnand %p2749_p2, %p2743_p13 }
 0x1f2   : > { %2609 = vmatpush3.bf16.msra.mxu0 %v2608_v33 }
 0x1f3   : > { %v3503_v36 = vpop.permute.xlu1 %1230  ;;  %v3505_v17 = vpop.permute.xlu0 %1475  ;;  %2610 = vmatprep.subr.bf16.mxu0 %v2811_v16 }
 0x1f6   : > { %2612 = vmatpush3.bf16.msra.mxu0 %v2611_v37 }
 0x1f7   : > { %v3514_v41 = vpop.permute.xlu1 %1234  ;;  %v3516_v42 = vpop.permute.xlu0 %1483  ;;  %2613 = vmatprep.subr.bf16.mxu0 %v2811_v16 }
 0x1fa   : > { %2615 = vmatpush3.bf16.msra.mxu0 %v2614_v43 }
 0x1fb   : > { %v1412_v46 = vpop.permute.xlu1 %1411  ;;  %v3525_v47 = vpop.permute.xlu0 %1492  ;;  %2616 = vmatprep.subr.bf16.mxu0 %v2811_v16 }
 0x1fc   : > { %1414 = vst.msk [vmem:[#allocation3 + $0x8] sm:$0xff] %vm1166_vm4, %v1412_v46 }
 0x1fe   : > { %2618 = vmatpush3.bf16.msra.mxu0 %v2617_v48 }
 0x1ff   : > { %v1420_v50 = vpop.permute.xlu1 %1419  ;;  %v3529_v51 = vpop.permute.xlu0 %1225 }
 0x200   : > { %1422 = vst.msk [vmem:[#allocation3 + $0x18] sm:$0xff] %vm1166_vm4, %v1420_v50 }
 0x203   : > { %v1429_v58 = vpop.permute.xlu1 %1428  ;;  %v3532_v59 = vpop.permute.xlu0 %1238 }
 0x204   : > { %1431 = vst.msk [vmem:[#allocation3 + $0x30] sm:$0xff] %vm1166_vm4, %v1429_v58 }
 0x207   : > { %v1164_v4 = vpop.permute.xlu1 %1163  ;;  %v3535_v6 = vpop.permute.xlu0 %1242 }
 0x208   : > { %1167 = vst.msk [vmem:[#allocation2] sm:$0xff] %vm1166_vm4, %v1164_v4 }
 0x20b   : > { %v1173_v7 = vpop.permute.xlu1 %1172  ;;  %v1247_v9 = vpop.permute.xlu0 %1246 }
 0x20c   : > { %1175 = vst.msk [vmem:[#allocation2 + $0x10] sm:$0xff] %vm1166_vm4, %v1173_v7 }
 0x20f   : > { %v1182_v11 = vpop.permute.xlu1 %1181  ;;  %v1408_v12 = vpop.permute.xlu0 %1407 }
 0x210   : > { %1184 = vst.msk [vmem:[#allocation2 + $0x28] sm:$0xff] %vm1166_vm4, %v1182_v11  ;;  %1410 = vst.msk [vmem:[#allocation3] sm:$0xff] %vm1166_vm4, %v1408_v12 }
 0x211   : > { %1215 = vst.msk [vmem:[#allocation2 + $0x28] sm:$0xff] %vm1197_vm6, %v3109_v3 }
 0x212   : > { %1249 = vst.msk [vmem:[#allocation2 + $0x28] sm:$0xff] %vm1228_vm7, %v1247_v9 }
 0x213   : > { %v1186_v13 = vpop.permute.xlu1 %1185  ;;  %v1416_v5 = vpop.permute.xlu0 %1415 }
 0x214   : > { %1188 = vst.msk [vmem:[#allocation2 + $0x30] sm:$0xff] %vm1166_vm4, %v1186_v13  ;;  %1418 = vst.msk [vmem:[#allocation3 + $0x10] sm:$0xff] %vm1166_vm4, %v1416_v5 }
 0x217   : > { %v1498_v14 = vpop.permute.xlu1 %1497  ;;  %v1425_v19 = vpop.permute.xlu0 %1424 }
 0x218   : > { %1427 = vst.msk [vmem:[#allocation3 + $0x28] sm:$0xff] %vm1166_vm4, %v1425_v19 }
 0x219   : > { %1457 = vst.msk [vmem:[#allocation3 + $0x28] sm:$0xff] %vm1197_vm6, %v3093_v60 }
 0x21a   : > { %1490 = vst.msk [vmem:[#allocation3 + $0x28] sm:$0xff] %vm1228_vm7, %v1488_v63 }
 0x21b   : > { %v1506_v18 = vpop.permute.xlu1 %1505  ;;  %v1433_v8 = vpop.permute.xlu0 %1432 }
 0x21c   : > { %1435 = vst.msk [vmem:[#allocation3 + $0x38] sm:$0xff] %vm1166_vm4, %v1433_v8 }
 0x21f   : > { %v1514_v3 = vpop.permute.xlu1 %1513  ;;  %v1169_v21 = vpop.permute.xlu0 %1168 }
 0x220   : > { %1171 = vst.msk [vmem:[#allocation2 + $0x8] sm:$0xff] %vm1166_vm4, %v1169_v21 }
 0x223   : > { %v3552_v22 = vpop.permute.xlu1 %1521  ;;  %v1177_v54 = vpop.permute.xlu0 %1176 }
 0x224   : > { %1179 = vst.msk [vmem:[#allocation2 + $0x18] sm:$0xff] %vm1166_vm4, %v1177_v54 }
 0x227   : > { %v3555_v23 = vpop.permute.xlu1 %1261  ;;  %v1502_v20 = vpop.permute.xlu0 %1501 }
 0x22b   : > { %v3557_v26 = vpop.permute.xlu1 %1265  ;;  %v3559_v60 = vpop.permute.xlu0 %1509 }
 0x22f   : > { %v3561_v10 = vpop.permute.xlu1 %1273  ;;  %v1518_v27 = vpop.permute.xlu0 %1517 }
 0x230   : > { %1520 = vst.msk [vmem:[#allocation3 + $0x28] sm:$0xff] %vm1259_vm8, %v1518_v27 }
 0x233   : > { %v1438_v29 = vpop.permute.xlu1 %1437  ;;  %v3564_v30 = vpop.permute.xlu0 %1256 }
 0x234   : > { %1440 = vst.msk [vmem:[#allocation3] sm:$0xff] %vm1197_vm6, %v1438_v29 }
 0x235   : > { %1470 = vst.msk [vmem:[#allocation3] sm:$0xff] %vm1228_vm7, %v3494_v32 }
 0x236   : > { %1500 = vst.msk [vmem:[#allocation3] sm:$0xff] %vm1259_vm8, %v1498_v14 }
 0x237   : > { %v1536_v31 = vld [vmem:[#allocation3 + $0x28] sm:$0x1]  ;;  %v1552_v15 = vld [vmem:[#allocation3 + $0x29] sm:$0x1]  ;;  %v1568_v63 = vld [vmem:[#allocation3 + $0x2a] sm:$0x1]  ;;  %v1446_v33 = vpop.permute.xlu1 %1445  ;;  %v3570_v34 = vpop.permute.xlu0 %1269 }
 0x238   : > { %1537 = vst [vmem:[#allocation4 + $0x5] sm:$0x1] %v1536_v31  ;;  %1553 = vst [vmem:[#allocation4 + $0xd] sm:$0x1] %v1552_v15  ;;  %v1584_v35 = vld [vmem:[#allocation3 + $0x2b] sm:$0x1] }
 0x239   : > { %1569 = vst [vmem:[#allocation4 + $0x15] sm:$0x1] %v1568_v63  ;;  %v1600_v37 = vld [vmem:[#allocation3 + $0x2c] sm:$0x1]  ;;  %v1616_v39 = vld [vmem:[#allocation3 + $0x2d] sm:$0x1] }
 0x23a   : > { %1448 = vst.msk [vmem:[#allocation3 + $0x10] sm:$0xff] %vm1197_vm6, %v1446_v33  ;;  %1585 = vst [vmem:[#allocation4 + $0x1d] sm:$0x1] %v1584_v35  ;;  %v1632_v32 = vld [vmem:[#allocation3 + $0x2e] sm:$0x1] }
 0x23b   : > { %1601 = vst [vmem:[#allocation4 + $0x25] sm:$0x1] %v1600_v37  ;;  %1617 = vst [vmem:[#allocation4 + $0x2d] sm:$0x1] %v1616_v39  ;;  %v1648_v40 = vld [vmem:[#allocation3 + $0x2f] sm:$0x1]  ;;  %v1454_v43 = vpop.permute.xlu1 %1453  ;;  %v1442_v44 = vpop.permute.xlu0 %1441 }
 0x23c   : > { %1478 = vst.msk [vmem:[#allocation3 + $0x10] sm:$0xff] %vm1228_vm7, %v3505_v17  ;;  %1633 = vst [vmem:[#allocation4 + $0x35] sm:$0x1] %v1632_v32 }
 0x23d   : > { %1649 = vst [vmem:[#allocation4 + $0x3d] sm:$0x1] %v1648_v40  ;;  %1508 = vst.msk [vmem:[#allocation3 + $0x10] sm:$0xff] %vm1259_vm8, %v1506_v18  ;;  %v1622_v45 = vld [vmem:[#allocation3 + $0x6] sm:$0x1] }
 0x23e   : > { %1456 = vst.msk [vmem:[#allocation3 + $0x20] sm:$0xff] %vm1197_vm6, %v1454_v43  ;;  %1444 = vst.msk [vmem:[#allocation3 + $0x8] sm:$0xff] %vm1197_vm6, %v1442_v44  ;;  %v1638_v46 = vld [vmem:[#allocation3 + $0x7] sm:$0x1]  ;;  %v1558_v48 = vld [vmem:[#allocation3 + $0x2] sm:$0x1] }
 0x23f   : > { %1486 = vst.msk [vmem:[#allocation3 + $0x20] sm:$0xff] %vm1228_vm7, %v3516_v42  ;;  %1474 = vst.msk [vmem:[#allocation3 + $0x8] sm:$0xff] %vm1228_vm7, %v3464_v25  ;;  %v1526_v17 = vld [vmem:[#allocation3] sm:$0x1]  ;;  %v1574_v50 = vld [vmem:[#allocation3 + $0x3] sm:$0x1]  ;;  %v1463_v4 = vpop.permute.xlu1 %1462  ;;  %v1450_v7 = vpop.permute.xlu0 %1449 }
 0x240   : > { %1623 = vst [vmem:[#allocation4 + $0x30] sm:$0x1] %v1622_v45  ;;  %1639 = vst [vmem:[#allocation4 + $0x38] sm:$0x1] %v1638_v46  ;;  %v1542_v58 = vld [vmem:[#allocation3 + $0x1] sm:$0x1] }
 0x241   : > { %1516 = vst.msk [vmem:[#allocation3 + $0x20] sm:$0xff] %vm1259_vm8, %v1514_v3  ;;  %1504 = vst.msk [vmem:[#allocation3 + $0x8] sm:$0xff] %vm1259_vm8, %v1502_v20  ;;  %v1590_v42 = vld [vmem:[#allocation3 + $0x4] sm:$0x1]  ;;  %v1606_v9 = vld [vmem:[#allocation3 + $0x5] sm:$0x1] }
 0x242   : > { %1559 = vst [vmem:[#allocation4 + $0x10] sm:$0x1] %v1558_v48  ;;  %1527 = vst [vmem:[#allocation4] sm:$0x1] %v1526_v17 }
 0x243   : > { %1575 = vst [vmem:[#allocation4 + $0x18] sm:$0x1] %v1574_v50  ;;  %1543 = vst [vmem:[#allocation4 + $0x8] sm:$0x1] %v1542_v58  ;;  %v1278_v19 = vpop.permute.xlu1 %1277  ;;  %v1459_v18 = vpop.permute.xlu0 %1458 }
 0x244   : > { %1465 = vst.msk [vmem:[#allocation3 + $0x38] sm:$0xff] %vm1197_vm6, %v1463_v4  ;;  %1452 = vst.msk [vmem:[#allocation3 + $0x18] sm:$0xff] %vm1197_vm6, %v1450_v7  ;;  %v1626_v25 = vld [vmem:[#allocation3 + $0x16] sm:$0x1]  ;;  %v1642_v11 = vld [vmem:[#allocation3 + $0x17] sm:$0x1] }
 0x245   : > { %1591 = vst [vmem:[#allocation4 + $0x20] sm:$0x1] %v1590_v42  ;;  %1607 = vst [vmem:[#allocation4 + $0x28] sm:$0x1] %v1606_v9  ;;  %v1562_v12 = vld [vmem:[#allocation3 + $0x12] sm:$0x1] }
 0x246   : > { %1495 = vst.msk [vmem:[#allocation3 + $0x38] sm:$0xff] %vm1228_vm7, %v3525_v47  ;;  %1482 = vst.msk [vmem:[#allocation3 + $0x18] sm:$0xff] %vm1228_vm7, %v3478_v28  ;;  %v1530_v13 = vld [vmem:[#allocation3 + $0x10] sm:$0x1]  ;;  %v1578_v5 = vld [vmem:[#allocation3 + $0x13] sm:$0x1] }
 0x247   : > { %1627 = vst [vmem:[#allocation4 + $0x32] sm:$0x1] %v1626_v25  ;;  %1643 = vst [vmem:[#allocation4 + $0x3a] sm:$0x1] %v1642_v11  ;;  %v1546_v14 = vld [vmem:[#allocation3 + $0x11] sm:$0x1]  ;;  %v1190_v27 = vpop.permute.xlu0 %1189 }
 0x248   : > { %1525 = vst.msk [vmem:[#allocation3 + $0x38] sm:$0xff] %vm1259_vm8, %v3090_v57  ;;  %1512 = vst.msk [vmem:[#allocation3 + $0x18] sm:$0xff] %vm1259_vm8, %v3559_v60  ;;  %v1594_v47 = vld [vmem:[#allocation3 + $0x14] sm:$0x1]  ;;  %v1610_v28 = vld [vmem:[#allocation3 + $0x15] sm:$0x1]  ;;  %v1195_v60 = vpop.permute.xlu1 %1194 }
 0x249   : > { %1563 = vst [vmem:[#allocation4 + $0x12] sm:$0x1] %v1562_v12  ;;  %1531 = vst [vmem:[#allocation4 + $0x2] sm:$0x1] %v1530_v13  ;;  %v1630_v57 = vld [vmem:[#allocation3 + $0x26] sm:$0x1] }
 0x24a   : > { %1579 = vst [vmem:[#allocation4 + $0x1a] sm:$0x1] %v1578_v5  ;;  %1547 = vst [vmem:[#allocation4 + $0xa] sm:$0x1] %v1546_v14  ;;  %v1646_v8 = vld [vmem:[#allocation3 + $0x27] sm:$0x1] }
 0x24b   : > { %1280 = vst.msk [vmem:[#allocation2 + $0x28] sm:$0xff] %vm1259_vm8, %v1278_v19  ;;  %1595 = vst [vmem:[#allocation4 + $0x22] sm:$0x1] %v1594_v47  ;;  %v1624_v3 = vld [vmem:[#allocation3 + $0xe] sm:$0x1]  ;;  %v1200_v44 = vpop.permute.xlu0 %1199 }
 0x24c   : > { %1461 = vst.msk [vmem:[#allocation3 + $0x30] sm:$0xff] %vm1197_vm6, %v1459_v18  ;;  %1611 = vst [vmem:[#allocation4 + $0x2a] sm:$0x1] %v1610_v28  ;;  %v1640_v21 = vld [vmem:[#allocation3 + $0xf] sm:$0x1]  ;;  %v1204_v43 = vpop.permute.xlu1 %1203 }
 0x24d   : > { %1491 = vst.msk [vmem:[#allocation3 + $0x30] sm:$0xff] %vm1228_vm7, %v3077_v52  ;;  %1631 = vst [vmem:[#allocation4 + $0x34] sm:$0x1] %v1630_v57  ;;  %v1560_v54 = vld [vmem:[#allocation3 + $0xa] sm:$0x1] }
 0x24e   : > { %1647 = vst [vmem:[#allocation4 + $0x3c] sm:$0x1] %v1646_v8  ;;  %1625 = vst [vmem:[#allocation4 + $0x31] sm:$0x1] %v1624_v3  ;;  %v1566_v20 = vld [vmem:[#allocation3 + $0x22] sm:$0x1] }
 0x24f   : > { %1524 = vst.msk [vmem:[#allocation3 + $0x30] sm:$0xff] %vm1259_vm8, %v3552_v22  ;;  %1641 = vst [vmem:[#allocation4 + $0x39] sm:$0x1] %v1640_v21  ;;  %v1528_v29 = vld [vmem:[#allocation3 + $0x8] sm:$0x1]  ;;  %v1208_v25 = vpop.permute.xlu0 %1207 }
 0x250   : > { %1561 = vst [vmem:[#allocation4 + $0x11] sm:$0x1] %v1560_v54  ;;  %1567 = vst [vmem:[#allocation4 + $0x14] sm:$0x1] %v1566_v20  ;;  %v1534_v31 = vld [vmem:[#allocation3 + $0x20] sm:$0x1] }
 0x251   : > { %v1576_v15 = vld [vmem:[#allocation3 + $0xb] sm:$0x1]  ;;  %1198 = vst.msk [vmem:[#allocation2] sm:$0xff] %vm1197_vm6, %v1195_v60  ;;  %1529 = vst [vmem:[#allocation4 + $0x1] sm:$0x1] %v1528_v29 }
 0x252   : > { %1192 = vst.msk [vmem:[#allocation2 + $0x38] sm:$0xff] %vm1166_vm4, %v1190_v27  ;;  %1535 = vst [vmem:[#allocation4 + $0x4] sm:$0x1] %v1534_v31  ;;  %v1582_v52 = vld [vmem:[#allocation3 + $0x23] sm:$0x1] }
 0x253   : > { %1577 = vst [vmem:[#allocation4 + $0x19] sm:$0x1] %v1576_v15  ;;  %v1544_v63 = vld [vmem:[#allocation3 + $0x9] sm:$0x1]  ;;  %v1550_v22 = vld [vmem:[#allocation3 + $0x21] sm:$0x1]  ;;  %v1217_v47 = vpop.permute.xlu0 %1216 }
 0x254   : > { %v1636_v33 = vld [vmem:[#allocation3 + $0x3e] sm:$0x1]  ;;  %v1652_v35 = vld [vmem:[#allocation3 + $0x3f] sm:$0x1]  ;;  %1229 = vst.msk [vmem:[#allocation2] sm:$0xff] %vm1228_vm7, %v3529_v51 }
 0x255   : > { %v1628_v37 = vld [vmem:[#allocation3 + $0x1e] sm:$0x1]  ;;  %1583 = vst [vmem:[#allocation4 + $0x1c] sm:$0x1] %v1582_v52  ;;  %1545 = vst [vmem:[#allocation4 + $0x9] sm:$0x1] %v1544_v63 }
 0x256   : > { %1551 = vst [vmem:[#allocation4 + $0xc] sm:$0x1] %v1550_v22  ;;  %1637 = vst [vmem:[#allocation4 + $0x37] sm:$0x1] %v1636_v33  ;;  %v1644_v39 = vld [vmem:[#allocation3 + $0x1f] sm:$0x1] }
 0x257   : > { %1653 = vst [vmem:[#allocation4 + $0x3f] sm:$0x1] %v1652_v35  ;;  %1629 = vst [vmem:[#allocation4 + $0x33] sm:$0x1] %v1628_v37  ;;  %v1564_v32 = vld [vmem:[#allocation3 + $0x1a] sm:$0x1]  ;;  %v1282_v27 = vpop.permute.xlu0 %1281 }
 0x258   : > { %1260 = vst.msk [vmem:[#allocation2] sm:$0xff] %vm1259_vm8, %v3564_v30  ;;  %v1572_v40 = vld [vmem:[#allocation3 + $0x3a] sm:$0x1]  ;;  %1645 = vst [vmem:[#allocation4 + $0x3b] sm:$0x1] %v1644_v39 }
 0x259   : > { %1565 = vst [vmem:[#allocation4 + $0x13] sm:$0x1] %v1564_v32  ;;  %1573 = vst [vmem:[#allocation4 + $0x17] sm:$0x1] %v1572_v40  ;;  %v1532_v45 = vld [vmem:[#allocation3 + $0x18] sm:$0x1] }
 0x25a   : > { %v1540_v46 = vld [vmem:[#allocation3 + $0x38] sm:$0x1]  ;;  %v1580_v51 = vld [vmem:[#allocation3 + $0x1b] sm:$0x1]  ;;  %1206 = vst.msk [vmem:[#allocation2 + $0x10] sm:$0xff] %vm1197_vm6, %v1204_v43  ;;  %1202 = vst.msk [vmem:[#allocation2 + $0x8] sm:$0xff] %vm1197_vm6, %v1200_v44 }
 0x25b   : > { %1533 = vst [vmem:[#allocation4 + $0x3] sm:$0x1] %v1532_v45  ;;  %1541 = vst [vmem:[#allocation4 + $0x7] sm:$0x1] %v1540_v46  ;;  %v1588_v48 = vld [vmem:[#allocation3 + $0x3b] sm:$0x1] }
 0x25c   : > { %1581 = vst [vmem:[#allocation4 + $0x1b] sm:$0x1] %v1580_v51  ;;  %v1548_v17 = vld [vmem:[#allocation3 + $0x19] sm:$0x1]  ;;  %v1634_v50 = vld [vmem:[#allocation3 + $0x36] sm:$0x1] }
 0x25d   : > { %v1556_v30 = vld [vmem:[#allocation3 + $0x39] sm:$0x1]  ;;  %v1650_v58 = vld [vmem:[#allocation3 + $0x37] sm:$0x1]  ;;  %1237 = vst.msk [vmem:[#allocation2 + $0x10] sm:$0xff] %vm1228_vm7, %v3514_v41  ;;  %1233 = vst.msk [vmem:[#allocation2 + $0x8] sm:$0xff] %vm1228_vm7, %v3503_v36  ;;  %v1212_v41 = vpop.permute.xlu1 %1211 }
 0x25e   : > { %v1570_v4 = vld [vmem:[#allocation3 + $0x32] sm:$0x1]  ;;  %1589 = vst [vmem:[#allocation4 + $0x1f] sm:$0x1] %v1588_v48  ;;  %1549 = vst [vmem:[#allocation4 + $0xb] sm:$0x1] %v1548_v17 }
 0x25f   : > { %1557 = vst [vmem:[#allocation4 + $0xf] sm:$0x1] %v1556_v30  ;;  %1635 = vst [vmem:[#allocation4 + $0x36] sm:$0x1] %v1634_v50  ;;  %v1538_v7 = vld [vmem:[#allocation3 + $0x30] sm:$0x1] }
 0x260   : > { %1651 = vst [vmem:[#allocation4 + $0x3e] sm:$0x1] %v1650_v58  ;;  %1268 = vst.msk [vmem:[#allocation2 + $0x10] sm:$0xff] %vm1259_vm8, %v3557_v26  ;;  %v1586_v42 = vld [vmem:[#allocation3 + $0x33] sm:$0x1]  ;;  %v3642_v8 = vld [vmem:[#allocation2] sm:$0xff] }
 0x261   : > { %1264 = vst.msk [vmem:[#allocation2 + $0x8] sm:$0xff] %vm1259_vm8, %v3555_v23  ;;  %1571 = vst [vmem:[#allocation4 + $0x16] sm:$0x1] %v1570_v4  ;;  %v1554_v9 = vld [vmem:[#allocation3 + $0x31] sm:$0x1] }
 0x262   : > { %1539 = vst [vmem:[#allocation4 + $0x6] sm:$0x1] %v1538_v7  ;;  %1587 = vst [vmem:[#allocation4 + $0x1e] sm:$0x1] %v1586_v42  ;;  %v1592_v36 = vld [vmem:[#allocation3 + $0xc] sm:$0x1] }
 0x263   : > { %1555 = vst [vmem:[#allocation4 + $0xe] sm:$0x1] %v1554_v9  ;;  %v1596_v11 = vld [vmem:[#allocation3 + $0x1c] sm:$0x1]  ;;  %v1598_v12 = vld [vmem:[#allocation3 + $0x24] sm:$0x1] }
 0x264   : > { %1214 = vst.msk [vmem:[#allocation2 + $0x20] sm:$0xff] %vm1197_vm6, %v1212_v41  ;;  %1210 = vst.msk [vmem:[#allocation2 + $0x18] sm:$0xff] %vm1197_vm6, %v1208_v25  ;;  %v1602_v23 = vld [vmem:[#allocation3 + $0x34] sm:$0x1]  ;;  %v1604_v26 = vld [vmem:[#allocation3 + $0x3c] sm:$0x1] }
 0x265   : > { %1593 = vst [vmem:[#allocation4 + $0x21] sm:$0x1] %v1592_v36  ;;  %1597 = vst [vmem:[#allocation4 + $0x23] sm:$0x1] %v1596_v11  ;;  %v1608_v13 = vld [vmem:[#allocation3 + $0xd] sm:$0x1] }
 0x266   : > { %1599 = vst [vmem:[#allocation4 + $0x24] sm:$0x1] %v1598_v12  ;;  %1245 = vst.msk [vmem:[#allocation2 + $0x20] sm:$0xff] %vm1228_vm7, %v3535_v6  ;;  %v1612_v5 = vld [vmem:[#allocation3 + $0x1d] sm:$0x1] }
 0x267   : > { %1241 = vst.msk [vmem:[#allocation2 + $0x18] sm:$0xff] %vm1228_vm7, %v3532_v59  ;;  %1603 = vst [vmem:[#allocation4 + $0x26] sm:$0x1] %v1602_v23  ;;  %v1614_v14 = vld [vmem:[#allocation3 + $0x25] sm:$0x1]  ;;  %v1221_v59 = vpop.permute.xlu1 %1220  ;;  %v3705_v50 = vld [vmem:[#allocation4 + $0x38] sm:$0xff] }
 0x268   : > { %1605 = vst [vmem:[#allocation4 + $0x27] sm:$0x1] %v1604_v26  ;;  %1609 = vst [vmem:[#allocation4 + $0x29] sm:$0x1] %v1608_v13  ;;  %v1618_v19 = vld [vmem:[#allocation3 + $0x35] sm:$0x1] }
 0x269   : > { %1276 = vst.msk [vmem:[#allocation2 + $0x20] sm:$0xff] %vm1259_vm8, %v3561_v10  ;;  %1272 = vst.msk [vmem:[#allocation2 + $0x18] sm:$0xff] %vm1259_vm8, %v3570_v34  ;;  %v1620_v18 = vld [vmem:[#allocation3 + $0x3d] sm:$0x1]  ;;  %v2349_v6 = vld [vmem:[%s3876_s8] ss:$0 sm:$0xff] }
 0x26a   : > { %1613 = vst [vmem:[#allocation4 + $0x2b] sm:$0x1] %v1612_v5  ;;  %1615 = vst [vmem:[#allocation4 + $0x2c] sm:$0x1] %v1614_v14  ;;  %v3631_v10 = vld [vmem:[#allocation2 + $0x10] sm:$0xff]  ;;  %v3635_v34 = vld [vmem:[#allocation2 + $0x8] sm:$0xff]  ;;  %v3640_v57 = vadd.f32 %v2349_v6, %v3365_v53  ;;  %v3653_v60 = vadd.f32 %v2349_v6, %v3373_v62  ;;  %v3660_v29 = vadd.f32 %v3356_v49, %v2349_v6 }
 0x26b   : > { %1619 = vst [vmem:[#allocation4 + $0x2e] sm:$0x1] %v1618_v19  ;;  %1621 = vst [vmem:[#allocation4 + $0x2f] sm:$0x1] %v1620_v18  ;;  %v3633_v28 = vld [vmem:[#allocation4 + $0x10] sm:$0xff]  ;;  %v3644_v3 = vld [vmem:[#allocation4] sm:$0xff]  ;;  %v1252_v53 = vpop.permute.xlu1 %1251  ;;  %v3673_v22 = vadd.f32 %v3368_v55, %v2349_v6  ;;  %v3683_v32 = vadd.f32 %v2349_v6, %v3384_v2  ;;  %v3691_v44 = vadd.f32 %v2349_v6, %v3412_v38 }
 0x26c   : > { %1223 = vst.msk [vmem:[#allocation2 + $0x38] sm:$0xff] %vm1197_vm6, %v1221_v59  ;;  %1219 = vst.msk [vmem:[#allocation2 + $0x30] sm:$0xff] %vm1197_vm6, %v1217_v47  ;;  %v3646_v21 = vld [vmem:[#allocation4 + $0x8] sm:$0xff]  ;;  %v1672_v54 = vadd.f32 %v3633_v28, %v3631_v10  ;;  %v1670_v20 = vadd.f32 %v3644_v3, %v3642_v8  ;;  %v3665_v52 = vld [vmem:[#allocation4 + $0x18] sm:$0xff]  ;;  %v3701_v17 = vadd.f32 %v3381_v0, %v2349_v6 }
 0x26d   : > { %1250 = vst.msk [vmem:[#allocation2 + $0x30] sm:$0xff] %vm1228_vm7, %v3096_v61  ;;  %v1671_v61 = vadd.f32 %v3646_v21, %v3635_v34  ;;  %1254 = vst.msk [vmem:[#allocation2 + $0x38] sm:$0xff] %vm1228_vm7, %v1252_v53  ;;  %v3688_v55 = vld [vmem:[#allocation2 + $0x28] sm:$0xff]  ;;  %v3698_v2 = vld [vmem:[#allocation4 + $0x30] sm:$0xff]  ;;  %v3710_v4 = vadd.f32 %v3408_v56, %v2349_v6 }
 0x26e   : > { %1284 = vst.msk [vmem:[#allocation2 + $0x30] sm:$0xff] %vm1259_vm8, %v1282_v27  ;;  %v1678_v31 = vadd.f32 %v1670_v20, %v3640_v57  ;;  %1285 = vst.msk [vmem:[#allocation2 + $0x38] sm:$0xff] %vm1259_vm8, %v3102_v1  ;;  %v1680_v37 = vadd.f32 %v1672_v54, %v3660_v29  ;;  %v1822_v14 = vld [vmem:[%s3879_s11 + $0x8] sm:$0xff]  ;;  %v1825_v19 = vld [vmem:[%s3879_s11 + $0x20] sm:$0xff] }
 0x26f   : > { %v1679_v62 = vadd.f32 %v1671_v61, %v3653_v60  ;;  %v3677_v33 = vld [vmem:[#allocation4 + $0x20] sm:$0xff]  ;;  %v2619_v6 = vpack.c.bf16 %v1825_v19, %v1822_v14  ;;  %v1824_v59 = vld [vmem:[%s3879_s11 + $0x18] sm:$0xff]  ;;  %v1831_v54 = vld [vmem:[%s3879_s11 + $0x50] sm:$0xff] }
 0x270   : > { %v3663_v15 = vld [vmem:[#allocation2 + $0x18] sm:$0xff]  ;;  %v3668_v63 = vld [vmem:[#allocation2 + $0x20] sm:$0xff]  ;;  %v1827_v53 = vld [vmem:[%s3879_s11 + $0x30] sm:$0xff] }
 0x271   : > { %v1673_v49 = vadd.f32 %v3665_v52, %v3663_v15  ;;  %v1686_v39 = vadd.f32 %v1679_v62, %v1678_v31  ;;  %v1674_v40 = vadd.f32 %v3677_v33, %v3668_v63  ;;  %v1821_v18 = vld [vmem:[%s3879_s11] sm:$0xff]  ;;  %v1828_v47 = vld [vmem:[%s3879_s11 + $0x38] sm:$0xff]  ;;  %v1830_v27 = vld [vmem:[%s3879_s11 + $0x48] sm:$0xff]  ;;  %2620 = vmatprep.subr.bf16.mxu1 %v2619_v6 }
 0x272   : > { %v3679_v35 = vld [vmem:[#allocation4 + $0x28] sm:$0xff]  ;;  %v2621_v20 = vpack.c.bf16 %v1824_v59, %v1821_v18  ;;  %v2623_v61 = vpack.c.bf16 %v1831_v54, %v1828_v47  ;;  %v2625_v31 = vpack.c.bf16 %v1830_v27, %v1827_v53  ;;  %v2362_v62 = vld [vmem:[%s3878_s10] ss:$0 sm:$0xff] }
 0x273   : > { %v1681_v1 = vadd.f32 %v1673_v49, %v3673_v22  ;;  %v1687_v43 = vadd.f32 %v1686_v39, %v1680_v37  ;;  %v1675_v45 = vadd.f32 %v3679_v35, %v3688_v55  ;;  %v1682_v46 = vadd.f32 %v1674_v40, %v3683_v32  ;;  %v1826_v14 = vld [vmem:[%s3879_s11 + $0x28] sm:$0xff]  ;;  %v1829_v54 = vld [vmem:[%s3879_s11 + $0x40] sm:$0xff] }
 0x274   : > { %2622 = vmatpush1.bf16.msra.mxu1 %v2621_v20  ;;  %v1832_v20 = vld [vmem:[%s3879_s11 + $0x58] sm:$0xff]  ;;  %v2720_v53 = vld [vmem:[%s3881_s13] sm:$0xff]   ;;  %v2721_v27 = vld [vmem:[%s3881_s13 + $0x8] sm:$0xff]  }
 0x275   : > { %v1688_v51 = vadd.f32 %v1687_v43, %v1681_v1  ;;  %v3696_v48 = vld [vmem:[#allocation2 + $0x30] sm:$0xff]  ;;  %v3703_v30 = vld [vmem:[#allocation2 + $0x38] sm:$0xff]  ;;  %v1683_v7 = vadd.f32 %v1675_v45, %v3691_v44  ;;  %2624 = vmatprep.subr.bf16.mxu1 %v2623_v61  ;;  %v2631_v61 = vpack.c.bf16 %v1832_v20, %v1829_v54 }
 0x276   : > { %v1676_v38 = vadd.f32 %v3698_v2, %v3696_v48  ;;  %v1677_v42 = vadd.f32 %v3705_v50, %v3703_v30 }
 0x277   : > { %v1689_v58 = vadd.f32 %v1688_v51, %v1682_v46 }
 0x278   : > { %v1684_v9 = vadd.f32 %v1676_v38, %v3701_v17  ;;  %v1685_v41 = vadd.f32 %v1677_v42, %v3710_v4  ;;  %2626 = vmatpush1.bf16.msra.mxu1 %v2625_v31  ;;  %v2724_v31 = vld [vmem:[%s3881_s13 + $0x20] sm:$0xff]  }
 0x279   : > { %v1690_v0 = vadd.f32 %v1689_v58, %v1683_v7  ;;  %2627 = vmatprep.subr.bf16.mxu1 %v2811_v16 }
 0x27b   : > { %v1691_v25 = vadd.f32 %v1690_v0, %v1684_v9 }
 0x27d   : > { %v1692_v36 = vadd.f32 %v1691_v25, %v1685_v41 }
 0x27f   : > { %v1693_v11 = vrot.slane %v1692_v36, 4 }
 0x281   : > { %v1694_v12 = vadd.f32 %v1693_v11, %v1692_v36 }
 0x283   : > { %v1695_v23 = vrot.slane %v1694_v12, 2 }
 0x285   : > { %v1696_v26 = vadd.f32 %v1695_v23, %v1694_v12 }
 0x287   : > { %v1697_v13 = vrot.slane %v1696_v26, 1 }
 0x289   : > { %v1698_v5 = vadd.f32 %v1697_v13, %v1696_v26 }
 0x28b   : > { %v1699_v56 = vmul.f32 0.015625, %v1698_v5 }
 0x28d   : > { %2558 = vmatmul.mubr.f32.vlgmr.msra.gmra.mrb[16].mxu0 %v1699_v56  ;;  %v1823_v56 = vld [vmem:[%s3879_s11 + $0x10] sm:$0xff] }
 0x28e   : > { %v2628_v59 = vpack.c.bf16 %v1826_v14, %v1823_v56 }
 0x360   : > { %v1789_v49 = vpop.f32.mrb[16].mxu0 }
 0x361   : > { %v1790_v37 = vadd.f32 %v2362_v62, %v1789_v49  ;;  %v2559_v39 = vpop.f32.mrb[17].mxu0  ;;  %v2725_v62 = vld [vmem:[%s3881_s13 + $0x28] sm:$0xff]   ;;  %v2726_v49 = vld [vmem:[%s3881_s13 + $0x30] sm:$0xff]  }
 0x362   : > { %v1835_v39 = vlaneseq }
 0x363   : > { %v1795_v40 = vmul.f32 0.70710677, %v1790_v37  ;;  %v1793_v18 = vmul.f32 0.5, %v1790_v37  ;;  %v2727_v37 = vld [vmem:[%s3881_s13 + $0x38] sm:$0xff]  }
 0x365   : > { %v1796_v1 = vand.u32 2147483647, %v1795_v40  ;;  %vm1816_vm9 = vcmp.ge.f32.partialorder %v1795_v40, 0.0  ;;  %v1836_v40 = vshrl.u32 %v1835_v39, 7 }
 0x367   : > { %v1797_v43 = vmul.f32 0.3275911, %v1796_v1  ;;  %v1810_v46 = vsub.f32 0.0, %v1796_v1 }
 0x369   : > { %v1798_v45 = vadd.f32 1.0, %v1797_v43  ;;  %v1811_v38 = vmul.f32 %v1810_v46, %v1796_v1  ;;  %v1837_v1 = vsub.s32 0, %v1836_v40  ;;  %v1833_v43 = vld [vmem:[%s3880_s12] sm:$0x7] }
 0x36b   : > { %2728 = vrcp.f32 %v1798_v45  ;;  %v1812_v42 = vmul.f32 1.442695, %v1811_v38  ;;  %v1841_v45 = vsub.s32 1, %v1836_v40  ;;  %v1838_v46 = vrot.slane %v1833_v43, %v1837_v1 }
 0x36d   : > { %2730 = vpow2.f32 %v1812_v42  ;;  %v1845_v42 = vsub.s32 2, %v1836_v40 }
 0x375   : > { %v2729_v51 = vpop.eup %2728 }
 0x376   : > { %v1801_v58 = vmul.f32 1.0614054, %v2729_v51 }
 0x377   : > { %v2731_v23 = vpop.eup %2730 }
 0x378   : > { %v1802_v7 = vadd.f32 -1.4531521, %v1801_v58 }
 0x37a   : > { %v1803_v9 = vmul.f32 %v2729_v51, %v1802_v7 }
 0x37c   : > { %v1804_v0 = vadd.f32 1.4214138, %v1803_v9 }
 0x37e   : > { %v1805_v41 = vmul.f32 %v2729_v51, %v1804_v0 }
 0x380   : > { %v1806_v25 = vadd.f32 -0.28449672, %v1805_v41  ;;  %v1846_v41 = vrot.slane %v1833_v43, %v1845_v42 }
 0x382   : > { %v1807_v36 = vmul.f32 %v2729_v51, %v1806_v25 }
 0x384   : > { %v1808_v11 = vadd.f32 0.2548296, %v1807_v36 }
 0x386   : > { %v1809_v12 = vmul.f32 %v2729_v51, %v1808_v11  ;;  %v1842_v51 = vrot.slane %v1833_v43, %v1841_v45 }
 0x388   : > { %v1814_v26 = vmul.f32 %v2731_v23, %v1809_v12 }
 0x38a   : > { %v1815_v13 = vsub.f32 1.0, %v1814_v26 }
 0x38c   : > { %v1817_v5 = vsub.f32 0.0, %v1815_v13 }
 0x38e   : > { %v1818_v19 = vsel %vm1816_vm9, %v1815_v13, %v1817_v5 }
 0x38f   : > { %v1819_v6 = vadd.f32 1.0, %v1818_v19 }
 0x391   : > { %v1820_v47 = vmul.f32 %v1819_v6, %v1793_v18 }
 0x393   : > { %2363 = vmatmul.mubr.msk.f32.vlgmr.msra.gmra.mrb[8].mxu1 %vm1850_vm10, %v1820_v47 }
 0x394   : > { %2629 = vmatpush3.bf16.msra.mxu1 %v2628_v59  ;;  %2568 = vmatprep.mubr.msk.f32.mxu1 %vm2812_vm5, %v2813_v24  ;;  %v2722_v24 = vld [vmem:[%s3881_s13 + $0x10] sm:$0xff]  }
 0x395   : > { %2630 = vmatprep.subr.bf16.mxu1 %v2811_v16  ;;  %v2723_v16 = vld [vmem:[%s3881_s13 + $0x18] sm:$0xff]  }
 0x398   : > { %2632 = vmatpush3.bf16.msra.mxu1 %v2631_v61 }
 0x399   : > { %2571 = vmatprep.subr.bf16.mxu1 %v2720_v53 }
 0x39b   : > { %2569 = vmatmul.mubr.msk.f32.vlgmr.msra.gmra.mrb[10].mxu1 %vm1850_vm10, %v1820_v47 }
 0x39c   : > { %2572 = vmatpush3.bf16.msra.mxu1 %v2720_v53 }
 0x39d   : > { %2573 = vmatprep.subr.bf16.mxu1 %v2721_v27 }
 0x3a0   : > { %2574 = vmatpush3.bf16.msra.mxu1 %v2721_v27 }
 0x3a1   : > { %2575 = vmatprep.subr.bf16.mxu1 %v2722_v24 }
 0x3a4   : > { %2576 = vmatpush3.bf16.msra.mxu1 %v2722_v24 }
 0x3a5   : > { %2577 = vmatprep.subr.bf16.mxu1 %v2723_v16 }
 0x3a8   : > { %2578 = vmatpush3.bf16.msra.mxu1 %v2723_v16 }
 0x3a9   : > { %2579 = vmatprep.subr.bf16.mxu1 %v2724_v31 }
 0x3ac   : > { %2580 = vmatpush3.bf16.msra.mxu1 %v2724_v31 }
 0x3ad   : > { %2581 = vmatprep.subr.bf16.mxu1 %v2725_v62 }
 0x3b0   : > { %2582 = vmatpush3.bf16.msra.mxu1 %v2725_v62 }
 0x3b1   : > { %2583 = vmatprep.subr.bf16.mxu1 %v2726_v49 }
 0x3b4   : > { %2584 = vmatpush3.bf16.msra.mxu1 %v2726_v49 }
 0x3b5   : > { %2585 = vmatprep.subr.bf16.mxu1 %v2727_v37 }
 0x3b8   : > { %2586 = vmatpush3.bf16.msra.mxu1 %v2727_v37 }
 0x466   : > { %v1920_v38 = vpop.f32.mrb[8].mxu1 }
 0x467   : > { %v1921_v58 = vadd.f32 %v1920_v38, %v1838_v46  ;;  %v1922_v7 = vpop.f32.mrb[9].mxu1 }
 0x468   : > { %v1923_v9 = vadd.f32 %v1922_v7, %v1842_v51 }
 0x46a   : > { %v1995_v0 = vmax.f32 %v1921_v58, %v1923_v9 }
 0x46e   : > { %v1991_v25 = vpop.f32.mrb[10].mxu1 }
 0x46f   : > { %v1992_v36 = vadd.f32 %v1991_v25, %v1846_v41  ;;  %v2570_v11 = vpop.f32.mrb[11].mxu1 }
 0x471   : > { %v1996_v12 = vmax.f32 %v1995_v0, %v1992_v36 }
 0x473   : > { %v1997_v23 = vsub.f32 %v1921_v58, %v1996_v12  ;;  %v2000_v26 = vsub.f32 %v1923_v9, %v1996_v12  ;;  %v2003_v13 = vsub.f32 %v1992_v36, %v1996_v12 }
 0x475   : > { %v1998_v5 = vmul.f32 1.442695, %v1997_v23  ;;  %v2001_v56 = vmul.f32 1.442695, %v2000_v26  ;;  %v2004_v14 = vmul.f32 1.442695, %v2003_v13 }
 0x477   : > { %2732 = vpow2.f32 %v1998_v5 }
 0x478   : > { %2734 = vpow2.f32 %v2001_v56 }
 0x479   : > { %2736 = vpow2.f32 %v2004_v14 }
 0x481   : > { %v2733_v19 = vpop.eup %2732 }
 0x482   : > { %v2735_v18 = vpop.eup %2734 }
 0x483   : > { %v2006_v6 = vadd.f32 %v2735_v18, %v2733_v19  ;;  %v2737_v59 = vpop.eup %2736 }
 0x485   : > { %v2007_v47 = vadd.f32 %v2737_v59, %v2006_v6 }
 0x487   : > { %2738 = vrcp.f32 %v2007_v47 }
 0x491   : > { %v2739_v54 = vpop.eup %2738 }
 0x492   : > { %v2009_v20 = vmul.f32 %v2739_v54, %v2733_v19  ;;  %v2010_v61 = vmul.f32 %v2739_v54, %v2735_v18  ;;  %v2011_v53 = vmul.f32 %v2739_v54, %v2737_v59 }
 0x494   : > { %v2015_v27 = vrot.slane %v2009_v20, %v1837_v1  ;;  %v2027_v24 = vrot.slane %v2010_v61, %v1837_v1  ;;  %v2047_v16 = vrot.slane %v2011_v53, %v1837_v1 }
 0x496   : > { %v2016_v31 = vmul.f32 %v2015_v27, %v3642_v8  ;;  %v2017_v62 = vmul.f32 %v2015_v27, %v3635_v34  ;;  %v2028_v49 = vmul.f32 %v2027_v24, %v3644_v3  ;;  %v2029_v37 = vmul.f32 %v2027_v24, %v3646_v21 }
 0x497   : > { %v2048_v39 = vmul.f32 %v2047_v16, %v3640_v57  ;;  %v2049_v40 = vmul.f32 %v2047_v16, %v3653_v60  ;;  %v2018_v43 = vmul.f32 %v2015_v27, %v3631_v10  ;;  %v2019_v45 = vmul.f32 %v2015_v27, %v3663_v15 }
 0x498   : > { %v2036_v46 = vadd.f32 %v2028_v49, %v2016_v31  ;;  %v2037_v51 = vadd.f32 %v2029_v37, %v2017_v62  ;;  %v2030_v1 = vmul.f32 %v2027_v24, %v3633_v28  ;;  %v2031_v8 = vmul.f32 %v2027_v24, %v3665_v52 }
 0x499   : > { %v2050_v34 = vmul.f32 %v2047_v16, %v3660_v29  ;;  %v2051_v3 = vmul.f32 %v2047_v16, %v3673_v22  ;;  %v2020_v21 = vmul.f32 %v2015_v27, %v3668_v63  ;;  %v2021_v57 = vmul.f32 %v2015_v27, %v3688_v55 }
 0x49a   : > { %v2056_v38 = vadd.f32 %v2048_v39, %v2036_v46  ;;  %v2057_v60 = vadd.f32 %v2049_v40, %v2037_v51  ;;  %v2038_v58 = vadd.f32 %v2030_v1, %v2018_v43  ;;  %v2039_v10 = vadd.f32 %v2031_v8, %v2019_v45 }
 0x49b   : > { %v2032_v15 = vmul.f32 %v2027_v24, %v3677_v33  ;;  %v2033_v7 = vmul.f32 %v2027_v24, %v3679_v35  ;;  %v2052_v28 = vmul.f32 %v2047_v16, %v3683_v32  ;;  %v2053_v52 = vmul.f32 %v2047_v16, %v3691_v44 }
 0x49c   : > { %v2064_v42 = vpack.c.bf16 %v2057_v60, %v2056_v38  ;;  %v2058_v29 = vadd.f32 %v2050_v34, %v2038_v58  ;;  %v2059_v9 = vadd.f32 %v2051_v3, %v2039_v10  ;;  %v2022_v22 = vmul.f32 %v2015_v27, %v3696_v48 }
 0x49d   : > { %v2040_v63 = vadd.f32 %v2032_v15, %v2020_v21  ;;  %v2041_v0 = vadd.f32 %v2033_v7, %v2021_v57  ;;  %v2023_v55 = vmul.f32 %v2015_v27, %v3703_v30  ;;  %v2034_v41 = vmul.f32 %v2027_v24, %v3698_v2 }
 0x49e   : > { %2587 = vmatprep.mubr.bf16.mxu1 %v2064_v42  ;;  %v2065_v33 = vpack.c.bf16 %v2059_v9, %v2058_v29  ;;  %v2035_v35 = vmul.f32 %v2027_v24, %v3705_v50  ;;  %v2054_v36 = vmul.f32 %v2047_v16, %v3701_v17  ;;  %v2055_v48 = vmul.f32 %v2047_v16, %v3710_v4  ;;  %v2365_v50 = vld [vmem:[%s3882_s14] ss:$0 sm:$0xff] }
 0x49f   : > { %v2060_v32 = vadd.f32 %v2052_v28, %v2040_v63  ;;  %v2061_v25 = vadd.f32 %v2053_v52, %v2041_v0  ;;  %v2042_v44 = vadd.f32 %v2034_v41, %v2022_v22 }
 0x4a0   : > { %2588 = vmatmul.mubr.bf16.vlgmr.msra.gmra.mrb[12].mxu1 %v2065_v33  ;;  %v2043_v11 = vadd.f32 %v2035_v35, %v2023_v55 }
 0x4a1   : > { %v2066_v12 = vpack.c.bf16 %v2061_v25, %v2060_v32  ;;  %v2062_v23 = vadd.f32 %v2054_v36, %v2042_v44 }
 0x4a2   : > { %v2063_v30 = vadd.f32 %v2055_v48, %v2043_v11 }
 0x4a3   : > { %2591 = vmatprep.mubr.bf16.mxu1 %v2066_v12 }
 0x4a4   : > { %v2067_v2 = vpack.c.bf16 %v2063_v30, %v2062_v23 }
 0x4a8   : > { %2592 = vmatmul.mubr.bf16.gmra.mrb[16].mxu1 %v2067_v2 }
 0x573   : > { %v2589_v26 = vpop.f32.mrb[12].mxu1 }
 0x574   : > { %v2182_v17 = vadd.f32 %v2589_v26, %v2365_v50  ;;  %v2173_v13 = vpop.f32.mrb[13].mxu1 }
 0x575   : > { %v2174_v5 = vadd.f32 %v2365_v50, %v2173_v13  ;;  %v2590_v56 = vpop.f32.mrb[14].mxu1 }
 0x576   : > { %2206 = vst [vmem:[%s517_s27 + $0x10] sm:$0xff] %v2182_v17  ;;  %v2185_v4 = vadd.f32 %v2590_v56, %v2365_v50  ;;  %v2176_v14 = vpop.f32.mrb[15].mxu1 }
 0x577   : > { %2204 = vst [vmem:[%s517_s27] sm:$0xff] %v2174_v5  ;;  %v2177_v19 = vadd.f32 %v2365_v50, %v2176_v14 }
 0x578   : > { %2207 = vst [vmem:[%s517_s27 + $0x18] sm:$0xff] %v2185_v4 }
 0x579   : > { %2205 = vst [vmem:[%s517_s27 + $0x8] sm:$0xff] %v2177_v19 }
 0x57b   : > { %v2593_v18 = vpop.f32.mrb[16].mxu1 }
 0x57c   : > { %v2198_v6 = vadd.f32 %v2593_v18, %v2365_v50  ;;  %v2189_v59 = vpop.f32.mrb[17].mxu1 }
 0x57d   : > { %v2190_v47 = vadd.f32 %v2365_v50, %v2189_v59  ;;  %v2594_v54 = vpop.f32.mrb[18].mxu1 }
 0x57e   : > { %2210 = vst [vmem:[%s517_s27 + $0x30] sm:$0xff] %v2198_v6  ;;  %v2201_v20 = vadd.f32 %v2594_v54, %v2365_v50  ;;  %v2192_v61 = vpop.f32.mrb[19].mxu1 }
 0x57f   : > { %2208 = vst [vmem:[%s517_s27 + $0x20] sm:$0xff] %v2190_v47  ;;  %v2193_v53 = vadd.f32 %v2365_v50, %v2192_v61 }
 0x580   : > { %2211 = vst [vmem:[%s517_s27 + $0x38] sm:$0xff] %v2201_v20 }
 0x581   : > { %2209 = vst [vmem:[%s517_s27 + $0x28] sm:$0xff] %v2193_v53 }
 0x582   : > { %2753 = shalt.err (!%p2750_p3)
}
 0x583   : > { %s2754_s16 = scalar_lea.hbm %s3821_s30, 1024  ;;  %s2758_s23 = scalar_lea.hbm %s3883_s15, 2048 }
 0x584   : > { %p2755_p4 = scmp.ne.s32.totalorder %s3821_s30, %s2754_s16  ;;  %p2759_p9 = scmp.lt.u32.totalorder %s3821_s30, %s3883_s15 }
 0x585   : > { %p2760_p10 = scmp.lt.u32.totalorder %s2758_s23, %s2754_s16  ;;  %p2762_p12 = scmp.lt.u32.totalorder %s2754_s16, %s3821_s30 }
 0x586   : > { %p2756_p7 = pnand %p2755_p4, %p2935_p5 }
 0x587   : > { %p2761_p11 = por %p2760_p10, %p2759_p9 }
 0x588   : > { %p2757_p8 = pneg %p2756_p7 }
 0x589   : > { %p2763_p13 = por %p2762_p12, %p2761_p11 }
 0x58b   : > { %p2764_p0 = pnand %p2763_p13, %p2757_p8 }
 0x58d   : > { %2767 = shalt.err (!%p2764_p0)
}
 0x58e   : > { %s2815_s20 = smov 128   ;;  %s2816_s1 = smov 8  }
 0x58f   : > { %2633 = dma.vmem_to_hbm [thread:$0]  (%p2935_p5), %s3823_s29, 1024, %s3821_s30, %s3827_s22, %s2815_s20, %s2815_s20, %s2816_s1  }
 0x590 PF: > { %p2639_p1 = scmp.ge.s32.totalorder %s2802_s21, 2  ;;  %s2241_s27 = sand.u32 1, %s2790_s18  }
 0x591   : > { %s2242_s16 = scalar_lea.sflag [#allocation6], %s2241_s27 }
 0x592   : > { %p2636_p2 = pnand %p2639_p1, %p2939_p6 }
 0x594   : > { %2785 = dma.done.wait (!%p2636_p2), %s2242_s16, 1024  }
 0x595   : > { %2787 = vsyncadd (!%p2636_p2), %s2242_s16, 4294966272  ;;  %s3897_s21 = sld [smem:[#allocation9_spill]]  ;;  %s3898_s17 = sld [smem:[#allocation8_spill]] }
 0x596   : > { %s3899_s20 = sld [smem:[#allocation10_spill]]  ;;  %s3900_s18 = smov %s2794_s19 }
 0x59b   : > { %p25_p3 = scmp.ge.s32.totalorder %s3897_s21, 4   ;;  %s3901_s19 = smov %s3898_s17 }
 0x59d   :  { %27 = sbr.rel (!%p25_p3) target bundleno = 5 (0x5), region = 121 }
 0x5a4   :  { %2247 = vsyncpa [#allocation6], 1 }
 0x5a5   :  { %2249 = vsyncpa [#allocation6 + $0x1], 1 }

</bundles_post_ra>
